<compile_context>
chip_gen: v7x
topology: tpu7x:2x2x1
jax: 0.10.0
libtpu: 0.0.40
codegen_flags: <defaults>
</compile_context>

<pallas_src>
import functools
import math

import jax
import jax.numpy as jnp
from jax.experimental import pallas as pl
from jax.experimental.pallas import tpu as pltpu

EPS = 1e-7
LANE = 128


def _round_up(x, m):
    return (x + m - 1) // m * m


# ---------------------------------------------------------------------------
# Kernel: in-kernel coalesced gather + exp scores + global-Z partial sums +
# momentum update of the positive rows.  grid = (num_K_tiles,), sequential.
# ---------------------------------------------------------------------------
def _score_kernel(idx_ref, y_ref,                              # scalar prefetch (SMEM)
                  l_ref, ab_ref, mem_hbm,                      # inputs
                  score_l_ref, score_ab_ref, zsum_ref, upd_ref,  # outputs
                  buf_ref, qn_ref, rowbuf_ref, zacc_ref, gsem, rsem,  # scratch
                  *, T, momentum, eps, k1, B, TK, Dp):
    kt = pl.program_id(0)
    nkt = pl.num_programs(0)
    slot = kt % 2

    # -- gather one K tile: one coalesced DMA per (b, k) row of the fused bank,
    # -- per-(slot, b) semaphores so the wait is one bulk descriptor per row.
    def issue_row_gather(tile, buf_slot, b):
        base = tile * TK

        @pl.loop(0, TK)
        def _issue(k):
            row = idx_ref[b, base + k]
            pltpu.make_async_copy(
                mem_hbm.at[pl.ds(row, 1)],                 # (1, 2*Dp) HBM row
                buf_ref.at[buf_slot, b, pl.ds(k, 1)],      # (1, 2*Dp) VMEM slot
                gsem.at[buf_slot, b]).start()

    def issue_tile(tile, buf_slot):
        for b in range(B):                                  # static: no div/mod
            issue_row_gather(tile, buf_slot, b)

    # ---- one-time init ------------------------------------------------------
    @pl.when(kt == 0)
    def _init():
        # Start the tile-0 gather and the positive-row gather FIRST so the DMAs
        # overlap the normalization below (and, for the rows, the whole K loop).
        issue_tile(0, 0)
        for b in range(B):
            pltpu.make_async_copy(
                mem_hbm.at[pl.ds(y_ref[b], 1)],
                rowbuf_ref.at[b],
                rsem.at[0]).start()

        lv = l_ref[...].astype(jnp.float32)                 # (B, 1, Dp)
        abv = ab_ref[...].astype(jnp.float32)
        ln = lv / (jnp.sqrt(jnp.sum(lv * lv, axis=-1, keepdims=True)) + eps)
        abn = abv / (jnp.sqrt(jnp.sum(abv * abv, axis=-1, keepdims=True)) + eps)
        qn_ref[:, :, :Dp] = ln                              # [l_norm | ab_norm]
        qn_ref[:, :, Dp:] = abn
        zacc_ref[0] = jnp.float32(0.0)
        zacc_ref[1] = jnp.float32(0.0)

    # ---- wait for this tile's gathered rows: ONE bulk wait per batch row -----
    for b in range(B):
        pltpu.make_async_copy(buf_ref.at[slot, b], buf_ref.at[slot, b],
                              gsem.at[slot, b]).wait()

    # ---- prefetch the next K tile into the other slot (overlaps compute) -----
    @pl.when(kt + 1 < nkt)
    def _prefetch():
        issue_tile(kt + 1, 1 - slot)

    # ---- scores: VPU multiply + lane reduce (q=1 per row -> MXU not useful) --
    inv_T = 1.0 / T
    w = buf_ref[slot].astype(jnp.float32)                   # (B, TK, 2*Dp)
    qn = qn_ref[...]                                        # (B, 1,  2*Dp)
    prod = w * qn
    s_l = jnp.sum(prod[:, :, :Dp], axis=-1)                 # (B, TK)  <w_ab, l_n>
    s_ab = jnp.sum(prod[:, :, Dp:], axis=-1)                # (B, TK)  <w_l, ab_n>
    p_l = jnp.exp(s_l * inv_T)
    p_ab = jnp.exp(s_ab * inv_T)
    score_l_ref[...] = p_l                                  # lane-dense exp scores
    score_ab_ref[...] = p_ab

    # ---- global-Z partial sums; padded columns (>= K+1) masked out -----------
    col = kt * TK + jax.lax.broadcasted_iota(jnp.int32, (B, TK), 1)
    valid = col < k1
    zacc_ref[0] = zacc_ref[0] + jnp.sum(jnp.where(valid, p_l, 0.0))
    zacc_ref[1] = zacc_ref[1] + jnp.sum(jnp.where(valid, p_ab, 0.0))

    # ---- finalize: emit Z sums + momentum-updated positive rows ---------------
    @pl.when(kt == nkt - 1)
    def _fin():
        lane = jax.lax.broadcasted_iota(jnp.int32, (1, LANE), 1)
        zsum_ref[...] = jnp.where(lane == 0, zacc_ref[0],
                                  jnp.where(lane == 1, zacc_ref[1], 0.0))

        # one bulk wait for the B positive-row gathers issued at kt == 0
        pltpu.make_async_copy(rowbuf_ref, rowbuf_ref, rsem.at[0]).wait()
        old = rowbuf_ref[...].astype(jnp.float32)           # (B, 1, 2*Dp)
        qn3 = qn_ref[...]

        l_pos = old[:, :, Dp:] * momentum + qn3[:, :, :Dp] * (1.0 - momentum)
        l_pos = l_pos * jax.lax.rsqrt(jnp.sum(l_pos * l_pos, axis=-1, keepdims=True))
        ab_pos = old[:, :, :Dp] * momentum + qn3[:, :, Dp:] * (1.0 - momentum)
        ab_pos = ab_pos * jax.lax.rsqrt(jnp.sum(ab_pos * ab_pos, axis=-1, keepdims=True))

        upd_ref[:, :, :Dp] = ab_pos.astype(upd_ref.dtype)   # fused row layout
        upd_ref[:, :, Dp:] = l_pos.astype(upd_ref.dtype)


# ---------------------------------------------------------------------------
# jitted wrapper around the pallas_call (banks donated -> in-place row update)
# ---------------------------------------------------------------------------
@functools.partial(jax.jit,
                   static_argnames=("T", "momentum", "k1", "tk"),
                   donate_argnames=("memory",))
def _cmc_forward(l, ab, idx, y, memory, *, T, momentum, k1, tk):
    B, D = l.shape
    N, D2 = memory.shape
    Dp = D2 // 2
    K1p = idx.shape[1]
    nkt = K1p // tk

    if D < Dp:                                   # lane-pad features (zeros)
        l = jnp.pad(l, ((0, 0), (0, Dp - D)))
        ab = jnp.pad(ab, ((0, 0), (0, Dp - D)))
    l3 = l.astype(jnp.float32).reshape(B, 1, Dp)
    ab3 = ab.astype(jnp.float32).reshape(B, 1, Dp)

    kernel = functools.partial(_score_kernel, T=T, momentum=momentum, eps=EPS,
                               k1=k1, B=B, TK=tk, Dp=Dp)

    grid_spec = pltpu.PrefetchScalarGridSpec(
        num_scalar_prefetch=2,                               # idx, y -> SMEM
        grid=(nkt,),
        in_specs=[
            pl.BlockSpec((B, 1, Dp), lambda kt, *_: (0, 0, 0)),     # l
            pl.BlockSpec((B, 1, Dp), lambda kt, *_: (0, 0, 0)),     # ab
            pl.BlockSpec(memory_space=pl.ANY),                      # fused bank (HBM)
        ],
        out_specs=[
            pl.BlockSpec((B, tk), lambda kt, *_: (0, kt)),          # exp scores (l)
            pl.BlockSpec((B, tk), lambda kt, *_: (0, kt)),          # exp scores (ab)
            pl.BlockSpec((1, LANE), lambda kt, *_: (0, 0)),         # Z partial sums
            pl.BlockSpec((B, 1, 2 * Dp), lambda kt, *_: (0, 0, 0)),  # new pos rows
        ],
        scratch_shapes=[
            pltpu.VMEM((2, B, tk, 2 * Dp), memory.dtype),  # gather double buffer
            pltpu.VMEM((B, 1, 2 * Dp), jnp.float32),       # [l_norm | ab_norm]
            pltpu.VMEM((B, 1, 2 * Dp), memory.dtype),      # old positive rows
            pltpu.SMEM((2,), jnp.float32),                 # running Z sums
            pltpu.SemaphoreType.DMA((2, B)),               # gather sems (slot, b)
            pltpu.SemaphoreType.DMA((1,)),                 # positive-row sem
        ],
    )

    score_l, score_ab, zsum, upd = pl.pallas_call(
        kernel,
        out_shape=(
            jax.ShapeDtypeStruct((B, K1p), jnp.float32),
            jax.ShapeDtypeStruct((B, K1p), jnp.float32),
            jax.ShapeDtypeStruct((1, LANE), jnp.float32),
            jax.ShapeDtypeStruct((B, 1, 2 * Dp), memory.dtype),
        ),
        grid_spec=grid_spec,
        compiler_params=pltpu.CompilerParams(
            dimension_semantics=("arbitrary",),
            # <= 40 MiB keeps headroom inside v7x's 64 MiB VMEM; well within
            # v5e/v6e's 128 MiB.
            vmem_limit_bytes=40 * 1024 * 1024,
        ),
    )(idx, y, l3, ab3, memory)

    # Z division folded into a fused XLA elementwise + the K+1 slice.
    scale = float(N) / float(B * k1)
    inv_zl = 1.0 / (zsum[0, 0] * scale)
    inv_zab = 1.0 / (zsum[0, 1] * scale)
    out_l = (score_l[:, :k1] * inv_zl)[:, :, None]
    out_ab = (score_ab[:, :k1] * inv_zab)[:, :, None]

    # bank is donated: only the B updated rows move, no full (N, 2*Dp) copy.
    new_memory = memory.at[y].set(upd[:, 0, :].astype(memory.dtype))
    return out_l, out_ab, new_memory


class CMCScoreInfoNCE:
    """JAX/Pallas port of the PyTorch CMCScore_infonce forward pass.

    The two feature banks are stored fused along the feature dim as a single
    (N, 2*Dp) float32 array ([memory_ab | memory_l] per row, lane padded), so
    each gathered index needs exactly one DMA.
    """

    def __init__(self, feat_dim, N, K, T=0.5, momentum=0.5, seed=0, k_tile=256):
        self.N = int(N)
        self.K = int(K)
        self.feat_dim = int(feat_dim)
        self.T = float(T)
        self.momentum = float(momentum)
        self.eps = EPS
        # Gather scratch is 2 * B * k_tile * 2*Dp * 4 bytes: 256 keeps it small
        # enough for v7x's 64 MiB VMEM; v5e/v6e (128 MiB) can use 512.
        self.k_tile = _round_up(int(k_tile), LANE)
        self.Dp = _round_up(self.feat_dim, LANE)

        stdv = 1.0 / math.sqrt(feat_dim / 3)
        key_l, key_ab, key_idx = jax.random.split(jax.random.PRNGKey(seed), 3)
        mem_l = jax.random.uniform(key_l, (N, feat_dim), jnp.float32) * (2 * stdv) - stdv
        mem_ab = jax.random.uniform(key_ab, (N, feat_dim), jnp.float32) * (2 * stdv) - stdv
        pad = ((0, 0), (0, self.Dp - feat_dim))
        # Fused bank row = [memory_ab_row | memory_l_row]; lane-pad columns are
        # identically zero and stay zero through the momentum update.
        self.memory = jnp.concatenate(
            [jnp.pad(mem_ab, pad), jnp.pad(mem_l, pad)], axis=1).astype(jnp.float32)
        self._idx_key = key_idx

    # unpadded views of the two banks (for inspection)
    @property
    def memory_ab(self):
        return self.memory[:, :self.feat_dim]

    @property
    def memory_l(self):
        return self.memory[:, self.Dp:self.Dp + self.feat_dim]

    def __call__(self, l, ab, y, idx=None):
        B = l.shape[0]
        K1 = self.K + 1
        y = jnp.asarray(y, jnp.int32)
        if idx is None:
            # TODO(synk): torch.multinomial(ones, replacement=True) == uniform
            # sampling with replacement; jax.random.randint stand-in.
            self._idx_key, sub = jax.random.split(self._idx_key)
            idx = jax.random.randint(sub, (B, K1), 0, self.N, dtype=jnp.int32)
            idx = idx.at[:, 0].set(y)
        idx = jnp.asarray(idx, jnp.int32)

        tk = min(self.k_tile, _round_up(K1, LANE))       # lane-dense K tile
        K1p = _round_up(K1, tk)
        # pad with row 0; padded columns are masked out of Z and sliced off
        idx = jnp.pad(idx, ((0, 0), (0, K1p - K1)))

        out_l, out_ab, self.memory = _cmc_forward(
            l, ab, idx, y, self.memory,
            T=self.T, momentum=self.momentum, k1=K1, tk=tk)
        return out_l, out_ab


# ---------------------------------------------------------------------------
# Pure-JAX reference (mirror of the PyTorch forward) for a correctness check.
# ---------------------------------------------------------------------------
def _reference(l, ab, y, idx, memory, T, momentum, N, eps, Dp):
    B, D = l.shape
    pad = ((0, 0), (0, Dp - D))
    l32 = jnp.pad(l, pad).astype(jnp.float32)
    ab32 = jnp.pad(ab, pad).astype(jnp.float32)
    l_n = l32 / (jnp.sqrt(jnp.sum(l32 * l32, 1, keepdims=True)) + eps)
    ab_n = ab32 / (jnp.sqrt(jnp.sum(ab32 * ab32, 1, keepdims=True)) + eps)

    rows = memory[idx].astype(jnp.float32)               # (B, K+1, 2*Dp)
    w_ab = rows[..., :Dp]
    w_l = rows[..., Dp:]
    p_l = jnp.exp(jnp.sum(w_ab * l_n[:, None, :], -1) / T)
    out_l = (p_l / (p_l.mean() * N))[..., None]
    p_ab = jnp.exp(jnp.sum(w_l * ab_n[:, None, :], -1) / T)
    out_ab = (p_ab / (p_ab.mean() * N))[..., None]

    old = memory[y].astype(jnp.float32)
    l_pos = old[:, Dp:] * momentum + l_n * (1 - momentum)
    l_pos = l_pos / jnp.sqrt(jnp.sum(l_pos * l_pos, 1, keepdims=True))
    ab_pos = old[:, :Dp] * momentum + ab_n * (1 - momentum)
    ab_pos = ab_pos / jnp.sqrt(jnp.sum(ab_pos * ab_pos, 1, keepdims=True))
    upd = jnp.concatenate([ab_pos, l_pos], axis=1)
    new_memory = memory.at[y].set(upd.astype(memory.dtype))
    return out_l, out_ab, new_memory


if __name__ == "__main__":
    configs = [
        # (B, feat_dim, N, K, k_tile) ; first config forces 2 K-tiles so the
        # double-buffered gather pipeline is exercised, second is single-tile.
        (4, 32, 64, 200, 128),
        (2, 32, 16, 8, 256),
    ]
    for (B, feat_dim, N, K, k_tile) in configs:
        mod = CMCScoreInfoNCE(feat_dim=feat_dim, N=N, K=K, T=0.5, momentum=0.5,
                              seed=0, k_tile=k_tile)

        key = jax.random.PRNGKey(0)
        kl, kab, kidx, ky = jax.random.split(key, 4)
        l = jax.random.normal(kl, (B, feat_dim), jnp.float32)
        ab = jax.random.normal(kab, (B, feat_dim), jnp.float32)
        y = jax.random.permutation(ky, jnp.arange(N, dtype=jnp.int32))[:B]
        idx = jax.random.randint(kidx, (B, K + 1), 0, N, dtype=jnp.int32)
        idx = idx.at[:, 0].set(y)

        mem0 = jnp.array(mod.memory)      # keep a copy: the bank is donated

        out_l, out_ab = mod(l, ab, y, idx)
        jax.block_until_ready((out_l, out_ab, mod.memory))

        ref_l, ref_ab, ref_mem = _reference(l, ab, y, idx, mem0, mod.T,
                                            mod.momentum, N, mod.eps, mod.Dp)

        assert out_l.shape == (B, K + 1, 1) and out_ab.shape == (B, K + 1, 1)
        assert bool(jnp.all(jnp.isfinite(out_l))) and bool(jnp.all(jnp.isfinite(out_ab)))
        assert jnp.allclose(out_l, ref_l, rtol=2e-2, atol=1e-5), "out_l mismatch"
        assert jnp.allclose(out_ab, ref_ab, rtol=2e-2, atol=1e-5), "out_ab mismatch"
        assert jnp.allclose(mod.memory, ref_mem, rtol=2e-2, atol=1e-3), "memory mismatch"

    print("KERNEL_OK")
</pallas_src>

<mosaic_0001>
module attributes {stable_mosaic.version = 11 : i64} {
  func.func @_score_kernel(%arg0: i32, %arg1: memref<4x256xi32, #tpu.memory_space<smem>>, %arg2: memref<4xi32, #tpu.memory_space<smem>>, %arg3: memref<4x1x128xf32, #tpu.memory_space<vmem>>, %arg4: memref<4x1x128xf32, #tpu.memory_space<vmem>>, %arg5: memref<64x256xf32, #tpu.memory_space<any>>, %arg6: memref<4x128xf32, #tpu.memory_space<vmem>>, %arg7: memref<4x128xf32, #tpu.memory_space<vmem>>, %arg8: memref<1x128xf32, #tpu.memory_space<vmem>>, %arg9: memref<4x1x256xf32, #tpu.memory_space<vmem>>, %arg10: memref<2x4x128x256xf32, #tpu.memory_space<vmem>>, %arg11: memref<4x1x256xf32, #tpu.memory_space<vmem>>, %arg12: memref<4x1x256xf32, #tpu.memory_space<vmem>>, %arg13: memref<2xf32, #tpu.memory_space<smem>>, %arg14: memref<2x4x!tpu.dma_semaphore, #tpu.memory_space<semaphore_mem>>, %arg15: memref<1x!tpu.dma_semaphore, #tpu.memory_space<semaphore_mem>>) attributes {dimension_semantics = [#tpu.dimension_semantics<arbitrary>], iteration_bounds = array<i64: 2>, scalar_prefetch = 2 : i64, scratch_operands = 6 : i64, tpu.core_type = #tpu.core_type<tc>, window_params = [{pipeline_mode = #tpu.pipeline_mode<synchronous>, transform_indices = @transform_0, window_bounds = array<i64: 4, 1, 128>}, {pipeline_mode = #tpu.pipeline_mode<synchronous>, transform_indices = @transform_1, window_bounds = array<i64: 4, 1, 128>}, {}, {transform_indices = @transform_3, window_bounds = array<i64: 4, 128>}, {transform_indices = @transform_4, window_bounds = array<i64: 4, 128>}, {pipeline_mode = #tpu.pipeline_mode<synchronous>, transform_indices = @transform_5, window_bounds = array<i64: 1, 128>}, {pipeline_mode = #tpu.pipeline_mode<synchronous>, transform_indices = @transform_6, window_bounds = array<i64: 4, 1, 256>}]} {
    %c2_i32 = arith.constant 2 : i32
    %c0_i32 = arith.constant 0 : i32
    %0 = arith.cmpi eq, %c2_i32, %c0_i32 : i32
    %c1_i32 = arith.constant 1 : i32
    %1 = arith.select %0, %c1_i32, %c2_i32 : i32
    %2 = arith.remsi %arg0, %1 : i32
    %c0_i32_0 = arith.constant 0 : i32
    %3 = arith.cmpi ne, %2, %c0_i32_0 : i32
    %c0_i32_1 = arith.constant 0 : i32
    %4 = arith.cmpi slt, %2, %c0_i32_1 : i32
    %c0_i32_2 = arith.constant 0 : i32
    %5 = arith.cmpi slt, %1, %c0_i32_2 : i32
    %6 = arith.xori %4, %5 : i1
    %7 = arith.andi %6, %3 : i1
    %8 = arith.addi %2, %1 : i32
    %9 = arith.select %7, %8, %2 : i32
    %c0_i32_3 = arith.constant 0 : i32
    %10 = arith.cmpi eq, %arg0, %c0_i32_3 : i32
    %11 = arith.extui %10 : i1 to i32
    %c0_i32_4 = arith.constant 0 : i32
    %12 = arith.cmpi ne, %11, %c0_i32_4 : i32
    scf.if %12 {
      %c0_i32_56 = arith.constant 0 : i32
      %c128_i32_57 = arith.constant 128 : i32
      %86 = arith.addi %c0_i32_56, %c128_i32_57 : i32
      %c1_i32_58 = arith.constant 1 : i32
      scf.for %arg16 = %c0_i32_56 to %86 step %c1_i32_58  : i32 {
        %c1_i32_113 = arith.constant 1 : i32
        %136 = arith.muli %arg16, %c1_i32_113 : i32
        %c0_i32_114 = arith.constant 0 : i32
        %137 = arith.addi %c0_i32_114, %136 : i32
        %c0_i32_115 = arith.constant 0 : i32
        %138 = arith.addi %c0_i32_115, %137 : i32
        %c0_116 = arith.constant 0 : index
        %139 = arith.index_cast %138 : i32 to index
        %140 = memref.load %arg1[%c0_116, %139] : memref<4x256xi32, #tpu.memory_space<smem>>
        %c0_i32_117 = arith.constant 0 : i32
        %c0_i32_118 = arith.constant 0 : i32
        %c0_i32_119 = arith.constant 0 : i32
        %c0_i32_120 = arith.constant 0 : i32
        %c0_i32_121 = arith.constant 0 : i32
        %141 = tpu.memref_slice %arg5[%140, %c0_i32_121] : memref<64x256xf32, #tpu.memory_space<any>> -> memref<1x256xf32, #tpu.memory_space<any>>
        %c0_i32_122 = arith.constant 0 : i32
        %142 = tpu.memref_slice %arg10[%c0_i32_117, %c0_i32_118, %137, %c0_i32_122] : memref<2x4x128x256xf32, #tpu.memory_space<vmem>> -> memref<1x1x1x256xf32, #tpu.memory_space<vmem>>
        %143 = tpu.memref_squeeze %142 : memref<1x1x1x256xf32, #tpu.memory_space<vmem>> -> memref<1x256xf32, #tpu.memory_space<vmem>>
        %144 = tpu.memref_slice %arg14[%c0_i32_119, %c0_i32_120] : memref<2x4x!tpu.dma_semaphore, #tpu.memory_space<semaphore_mem>> -> memref<1x1x!tpu.dma_semaphore, #tpu.memory_space<semaphore_mem>>
        %145 = tpu.memref_squeeze %144 : memref<1x1x!tpu.dma_semaphore, #tpu.memory_space<semaphore_mem>> -> memref<!tpu.dma_semaphore, #tpu.memory_space<semaphore_mem>>
        tpu.enqueue_dma source(%141 : memref<1x256xf32, #tpu.memory_space<any>>) target(%143 : memref<1x256xf32, #tpu.memory_space<vmem>>) target_semaphore(%145 : memref<!tpu.dma_semaphore, #tpu.memory_space<semaphore_mem>>)
      }
      %c128_i32_59 = arith.constant 128 : i32
      %c0_i32_60 = arith.constant 0 : i32
      %c128_i32_61 = arith.constant 128 : i32
      %87 = arith.addi %c0_i32_60, %c128_i32_61 : i32
      %c1_i32_62 = arith.constant 1 : i32
      scf.for %arg16 = %c0_i32_60 to %87 step %c1_i32_62  : i32 {
        %c1_i32_113 = arith.constant 1 : i32
        %136 = arith.muli %arg16, %c1_i32_113 : i32
        %c0_i32_114 = arith.constant 0 : i32
        %137 = arith.addi %c0_i32_114, %136 : i32
        %c0_i32_115 = arith.constant 0 : i32
        %138 = arith.addi %c0_i32_115, %137 : i32
        %c1_116 = arith.constant 1 : index
        %139 = arith.index_cast %138 : i32 to index
        %140 = memref.load %arg1[%c1_116, %139] : memref<4x256xi32, #tpu.memory_space<smem>>
        %c0_i32_117 = arith.constant 0 : i32
        %c1_i32_118 = arith.constant 1 : i32
        %c0_i32_119 = arith.constant 0 : i32
        %c1_i32_120 = arith.constant 1 : i32
        %c0_i32_121 = arith.constant 0 : i32
        %141 = tpu.memref_slice %arg5[%140, %c0_i32_121] : memref<64x256xf32, #tpu.memory_space<any>> -> memref<1x256xf32, #tpu.memory_space<any>>
        %c0_i32_122 = arith.constant 0 : i32
        %142 = tpu.memref_slice %arg10[%c0_i32_117, %c1_i32_118, %137, %c0_i32_122] : memref<2x4x128x256xf32, #tpu.memory_space<vmem>> -> memref<1x1x1x256xf32, #tpu.memory_space<vmem>>
        %143 = tpu.memref_squeeze %142 : memref<1x1x1x256xf32, #tpu.memory_space<vmem>> -> memref<1x256xf32, #tpu.memory_space<vmem>>
        %144 = tpu.memref_slice %arg14[%c0_i32_119, %c1_i32_120] : memref<2x4x!tpu.dma_semaphore, #tpu.memory_space<semaphore_mem>> -> memref<1x1x!tpu.dma_semaphore, #tpu.memory_space<semaphore_mem>>
        %145 = tpu.memref_squeeze %144 : memref<1x1x!tpu.dma_semaphore, #tpu.memory_space<semaphore_mem>> -> memref<!tpu.dma_semaphore, #tpu.memory_space<semaphore_mem>>
        tpu.enqueue_dma source(%141 : memref<1x256xf32, #tpu.memory_space<any>>) target(%143 : memref<1x256xf32, #tpu.memory_space<vmem>>) target_semaphore(%145 : memref<!tpu.dma_semaphore, #tpu.memory_space<semaphore_mem>>)
      }
      %c128_i32_63 = arith.constant 128 : i32
      %c0_i32_64 = arith.constant 0 : i32
      %c128_i32_65 = arith.constant 128 : i32
      %88 = arith.addi %c0_i32_64, %c128_i32_65 : i32
      %c1_i32_66 = arith.constant 1 : i32
      scf.for %arg16 = %c0_i32_64 to %88 step %c1_i32_66  : i32 {
        %c1_i32_113 = arith.constant 1 : i32
        %136 = arith.muli %arg16, %c1_i32_113 : i32
        %c0_i32_114 = arith.constant 0 : i32
        %137 = arith.addi %c0_i32_114, %136 : i32
        %c0_i32_115 = arith.constant 0 : i32
        %138 = arith.addi %c0_i32_115, %137 : i32
        %c2_116 = arith.constant 2 : index
        %139 = arith.index_cast %138 : i32 to index
        %140 = memref.load %arg1[%c2_116, %139] : memref<4x256xi32, #tpu.memory_space<smem>>
        %c0_i32_117 = arith.constant 0 : i32
        %c2_i32_118 = arith.constant 2 : i32
        %c0_i32_119 = arith.constant 0 : i32
        %c2_i32_120 = arith.constant 2 : i32
        %c0_i32_121 = arith.constant 0 : i32
        %141 = tpu.memref_slice %arg5[%140, %c0_i32_121] : memref<64x256xf32, #tpu.memory_space<any>> -> memref<1x256xf32, #tpu.memory_space<any>>
        %c0_i32_122 = arith.constant 0 : i32
        %142 = tpu.memref_slice %arg10[%c0_i32_117, %c2_i32_118, %137, %c0_i32_122] : memref<2x4x128x256xf32, #tpu.memory_space<vmem>> -> memref<1x1x1x256xf32, #tpu.memory_space<vmem>>
        %143 = tpu.memref_squeeze %142 : memref<1x1x1x256xf32, #tpu.memory_space<vmem>> -> memref<1x256xf32, #tpu.memory_space<vmem>>
        %144 = tpu.memref_slice %arg14[%c0_i32_119, %c2_i32_120] : memref<2x4x!tpu.dma_semaphore, #tpu.memory_space<semaphore_mem>> -> memref<1x1x!tpu.dma_semaphore, #tpu.memory_space<semaphore_mem>>
        %145 = tpu.memref_squeeze %144 : memref<1x1x!tpu.dma_semaphore, #tpu.memory_space<semaphore_mem>> -> memref<!tpu.dma_semaphore, #tpu.memory_space<semaphore_mem>>
        tpu.enqueue_dma source(%141 : memref<1x256xf32, #tpu.memory_space<any>>) target(%143 : memref<1x256xf32, #tpu.memory_space<vmem>>) target_semaphore(%145 : memref<!tpu.dma_semaphore, #tpu.memory_space<semaphore_mem>>)
      }
      %c128_i32_67 = arith.constant 128 : i32
      %c0_i32_68 = arith.constant 0 : i32
      %c128_i32_69 = arith.constant 128 : i32
      %89 = arith.addi %c0_i32_68, %c128_i32_69 : i32
      %c1_i32_70 = arith.constant 1 : i32
      scf.for %arg16 = %c0_i32_68 to %89 step %c1_i32_70  : i32 {
        %c1_i32_113 = arith.constant 1 : i32
        %136 = arith.muli %arg16, %c1_i32_113 : i32
        %c0_i32_114 = arith.constant 0 : i32
        %137 = arith.addi %c0_i32_114, %136 : i32
        %c0_i32_115 = arith.constant 0 : i32
        %138 = arith.addi %c0_i32_115, %137 : i32
        %c3_116 = arith.constant 3 : index
        %139 = arith.index_cast %138 : i32 to index
        %140 = memref.load %arg1[%c3_116, %139] : memref<4x256xi32, #tpu.memory_space<smem>>
        %c0_i32_117 = arith.constant 0 : i32
        %c3_i32_118 = arith.constant 3 : i32
        %c0_i32_119 = arith.constant 0 : i32
        %c3_i32_120 = arith.constant 3 : i32
        %c0_i32_121 = arith.constant 0 : i32
        %141 = tpu.memref_slice %arg5[%140, %c0_i32_121] : memref<64x256xf32, #tpu.memory_space<any>> -> memref<1x256xf32, #tpu.memory_space<any>>
        %c0_i32_122 = arith.constant 0 : i32
        %142 = tpu.memref_slice %arg10[%c0_i32_117, %c3_i32_118, %137, %c0_i32_122] : memref<2x4x128x256xf32, #tpu.memory_space<vmem>> -> memref<1x1x1x256xf32, #tpu.memory_space<vmem>>
        %143 = tpu.memref_squeeze %142 : memref<1x1x1x256xf32, #tpu.memory_space<vmem>> -> memref<1x256xf32, #tpu.memory_space<vmem>>
        %144 = tpu.memref_slice %arg14[%c0_i32_119, %c3_i32_120] : memref<2x4x!tpu.dma_semaphore, #tpu.memory_space<semaphore_mem>> -> memref<1x1x!tpu.dma_semaphore, #tpu.memory_space<semaphore_mem>>
        %145 = tpu.memref_squeeze %144 : memref<1x1x!tpu.dma_semaphore, #tpu.memory_space<semaphore_mem>> -> memref<!tpu.dma_semaphore, #tpu.memory_space<semaphore_mem>>
        tpu.enqueue_dma source(%141 : memref<1x256xf32, #tpu.memory_space<any>>) target(%143 : memref<1x256xf32, #tpu.memory_space<vmem>>) target_semaphore(%145 : memref<!tpu.dma_semaphore, #tpu.memory_space<semaphore_mem>>)
      }
      %c128_i32_71 = arith.constant 128 : i32
      %c0_72 = arith.constant 0 : index
      %90 = memref.load %arg2[%c0_72] : memref<4xi32, #tpu.memory_space<smem>>
      %c0_i32_73 = arith.constant 0 : i32
      %c0_i32_74 = arith.constant 0 : i32
      %c0_i32_75 = arith.constant 0 : i32
      %91 = tpu.memref_slice %arg5[%90, %c0_i32_75] : memref<64x256xf32, #tpu.memory_space<any>> -> memref<1x256xf32, #tpu.memory_space<any>>
      %c0_i32_76 = arith.constant 0 : i32
      %c0_i32_77 = arith.constant 0 : i32
      %92 = tpu.memref_slice %arg12[%c0_i32_73, %c0_i32_76, %c0_i32_77] : memref<4x1x256xf32, #tpu.memory_space<vmem>> -> memref<1x1x256xf32, #tpu.memory_space<vmem>>
      %93 = tpu.memref_squeeze %92 : memref<1x1x256xf32, #tpu.memory_space<vmem>> -> memref<1x256xf32, #tpu.memory_space<vmem>>
      %94 = tpu.memref_slice %arg15[%c0_i32_74] : memref<1x!tpu.dma_semaphore, #tpu.memory_space<semaphore_mem>> -> memref<1x!tpu.dma_semaphore, #tpu.memory_space<semaphore_mem>>
      %95 = tpu.memref_squeeze %94 : memref<1x!tpu.dma_semaphore, #tpu.memory_space<semaphore_mem>> -> memref<!tpu.dma_semaphore, #tpu.memory_space<semaphore_mem>>
      tpu.enqueue_dma source(%91 : memref<1x256xf32, #tpu.memory_space<any>>) target(%93 : memref<1x256xf32, #tpu.memory_space<vmem>>) target_semaphore(%95 : memref<!tpu.dma_semaphore, #tpu.memory_space<semaphore_mem>>)
      %c1_78 = arith.constant 1 : index
      %96 = memref.load %arg2[%c1_78] : memref<4xi32, #tpu.memory_space<smem>>
      %c1_i32_79 = arith.constant 1 : i32
      %c0_i32_80 = arith.constant 0 : i32
      %c0_i32_81 = arith.constant 0 : i32
      %97 = tpu.memref_slice %arg5[%96, %c0_i32_81] : memref<64x256xf32, #tpu.memory_space<any>> -> memref<1x256xf32, #tpu.memory_space<any>>
      %c0_i32_82 = arith.constant 0 : i32
      %c0_i32_83 = arith.constant 0 : i32
      %98 = tpu.memref_slice %arg12[%c1_i32_79, %c0_i32_82, %c0_i32_83] : memref<4x1x256xf32, #tpu.memory_space<vmem>> -> memref<1x1x256xf32, #tpu.memory_space<vmem>>
      %99 = tpu.memref_squeeze %98 : memref<1x1x256xf32, #tpu.memory_space<vmem>> -> memref<1x256xf32, #tpu.memory_space<vmem>>
      %100 = tpu.memref_slice %arg15[%c0_i32_80] : memref<1x!tpu.dma_semaphore, #tpu.memory_space<semaphore_mem>> -> memref<1x!tpu.dma_semaphore, #tpu.memory_space<semaphore_mem>>
      %101 = tpu.memref_squeeze %100 : memref<1x!tpu.dma_semaphore, #tpu.memory_space<semaphore_mem>> -> memref<!tpu.dma_semaphore, #tpu.memory_space<semaphore_mem>>
      tpu.enqueue_dma source(%97 : memref<1x256xf32, #tpu.memory_space<any>>) target(%99 : memref<1x256xf32, #tpu.memory_space<vmem>>) target_semaphore(%101 : memref<!tpu.dma_semaphore, #tpu.memory_space<semaphore_mem>>)
      %c2 = arith.constant 2 : index
      %102 = memref.load %arg2[%c2] : memref<4xi32, #tpu.memory_space<smem>>
      %c2_i32_84 = arith.constant 2 : i32
      %c0_i32_85 = arith.constant 0 : i32
      %c0_i32_86 = arith.constant 0 : i32
      %103 = tpu.memref_slice %arg5[%102, %c0_i32_86] : memref<64x256xf32, #tpu.memory_space<any>> -> memref<1x256xf32, #tpu.memory_space<any>>
      %c0_i32_87 = arith.constant 0 : i32
      %c0_i32_88 = arith.constant 0 : i32
      %104 = tpu.memref_slice %arg12[%c2_i32_84, %c0_i32_87, %c0_i32_88] : memref<4x1x256xf32, #tpu.memory_space<vmem>> -> memref<1x1x256xf32, #tpu.memory_space<vmem>>
      %105 = tpu.memref_squeeze %104 : memref<1x1x256xf32, #tpu.memory_space<vmem>> -> memref<1x256xf32, #tpu.memory_space<vmem>>
      %106 = tpu.memref_slice %arg15[%c0_i32_85] : memref<1x!tpu.dma_semaphore, #tpu.memory_space<semaphore_mem>> -> memref<1x!tpu.dma_semaphore, #tpu.memory_space<semaphore_mem>>
      %107 = tpu.memref_squeeze %106 : memref<1x!tpu.dma_semaphore, #tpu.memory_space<semaphore_mem>> -> memref<!tpu.dma_semaphore, #tpu.memory_space<semaphore_mem>>
      tpu.enqueue_dma source(%103 : memref<1x256xf32, #tpu.memory_space<any>>) target(%105 : memref<1x256xf32, #tpu.memory_space<vmem>>) target_semaphore(%107 : memref<!tpu.dma_semaphore, #tpu.memory_space<semaphore_mem>>)
      %c3 = arith.constant 3 : index
      %108 = memref.load %arg2[%c3] : memref<4xi32, #tpu.memory_space<smem>>
      %c3_i32_89 = arith.constant 3 : i32
      %c0_i32_90 = arith.constant 0 : i32
      %c0_i32_91 = arith.constant 0 : i32
      %109 = tpu.memref_slice %arg5[%108, %c0_i32_91] : memref<64x256xf32, #tpu.memory_space<any>> -> memref<1x256xf32, #tpu.memory_space<any>>
      %c0_i32_92 = arith.constant 0 : i32
      %c0_i32_93 = arith.constant 0 : i32
      %110 = tpu.memref_slice %arg12[%c3_i32_89, %c0_i32_92, %c0_i32_93] : memref<4x1x256xf32, #tpu.memory_space<vmem>> -> memref<1x1x256xf32, #tpu.memory_space<vmem>>
      %111 = tpu.memref_squeeze %110 : memref<1x1x256xf32, #tpu.memory_space<vmem>> -> memref<1x256xf32, #tpu.memory_space<vmem>>
      %112 = tpu.memref_slice %arg15[%c0_i32_90] : memref<1x!tpu.dma_semaphore, #tpu.memory_space<semaphore_mem>> -> memref<1x!tpu.dma_semaphore, #tpu.memory_space<semaphore_mem>>
      %113 = tpu.memref_squeeze %112 : memref<1x!tpu.dma_semaphore, #tpu.memory_space<semaphore_mem>> -> memref<!tpu.dma_semaphore, #tpu.memory_space<semaphore_mem>>
      tpu.enqueue_dma source(%109 : memref<1x256xf32, #tpu.memory_space<any>>) target(%111 : memref<1x256xf32, #tpu.memory_space<vmem>>) target_semaphore(%113 : memref<!tpu.dma_semaphore, #tpu.memory_space<semaphore_mem>>)
      %c0_94 = arith.constant 0 : index
      %c0_95 = arith.constant 0 : index
      %c0_96 = arith.constant 0 : index
      %114 = vector.load %arg3[%c0_94, %c0_95, %c0_96] : memref<4x1x128xf32, #tpu.memory_space<vmem>>, vector<4x1x128xf32>
      %c0_97 = arith.constant 0 : index
      %c0_98 = arith.constant 0 : index
      %c0_99 = arith.constant 0 : index
      %115 = vector.load %arg4[%c0_97, %c0_98, %c0_99] : memref<4x1x128xf32, #tpu.memory_space<vmem>>, vector<4x1x128xf32>
      %116 = arith.mulf %114, %114 : vector<4x1x128xf32>
      %cst_100 = arith.constant dense<0.000000e+00> : vector<4x1xf32>
      %117 = vector.multi_reduction <add>, %116, %cst_100 [2] : vector<4x1x128xf32> to vector<4x1xf32>
      %118 = vector.shape_cast %117 : vector<4x1xf32> to vector<4x1x1xf32>
      %119 = math.sqrt %118 : vector<4x1x1xf32>
      %cst_101 = arith.constant 1.000000e-07 : f32
      %120 = vector.broadcast %cst_101 : f32 to vector<4x1x1xf32>
      %121 = arith.addf %119, %120 : vector<4x1x1xf32>
      %122 = vector.broadcast %121 : vector<4x1x1xf32> to vector<4x1x128xf32>
      %123 = arith.divf %114, %122 : vector<4x1x128xf32>
      %124 = arith.mulf %115, %115 : vector<4x1x128xf32>
      %cst_102 = arith.constant dense<0.000000e+00> : vector<4x1xf32>
      %125 = vector.multi_reduction <add>, %124, %cst_102 [2] : vector<4x1x128xf32> to vector<4x1xf32>
      %126 = vector.shape_cast %125 : vector<4x1xf32> to vector<4x1x1xf32>
      %127 = math.sqrt %126 : vector<4x1x1xf32>
      %cst_103 = arith.constant 1.000000e-07 : f32
      %128 = vector.broadcast %cst_103 : f32 to vector<4x1x1xf32>
      %129 = arith.addf %127, %128 : vector<4x1x1xf32>
      %130 = vector.broadcast %129 : vector<4x1x1xf32> to vector<4x1x128xf32>
      %131 = arith.divf %115, %130 : vector<4x1x128xf32>
      %c0_104 = arith.constant 0 : index
      %c0_105 = arith.constant 0 : index
      %c0_106 = arith.constant 0 : index
      %132 = vector.load %arg11[%c0_104, %c0_105, %c0_106] : memref<4x1x256xf32, #tpu.memory_space<vmem>>, vector<4x1x128xf32>
      tpu.vector_store %arg11[%c0_104, %c0_105, %c0_106], %123 {strides = array<i32>} : memref<4x1x256xf32, #tpu.memory_space<vmem>>, vector<4x1x128xf32>,
      %c0_107 = arith.constant 0 : index
      %c0_108 = arith.constant 0 : index
      %c128 = arith.constant 128 : index
      %133 = vector.load %arg11[%c0_107, %c0_108, %c128] : memref<4x1x256xf32, #tpu.memory_space<vmem>>, vector<4x1x128xf32>
      tpu.vector_store %arg11[%c0_107, %c0_108, %c128], %131 {strides = array<i32>} : memref<4x1x256xf32, #tpu.memory_space<vmem>>, vector<4x1x128xf32>,
      %cst_109 = arith.constant 0.000000e+00 : f32
      %c0_110 = arith.constant 0 : index
      %134 = memref.load %arg13[%c0_110] : memref<2xf32, #tpu.memory_space<smem>>
      memref.store %cst_109, %arg13[%c0_110] : memref<2xf32, #tpu.memory_space<smem>>
      %cst_111 = arith.constant 0.000000e+00 : f32
      %c1_112 = arith.constant 1 : index
      %135 = memref.load %arg13[%c1_112] : memref<2xf32, #tpu.memory_space<smem>>
      memref.store %cst_111, %arg13[%c1_112] : memref<2xf32, #tpu.memory_space<smem>>
    } else {
    }
    %c0_i32_5 = arith.constant 0 : i32
    %c0_i32_6 = arith.constant 0 : i32
    %c0_i32_7 = arith.constant 0 : i32
    %c0_i32_8 = arith.constant 0 : i32
    %c0_i32_9 = arith.constant 0 : i32
    %13 = tpu.memref_slice %arg10[%9, %c0_i32_5, %c0_i32_8, %c0_i32_9] : memref<2x4x128x256xf32, #tpu.memory_space<vmem>> -> memref<1x1x128x256xf32, #tpu.memory_space<vmem>>
    %14 = tpu.memref_squeeze %13 : memref<1x1x128x256xf32, #tpu.memory_space<vmem>> -> memref<128x256xf32, #tpu.memory_space<vmem>>
    %c0_i32_10 = arith.constant 0 : i32
    %c0_i32_11 = arith.constant 0 : i32
    %15 = tpu.memref_slice %arg10[%9, %c0_i32_6, %c0_i32_10, %c0_i32_11] : memref<2x4x128x256xf32, #tpu.memory_space<vmem>> -> memref<1x1x128x256xf32, #tpu.memory_space<vmem>>
    %16 = tpu.memref_squeeze %15 : memref<1x1x128x256xf32, #tpu.memory_space<vmem>> -> memref<128x256xf32, #tpu.memory_space<vmem>>
    %17 = tpu.memref_slice %arg14[%9, %c0_i32_7] : memref<2x4x!tpu.dma_semaphore, #tpu.memory_space<semaphore_mem>> -> memref<1x1x!tpu.dma_semaphore, #tpu.memory_space<semaphore_mem>>
    %18 = tpu.memref_squeeze %17 : memref<1x1x!tpu.dma_semaphore, #tpu.memory_space<semaphore_mem>> -> memref<!tpu.dma_semaphore, #tpu.memory_space<semaphore_mem>>
    tpu.wait_dma2 semaphore(%18 : memref<!tpu.dma_semaphore, #tpu.memory_space<semaphore_mem>>) src(%14 : memref<128x256xf32, #tpu.memory_space<vmem>>) dst(%16 : memref<128x256xf32, #tpu.memory_space<vmem>>)
    %c1_i32_12 = arith.constant 1 : i32
    %c1_i32_13 = arith.constant 1 : i32
    %c1_i32_14 = arith.constant 1 : i32
    %c0_i32_15 = arith.constant 0 : i32
    %c0_i32_16 = arith.constant 0 : i32
    %19 = tpu.memref_slice %arg10[%9, %c1_i32_12, %c0_i32_15, %c0_i32_16] : memref<2x4x128x256xf32, #tpu.memory_space<vmem>> -> memref<1x1x128x256xf32, #tpu.memory_space<vmem>>
    %20 = tpu.memref_squeeze %19 : memref<1x1x128x256xf32, #tpu.memory_space<vmem>> -> memref<128x256xf32, #tpu.memory_space<vmem>>
    %c0_i32_17 = arith.constant 0 : i32
    %c0_i32_18 = arith.constant 0 : i32
    %21 = tpu.memref_slice %arg10[%9, %c1_i32_13, %c0_i32_17, %c0_i32_18] : memref<2x4x128x256xf32, #tpu.memory_space<vmem>> -> memref<1x1x128x256xf32, #tpu.memory_space<vmem>>
    %22 = tpu.memref_squeeze %21 : memref<1x1x128x256xf32, #tpu.memory_space<vmem>> -> memref<128x256xf32, #tpu.memory_space<vmem>>
    %23 = tpu.memref_slice %arg14[%9, %c1_i32_14] : memref<2x4x!tpu.dma_semaphore, #tpu.memory_space<semaphore_mem>> -> memref<1x1x!tpu.dma_semaphore, #tpu.memory_space<semaphore_mem>>
    %24 = tpu.memref_squeeze %23 : memref<1x1x!tpu.dma_semaphore, #tpu.memory_space<semaphore_mem>> -> memref<!tpu.dma_semaphore, #tpu.memory_space<semaphore_mem>>
    tpu.wait_dma2 semaphore(%24 : memref<!tpu.dma_semaphore, #tpu.memory_space<semaphore_mem>>) src(%20 : memref<128x256xf32, #tpu.memory_space<vmem>>) dst(%22 : memref<128x256xf32, #tpu.memory_space<vmem>>)
    %c2_i32_19 = arith.constant 2 : i32
    %c2_i32_20 = arith.constant 2 : i32
    %c2_i32_21 = arith.constant 2 : i32
    %c0_i32_22 = arith.constant 0 : i32
    %c0_i32_23 = arith.constant 0 : i32
    %25 = tpu.memref_slice %arg10[%9, %c2_i32_19, %c0_i32_22, %c0_i32_23] : memref<2x4x128x256xf32, #tpu.memory_space<vmem>> -> memref<1x1x128x256xf32, #tpu.memory_space<vmem>>
    %26 = tpu.memref_squeeze %25 : memref<1x1x128x256xf32, #tpu.memory_space<vmem>> -> memref<128x256xf32, #tpu.memory_space<vmem>>
    %c0_i32_24 = arith.constant 0 : i32
    %c0_i32_25 = arith.constant 0 : i32
    %27 = tpu.memref_slice %arg10[%9, %c2_i32_20, %c0_i32_24, %c0_i32_25] : memref<2x4x128x256xf32, #tpu.memory_space<vmem>> -> memref<1x1x128x256xf32, #tpu.memory_space<vmem>>
    %28 = tpu.memref_squeeze %27 : memref<1x1x128x256xf32, #tpu.memory_space<vmem>> -> memref<128x256xf32, #tpu.memory_space<vmem>>
    %29 = tpu.memref_slice %arg14[%9, %c2_i32_21] : memref<2x4x!tpu.dma_semaphore, #tpu.memory_space<semaphore_mem>> -> memref<1x1x!tpu.dma_semaphore, #tpu.memory_space<semaphore_mem>>
    %30 = tpu.memref_squeeze %29 : memref<1x1x!tpu.dma_semaphore, #tpu.memory_space<semaphore_mem>> -> memref<!tpu.dma_semaphore, #tpu.memory_space<semaphore_mem>>
    tpu.wait_dma2 semaphore(%30 : memref<!tpu.dma_semaphore, #tpu.memory_space<semaphore_mem>>) src(%26 : memref<128x256xf32, #tpu.memory_space<vmem>>) dst(%28 : memref<128x256xf32, #tpu.memory_space<vmem>>)
    %c3_i32 = arith.constant 3 : i32
    %c3_i32_26 = arith.constant 3 : i32
    %c3_i32_27 = arith.constant 3 : i32
    %c0_i32_28 = arith.constant 0 : i32
    %c0_i32_29 = arith.constant 0 : i32
    %31 = tpu.memref_slice %arg10[%9, %c3_i32, %c0_i32_28, %c0_i32_29] : memref<2x4x128x256xf32, #tpu.memory_space<vmem>> -> memref<1x1x128x256xf32, #tpu.memory_space<vmem>>
    %32 = tpu.memref_squeeze %31 : memref<1x1x128x256xf32, #tpu.memory_space<vmem>> -> memref<128x256xf32, #tpu.memory_space<vmem>>
    %c0_i32_30 = arith.constant 0 : i32
    %c0_i32_31 = arith.constant 0 : i32
    %33 = tpu.memref_slice %arg10[%9, %c3_i32_26, %c0_i32_30, %c0_i32_31] : memref<2x4x128x256xf32, #tpu.memory_space<vmem>> -> memref<1x1x128x256xf32, #tpu.memory_space<vmem>>
    %34 = tpu.memref_squeeze %33 : memref<1x1x128x256xf32, #tpu.memory_space<vmem>> -> memref<128x256xf32, #tpu.memory_space<vmem>>
    %35 = tpu.memref_slice %arg14[%9, %c3_i32_27] : memref<2x4x!tpu.dma_semaphore, #tpu.memory_space<semaphore_mem>> -> memref<1x1x!tpu.dma_semaphore, #tpu.memory_space<semaphore_mem>>
    %36 = tpu.memref_squeeze %35 : memref<1x1x!tpu.dma_semaphore, #tpu.memory_space<semaphore_mem>> -> memref<!tpu.dma_semaphore, #tpu.memory_space<semaphore_mem>>
    tpu.wait_dma2 semaphore(%36 : memref<!tpu.dma_semaphore, #tpu.memory_space<semaphore_mem>>) src(%32 : memref<128x256xf32, #tpu.memory_space<vmem>>) dst(%34 : memref<128x256xf32, #tpu.memory_space<vmem>>)
    %c1_i32_32 = arith.constant 1 : i32
    %37 = arith.addi %arg0, %c1_i32_32 : i32
    %c2_i32_33 = arith.constant 2 : i32
    %38 = arith.cmpi slt, %37, %c2_i32_33 : i32
    %39 = arith.extui %38 : i1 to i32
    %c0_i32_34 = arith.constant 0 : i32
    %40 = arith.cmpi ne, %39, %c0_i32_34 : i32
    scf.if %40 {
      %c1_i32_56 = arith.constant 1 : i32
      %86 = arith.addi %arg0, %c1_i32_56 : i32
      %c1_i32_57 = arith.constant 1 : i32
      %87 = arith.subi %c1_i32_57, %9 : i32
      %c128_i32_58 = arith.constant 128 : i32
      %88 = arith.muli %86, %c128_i32_58 : i32
      %c0_i32_59 = arith.constant 0 : i32
      %c128_i32_60 = arith.constant 128 : i32
      %89 = arith.addi %c0_i32_59, %c128_i32_60 : i32
      %c1_i32_61 = arith.constant 1 : i32
      scf.for %arg16 = %c0_i32_59 to %89 step %c1_i32_61  : i32 {
        %c1_i32_78 = arith.constant 1 : i32
        %96 = arith.muli %arg16, %c1_i32_78 : i32
        %c0_i32_79 = arith.constant 0 : i32
        %97 = arith.addi %c0_i32_79, %96 : i32
        %98 = arith.addi %88, %97 : i32
        %c0_80 = arith.constant 0 : index
        %99 = arith.index_cast %98 : i32 to index
        %100 = memref.load %arg1[%c0_80, %99] : memref<4x256xi32, #tpu.memory_space<smem>>
        %c0_i32_81 = arith.constant 0 : i32
        %c0_i32_82 = arith.constant 0 : i32
        %c0_i32_83 = arith.constant 0 : i32
        %101 = tpu.memref_slice %arg5[%100, %c0_i32_83] : memref<64x256xf32, #tpu.memory_space<any>> -> memref<1x256xf32, #tpu.memory_space<any>>
        %c0_i32_84 = arith.constant 0 : i32
        %102 = tpu.memref_slice %arg10[%87, %c0_i32_81, %97, %c0_i32_84] : memref<2x4x128x256xf32, #tpu.memory_space<vmem>> -> memref<1x1x1x256xf32, #tpu.memory_space<vmem>>
        %103 = tpu.memref_squeeze %102 : memref<1x1x1x256xf32, #tpu.memory_space<vmem>> -> memref<1x256xf32, #tpu.memory_space<vmem>>
        %104 = tpu.memref_slice %arg14[%87, %c0_i32_82] : memref<2x4x!tpu.dma_semaphore, #tpu.memory_space<semaphore_mem>> -> memref<1x1x!tpu.dma_semaphore, #tpu.memory_space<semaphore_mem>>
        %105 = tpu.memref_squeeze %104 : memref<1x1x!tpu.dma_semaphore, #tpu.memory_space<semaphore_mem>> -> memref<!tpu.dma_semaphore, #tpu.memory_space<semaphore_mem>>
        tpu.enqueue_dma source(%101 : memref<1x256xf32, #tpu.memory_space<any>>) target(%103 : memref<1x256xf32, #tpu.memory_space<vmem>>) target_semaphore(%105 : memref<!tpu.dma_semaphore, #tpu.memory_space<semaphore_mem>>)
      }
      %c128_i32_62 = arith.constant 128 : i32
      %c128_i32_63 = arith.constant 128 : i32
      %90 = arith.muli %86, %c128_i32_63 : i32
      %c0_i32_64 = arith.constant 0 : i32
      %c128_i32_65 = arith.constant 128 : i32
      %91 = arith.addi %c0_i32_64, %c128_i32_65 : i32
      %c1_i32_66 = arith.constant 1 : i32
      scf.for %arg16 = %c0_i32_64 to %91 step %c1_i32_66  : i32 {
        %c1_i32_78 = arith.constant 1 : i32
        %96 = arith.muli %arg16, %c1_i32_78 : i32
        %c0_i32_79 = arith.constant 0 : i32
        %97 = arith.addi %c0_i32_79, %96 : i32
        %98 = arith.addi %90, %97 : i32
        %c1_80 = arith.constant 1 : index
        %99 = arith.index_cast %98 : i32 to index
        %100 = memref.load %arg1[%c1_80, %99] : memref<4x256xi32, #tpu.memory_space<smem>>
        %c1_i32_81 = arith.constant 1 : i32
        %c1_i32_82 = arith.constant 1 : i32
        %c0_i32_83 = arith.constant 0 : i32
        %101 = tpu.memref_slice %arg5[%100, %c0_i32_83] : memref<64x256xf32, #tpu.memory_space<any>> -> memref<1x256xf32, #tpu.memory_space<any>>
        %c0_i32_84 = arith.constant 0 : i32
        %102 = tpu.memref_slice %arg10[%87, %c1_i32_81, %97, %c0_i32_84] : memref<2x4x128x256xf32, #tpu.memory_space<vmem>> -> memref<1x1x1x256xf32, #tpu.memory_space<vmem>>
        %103 = tpu.memref_squeeze %102 : memref<1x1x1x256xf32, #tpu.memory_space<vmem>> -> memref<1x256xf32, #tpu.memory_space<vmem>>
        %104 = tpu.memref_slice %arg14[%87, %c1_i32_82] : memref<2x4x!tpu.dma_semaphore, #tpu.memory_space<semaphore_mem>> -> memref<1x1x!tpu.dma_semaphore, #tpu.memory_space<semaphore_mem>>
        %105 = tpu.memref_squeeze %104 : memref<1x1x!tpu.dma_semaphore, #tpu.memory_space<semaphore_mem>> -> memref<!tpu.dma_semaphore, #tpu.memory_space<semaphore_mem>>
        tpu.enqueue_dma source(%101 : memref<1x256xf32, #tpu.memory_space<any>>) target(%103 : memref<1x256xf32, #tpu.memory_space<vmem>>) target_semaphore(%105 : memref<!tpu.dma_semaphore, #tpu.memory_space<semaphore_mem>>)
      }
      %c128_i32_67 = arith.constant 128 : i32
      %c128_i32_68 = arith.constant 128 : i32
      %92 = arith.muli %86, %c128_i32_68 : i32
      %c0_i32_69 = arith.constant 0 : i32
      %c128_i32_70 = arith.constant 128 : i32
      %93 = arith.addi %c0_i32_69, %c128_i32_70 : i32
      %c1_i32_71 = arith.constant 1 : i32
      scf.for %arg16 = %c0_i32_69 to %93 step %c1_i32_71  : i32 {
        %c1_i32_78 = arith.constant 1 : i32
        %96 = arith.muli %arg16, %c1_i32_78 : i32
        %c0_i32_79 = arith.constant 0 : i32
        %97 = arith.addi %c0_i32_79, %96 : i32
        %98 = arith.addi %92, %97 : i32
        %c2 = arith.constant 2 : index
        %99 = arith.index_cast %98 : i32 to index
        %100 = memref.load %arg1[%c2, %99] : memref<4x256xi32, #tpu.memory_space<smem>>
        %c2_i32_80 = arith.constant 2 : i32
        %c2_i32_81 = arith.constant 2 : i32
        %c0_i32_82 = arith.constant 0 : i32
        %101 = tpu.memref_slice %arg5[%100, %c0_i32_82] : memref<64x256xf32, #tpu.memory_space<any>> -> memref<1x256xf32, #tpu.memory_space<any>>
        %c0_i32_83 = arith.constant 0 : i32
        %102 = tpu.memref_slice %arg10[%87, %c2_i32_80, %97, %c0_i32_83] : memref<2x4x128x256xf32, #tpu.memory_space<vmem>> -> memref<1x1x1x256xf32, #tpu.memory_space<vmem>>
        %103 = tpu.memref_squeeze %102 : memref<1x1x1x256xf32, #tpu.memory_space<vmem>> -> memref<1x256xf32, #tpu.memory_space<vmem>>
        %104 = tpu.memref_slice %arg14[%87, %c2_i32_81] : memref<2x4x!tpu.dma_semaphore, #tpu.memory_space<semaphore_mem>> -> memref<1x1x!tpu.dma_semaphore, #tpu.memory_space<semaphore_mem>>
        %105 = tpu.memref_squeeze %104 : memref<1x1x!tpu.dma_semaphore, #tpu.memory_space<semaphore_mem>> -> memref<!tpu.dma_semaphore, #tpu.memory_space<semaphore_mem>>
        tpu.enqueue_dma source(%101 : memref<1x256xf32, #tpu.memory_space<any>>) target(%103 : memref<1x256xf32, #tpu.memory_space<vmem>>) target_semaphore(%105 : memref<!tpu.dma_semaphore, #tpu.memory_space<semaphore_mem>>)
      }
      %c128_i32_72 = arith.constant 128 : i32
      %c128_i32_73 = arith.constant 128 : i32
      %94 = arith.muli %86, %c128_i32_73 : i32
      %c0_i32_74 = arith.constant 0 : i32
      %c128_i32_75 = arith.constant 128 : i32
      %95 = arith.addi %c0_i32_74, %c128_i32_75 : i32
      %c1_i32_76 = arith.constant 1 : i32
      scf.for %arg16 = %c0_i32_74 to %95 step %c1_i32_76  : i32 {
        %c1_i32_78 = arith.constant 1 : i32
        %96 = arith.muli %arg16, %c1_i32_78 : i32
        %c0_i32_79 = arith.constant 0 : i32
        %97 = arith.addi %c0_i32_79, %96 : i32
        %98 = arith.addi %94, %97 : i32
        %c3 = arith.constant 3 : index
        %99 = arith.index_cast %98 : i32 to index
        %100 = memref.load %arg1[%c3, %99] : memref<4x256xi32, #tpu.memory_space<smem>>
        %c3_i32_80 = arith.constant 3 : i32
        %c3_i32_81 = arith.constant 3 : i32
        %c0_i32_82 = arith.constant 0 : i32
        %101 = tpu.memref_slice %arg5[%100, %c0_i32_82] : memref<64x256xf32, #tpu.memory_space<any>> -> memref<1x256xf32, #tpu.memory_space<any>>
        %c0_i32_83 = arith.constant 0 : i32
        %102 = tpu.memref_slice %arg10[%87, %c3_i32_80, %97, %c0_i32_83] : memref<2x4x128x256xf32, #tpu.memory_space<vmem>> -> memref<1x1x1x256xf32, #tpu.memory_space<vmem>>
        %103 = tpu.memref_squeeze %102 : memref<1x1x1x256xf32, #tpu.memory_space<vmem>> -> memref<1x256xf32, #tpu.memory_space<vmem>>
        %104 = tpu.memref_slice %arg14[%87, %c3_i32_81] : memref<2x4x!tpu.dma_semaphore, #tpu.memory_space<semaphore_mem>> -> memref<1x1x!tpu.dma_semaphore, #tpu.memory_space<semaphore_mem>>
        %105 = tpu.memref_squeeze %104 : memref<1x1x!tpu.dma_semaphore, #tpu.memory_space<semaphore_mem>> -> memref<!tpu.dma_semaphore, #tpu.memory_space<semaphore_mem>>
        tpu.enqueue_dma source(%101 : memref<1x256xf32, #tpu.memory_space<any>>) target(%103 : memref<1x256xf32, #tpu.memory_space<vmem>>) target_semaphore(%105 : memref<!tpu.dma_semaphore, #tpu.memory_space<semaphore_mem>>)
      }
      %c128_i32_77 = arith.constant 128 : i32
    } else {
    }
    %41 = arith.index_cast %9 : i32 to index
    %c0 = arith.constant 0 : index
    %c0_35 = arith.constant 0 : index
    %c0_36 = arith.constant 0 : index
    %42 = vector.load %arg10[%41, %c0, %c0_35, %c0_36] : memref<2x4x128x256xf32, #tpu.memory_space<vmem>>, vector<1x4x128x256xf32>
    %43 = vector.shape_cast %42 : vector<1x4x128x256xf32> to vector<4x128x256xf32>
    %c0_37 = arith.constant 0 : index
    %c0_38 = arith.constant 0 : index
    %c0_39 = arith.constant 0 : index
    %44 = vector.load %arg11[%c0_37, %c0_38, %c0_39] : memref<4x1x256xf32, #tpu.memory_space<vmem>>, vector<4x1x256xf32>
    %45 = vector.broadcast %44 : vector<4x1x256xf32> to vector<4x128x256xf32>
    %46 = arith.mulf %43, %45 : vector<4x128x256xf32>
    %47 = vector.extract_strided_slice %46 {offsets = [0, 0, 0], sizes = [4, 128, 128], strides = [1, 1, 1]} : vector<4x128x256xf32> to vector<4x128x128xf32>
    %cst = arith.constant dense<0.000000e+00> : vector<4x128xf32>
    %48 = vector.multi_reduction <add>, %47, %cst [2] : vector<4x128x128xf32> to vector<4x128xf32>
    %49 = vector.extract_strided_slice %46 {offsets = [0, 0, 128], sizes = [4, 128, 128], strides = [1, 1, 1]} : vector<4x128x256xf32> to vector<4x128x128xf32>
    %cst_40 = arith.constant dense<0.000000e+00> : vector<4x128xf32>
    %50 = vector.multi_reduction <add>, %49, %cst_40 [2] : vector<4x128x128xf32> to vector<4x128xf32>
    %cst_41 = arith.constant 2.000000e+00 : f32
    %51 = vector.broadcast %cst_41 : f32 to vector<4x128xf32>
    %52 = arith.mulf %48, %51 : vector<4x128xf32>
    %53 = math.exp %52 : vector<4x128xf32>
    %cst_42 = arith.constant 2.000000e+00 : f32
    %54 = vector.broadcast %cst_42 : f32 to vector<4x128xf32>
    %55 = arith.mulf %50, %54 : vector<4x128xf32>
    %56 = math.exp %55 : vector<4x128xf32>
    %c0_43 = arith.constant 0 : index
    %c0_44 = arith.constant 0 : index
    %57 = vector.load %arg6[%c0_43, %c0_44] : memref<4x128xf32, #tpu.memory_space<vmem>>, vector<4x128xf32>
    tpu.vector_store %arg6[%c0_43, %c0_44], %53 {strides = array<i32>} : memref<4x128xf32, #tpu.memory_space<vmem>>, vector<4x128xf32>,
    %c0_45 = arith.constant 0 : index
    %c0_46 = arith.constant 0 : index
    %58 = vector.load %arg7[%c0_45, %c0_46] : memref<4x128xf32, #tpu.memory_space<vmem>>, vector<4x128xf32>
    tpu.vector_store %arg7[%c0_45, %c0_46], %56 {strides = array<i32>} : memref<4x128xf32, #tpu.memory_space<vmem>>, vector<4x128xf32>,
    %c128_i32 = arith.constant 128 : i32
    %59 = arith.muli %arg0, %c128_i32 : i32
    %60 = tpu.iota {dimensions = array<i32: 1>} : vector<4x128xi32>
    %61 = vector.broadcast %59 : i32 to vector<4x128xi32>
    %62 = arith.addi %61, %60 : vector<4x128xi32>
    %c201_i32 = arith.constant 201 : i32
    %63 = vector.broadcast %c201_i32 : i32 to vector<4x128xi32>
    %64 = arith.cmpi slt, %62, %63 : vector<4x128xi32>
    %c0_47 = arith.constant 0 : index
    %65 = memref.load %arg13[%c0_47] : memref<2xf32, #tpu.memory_space<smem>>
    %cst_48 = arith.constant 0.000000e+00 : f32
    %66 = vector.broadcast %cst_48 : f32 to vector<4x128xf32>
    %67 = arith.select %64, %53, %66 : vector<4x128xi1>, vector<4x128xf32>
    %68 = vector.shape_cast %67 : vector<4x128xf32> to vector<1x4x128xf32>
    %cst_49 = arith.constant dense<0.000000e+00> : vector<1xf32>
    %69 = vector.multi_reduction <add>, %68, %cst_49 [1, 2] : vector<1x4x128xf32> to vector<1xf32>
    %70 = vector.shape_cast %69 : vector<1xf32> to vector<1x1x1xf32>
    %71 = vector.extract %70[0, 0, 0] : f32 from vector<1x1x1xf32>
    %72 = arith.addf %65, %71 : f32
    %c0_50 = arith.constant 0 : index
    %73 = memref.load %arg13[%c0_50] : memref<2xf32, #tpu.memory_space<smem>>
    memref.store %72, %arg13[%c0_50] : memref<2xf32, #tpu.memory_space<smem>>
    %c1 = arith.constant 1 : index
    %74 = memref.load %arg13[%c1] : memref<2xf32, #tpu.memory_space<smem>>
    %cst_51 = arith.constant 0.000000e+00 : f32
    %75 = vector.broadcast %cst_51 : f32 to vector<4x128xf32>
    %76 = arith.select %64, %56, %75 : vector<4x128xi1>, vector<4x128xf32>
    %77 = vector.shape_cast %76 : vector<4x128xf32> to vector<1x4x128xf32>
    %cst_52 = arith.constant dense<0.000000e+00> : vector<1xf32>
    %78 = vector.multi_reduction <add>, %77, %cst_52 [1, 2] : vector<1x4x128xf32> to vector<1xf32>
    %79 = vector.shape_cast %78 : vector<1xf32> to vector<1x1x1xf32>
    %80 = vector.extract %79[0, 0, 0] : f32 from vector<1x1x1xf32>
    %81 = arith.addf %74, %80 : f32
    %c1_53 = arith.constant 1 : index
    %82 = memref.load %arg13[%c1_53] : memref<2xf32, #tpu.memory_space<smem>>
    memref.store %81, %arg13[%c1_53] : memref<2xf32, #tpu.memory_space<smem>>
    %c1_i32_54 = arith.constant 1 : i32
    %83 = arith.cmpi eq, %arg0, %c1_i32_54 : i32
    %84 = arith.extui %83 : i1 to i32
    %c0_i32_55 = arith.constant 0 : i32
    %85 = arith.cmpi ne, %84, %c0_i32_55 : i32
    scf.if %85 {
      %86 = tpu.iota {dimensions = array<i32: 1>} : vector<1x128xi32>
      %c0_i32_56 = arith.constant 0 : i32
      %87 = vector.broadcast %c0_i32_56 : i32 to vector<1x128xi32>
      %88 = arith.cmpi eq, %86, %87 : vector<1x128xi32>
      %c0_57 = arith.constant 0 : index
      %89 = memref.load %arg13[%c0_57] : memref<2xf32, #tpu.memory_space<smem>>
      %c1_i32_58 = arith.constant 1 : i32
      %90 = vector.broadcast %c1_i32_58 : i32 to vector<1x128xi32>
      %91 = arith.cmpi eq, %86, %90 : vector<1x128xi32>
      %c1_59 = arith.constant 1 : index
      %92 = memref.load %arg13[%c1_59] : memref<2xf32, #tpu.memory_space<smem>>
      %cst_60 = arith.constant 0.000000e+00 : f32
      %93 = vector.broadcast %92 : f32 to vector<1x128xf32>
      %94 = vector.broadcast %cst_60 : f32 to vector<1x128xf32>
      %95 = arith.select %91, %93, %94 : vector<1x128xi1>, vector<1x128xf32>
      %96 = vector.broadcast %89 : f32 to vector<1x128xf32>
      %97 = arith.select %88, %96, %95 : vector<1x128xi1>, vector<1x128xf32>
      %c0_61 = arith.constant 0 : index
      %c0_62 = arith.constant 0 : index
      %98 = vector.load %arg8[%c0_61, %c0_62] : memref<1x128xf32, #tpu.memory_space<vmem>>, vector<1x128xf32>
      tpu.vector_store %arg8[%c0_61, %c0_62], %97 {strides = array<i32>} : memref<1x128xf32, #tpu.memory_space<vmem>>, vector<1x128xf32>,
      %c0_i32_63 = arith.constant 0 : i32
      %99 = tpu.memref_slice %arg15[%c0_i32_63] : memref<1x!tpu.dma_semaphore, #tpu.memory_space<semaphore_mem>> -> memref<1x!tpu.dma_semaphore, #tpu.memory_space<semaphore_mem>>
      %100 = tpu.memref_squeeze %99 : memref<1x!tpu.dma_semaphore, #tpu.memory_space<semaphore_mem>> -> memref<!tpu.dma_semaphore, #tpu.memory_space<semaphore_mem>>
      tpu.wait_dma2 semaphore(%100 : memref<!tpu.dma_semaphore, #tpu.memory_space<semaphore_mem>>) src(%arg12 : memref<4x1x256xf32, #tpu.memory_space<vmem>>) dst(%arg12 : memref<4x1x256xf32, #tpu.memory_space<vmem>>)
      %c0_64 = arith.constant 0 : index
      %c0_65 = arith.constant 0 : index
      %c0_66 = arith.constant 0 : index
      %101 = vector.load %arg12[%c0_64, %c0_65, %c0_66] : memref<4x1x256xf32, #tpu.memory_space<vmem>>, vector<4x1x256xf32>
      %c0_67 = arith.constant 0 : index
      %c0_68 = arith.constant 0 : index
      %c0_69 = arith.constant 0 : index
      %102 = vector.load %arg11[%c0_67, %c0_68, %c0_69] : memref<4x1x256xf32, #tpu.memory_space<vmem>>, vector<4x1x256xf32>
      %103 = vector.extract_strided_slice %101 {offsets = [0, 0, 128], sizes = [4, 1, 128], strides = [1, 1, 1]} : vector<4x1x256xf32> to vector<4x1x128xf32>
      %cst_70 = arith.constant 5.000000e-01 : f32
      %104 = vector.broadcast %cst_70 : f32 to vector<4x1x128xf32>
      %105 = arith.mulf %103, %104 : vector<4x1x128xf32>
      %106 = vector.extract_strided_slice %102 {offsets = [0, 0, 0], sizes = [4, 1, 128], strides = [1, 1, 1]} : vector<4x1x256xf32> to vector<4x1x128xf32>
      %cst_71 = arith.constant 5.000000e-01 : f32
      %107 = vector.broadcast %cst_71 : f32 to vector<4x1x128xf32>
      %108 = arith.mulf %106, %107 : vector<4x1x128xf32>
      %109 = arith.addf %105, %108 : vector<4x1x128xf32>
      %110 = arith.mulf %109, %109 : vector<4x1x128xf32>
      %cst_72 = arith.constant dense<0.000000e+00> : vector<4x1xf32>
      %111 = vector.multi_reduction <add>, %110, %cst_72 [2] : vector<4x1x128xf32> to vector<4x1xf32>
      %112 = vector.shape_cast %111 : vector<4x1xf32> to vector<4x1x1xf32>
      %113 = math.rsqrt %112 : vector<4x1x1xf32>
      %114 = vector.broadcast %113 : vector<4x1x1xf32> to vector<4x1x128xf32>
      %115 = arith.mulf %109, %114 : vector<4x1x128xf32>
      %116 = vector.extract_strided_slice %101 {offsets = [0, 0, 0], sizes = [4, 1, 128], strides = [1, 1, 1]} : vector<4x1x256xf32> to vector<4x1x128xf32>
      %cst_73 = arith.constant 5.000000e-01 : f32
      %117 = vector.broadcast %cst_73 : f32 to vector<4x1x128xf32>
      %118 = arith.mulf %116, %117 : vector<4x1x128xf32>
      %119 = vector.extract_strided_slice %102 {offsets = [0, 0, 128], sizes = [4, 1, 128], strides = [1, 1, 1]} : vector<4x1x256xf32> to vector<4x1x128xf32>
      %cst_74 = arith.constant 5.000000e-01 : f32
      %120 = vector.broadcast %cst_74 : f32 to vector<4x1x128xf32>
      %121 = arith.mulf %119, %120 : vector<4x1x128xf32>
      %122 = arith.addf %118, %121 : vector<4x1x128xf32>
      %123 = arith.mulf %122, %122 : vector<4x1x128xf32>
      %cst_75 = arith.constant dense<0.000000e+00> : vector<4x1xf32>
      %124 = vector.multi_reduction <add>, %123, %cst_75 [2] : vector<4x1x128xf32> to vector<4x1xf32>
      %125 = vector.shape_cast %124 : vector<4x1xf32> to vector<4x1x1xf32>
      %126 = math.rsqrt %125 : vector<4x1x1xf32>
      %127 = vector.broadcast %126 : vector<4x1x1xf32> to vector<4x1x128xf32>
      %128 = arith.mulf %122, %127 : vector<4x1x128xf32>
      %c0_76 = arith.constant 0 : index
      %c0_77 = arith.constant 0 : index
      %c0_78 = arith.constant 0 : index
      %129 = vector.load %arg9[%c0_76, %c0_77, %c0_78] : memref<4x1x256xf32, #tpu.memory_space<vmem>>, vector<4x1x128xf32>
      tpu.vector_store %arg9[%c0_76, %c0_77, %c0_78], %128 {strides = array<i32>} : memref<4x1x256xf32, #tpu.memory_space<vmem>>, vector<4x1x128xf32>,
      %c0_79 = arith.constant 0 : index
      %c0_80 = arith.constant 0 : index
      %c128 = arith.constant 128 : index
      %130 = vector.load %arg9[%c0_79, %c0_80, %c128] : memref<4x1x256xf32, #tpu.memory_space<vmem>>, vector<4x1x128xf32>
      tpu.vector_store %arg9[%c0_79, %c0_80, %c128], %115 {strides = array<i32>} : memref<4x1x256xf32, #tpu.memory_space<vmem>>, vector<4x1x128xf32>,
    } else {
    }
    return
  }
  func.func @transform_0(%arg0: i32, %arg1: memref<4x256xi32, #tpu.memory_space<smem>>, %arg2: memref<4xi32, #tpu.memory_space<smem>>) -> (i32, i32, i32) {
    %c0_i32 = arith.constant 0 : i32
    %c0_i32_0 = arith.constant 0 : i32
    %c0_i32_1 = arith.constant 0 : i32
    %c0_i32_2 = arith.constant 0 : i32
    return %c0_i32, %c0_i32_0, %c0_i32_1 : i32, i32, i32
  }
  func.func @transform_1(%arg0: i32, %arg1: memref<4x256xi32, #tpu.memory_space<smem>>, %arg2: memref<4xi32, #tpu.memory_space<smem>>) -> (i32, i32, i32) {
    %c0_i32 = arith.constant 0 : i32
    %c0_i32_0 = arith.constant 0 : i32
    %c0_i32_1 = arith.constant 0 : i32
    %c0_i32_2 = arith.constant 0 : i32
    return %c0_i32, %c0_i32_0, %c0_i32_1 : i32, i32, i32
  }
  func.func @transform_3(%arg0: i32, %arg1: memref<4x256xi32, #tpu.memory_space<smem>>, %arg2: memref<4xi32, #tpu.memory_space<smem>>) -> (i32, i32) {
    %c0_i32 = arith.constant 0 : i32
    %c0_i32_0 = arith.constant 0 : i32
    return %c0_i32, %arg0 : i32, i32
  }
  func.func @transform_4(%arg0: i32, %arg1: memref<4x256xi32, #tpu.memory_space<smem>>, %arg2: memref<4xi32, #tpu.memory_space<smem>>) -> (i32, i32) {
    %c0_i32 = arith.constant 0 : i32
    %c0_i32_0 = arith.constant 0 : i32
    return %c0_i32, %arg0 : i32, i32
  }
  func.func @transform_5(%arg0: i32, %arg1: memref<4x256xi32, #tpu.memory_space<smem>>, %arg2: memref<4xi32, #tpu.memory_space<smem>>) -> (i32, i32) {
    %c0_i32 = arith.constant 0 : i32
    %c0_i32_0 = arith.constant 0 : i32
    %c0_i32_1 = arith.constant 0 : i32
    return %c0_i32, %c0_i32_0 : i32, i32
  }
  func.func @transform_6(%arg0: i32, %arg1: memref<4x256xi32, #tpu.memory_space<smem>>, %arg2: memref<4xi32, #tpu.memory_space<smem>>) -> (i32, i32, i32) {
    %c0_i32 = arith.constant 0 : i32
    %c0_i32_0 = arith.constant 0 : i32
    %c0_i32_1 = arith.constant 0 : i32
    %c0_i32_2 = arith.constant 0 : i32
    return %c0_i32, %c0_i32_0, %c0_i32_1 : i32, i32, i32
  }
}

</mosaic_0001>

<bundles_post_ra>
// kernel: _cmc_forward.1
= control target key start
LH: loop header
LB: loop body
LE: loop exit
PB: predicated region body
PF: predicated region fallthrough
CT: control target
= control target key end

     0   :  { %s5086_s0 = inlined_call_operand.vmem [shape: s32[4,256], index: 0, kind: input, shape index: {}]   ;;  %s5087_s2 = inlined_call_operand.vmem [shape: f32[4,1,128], index: 2, kind: input, shape index: {}]   ;;  %s5088_s3 = inlined_call_operand.vmem [shape: f32[4,1,128], index: 3, kind: input, shape index: {}]   ;;  %s5089_s4 = inlined_call_operand.hbm [shape: f32[64,256], index: 4, kind: input, shape index: {}]   ;;  %s5090_s5 = inlined_call_operand.vmem [shape: f32[4,256], index: 5, kind: output, shape index: {0}]   ;;  %s5091_s6 = inlined_call_operand.vmem [shape: f32[4,256], index: 6, kind: output, shape index: {1}]   ;;  %s5092_s7 = inlined_call_operand.vmem [shape: f32[1,128], index: 7, kind: output, shape index: {2}]   ;;  %s5093_s8 = inlined_call_operand.vmem [shape: f32[4,1,256], index: 8, kind: output, shape index: {3}]   ;;  %s5094_s1 = inlined_call_operand.vmem [shape: s32[4], index: 1, kind: input, shape index: {}]  }
   0x1   :  { %5097 = sst [smem:[#allocation32_spill]] %s5087_s2  ;;  %s14_s29 = sshll.u32 %s5086_s0, 4  ;;  %s15_s29 = int_to_ptr.vmem [resolvable:$true] %s14_s29 }
   0x2   :  { %5098 = sst [smem:[#allocation33_spill]] %s5088_s3  ;;  %s18_s10 = sshll.u32 %s5094_s1, 4  ;;  %s19_s10 = int_to_ptr.vmem [resolvable:$true] %s18_s10 }
   0x3   :  { %5099 = sst [smem:[#allocation34_spill]] %s5090_s5  ;;  %s3429_s11 = scalar_lea.vmem %s15_s29, 128 }
   0x4   :  { %5100 = sst [smem:[#allocation35_spill]] %s5091_s6  ;;  %p3430_p0 = scmp.ne.s32.totalorder %s15_s29, %s3429_s11 }
   0x5   :  { %5101 = sst [smem:[#allocation36_spill]] %s5092_s7  ;;  %p3434_p1 = scmp.lt.s32.totalorder %s15_s29, %s15_s29 }
   0x6   :  { %5102 = sst [smem:[#allocation37_spill]] %s5093_s8  ;;  %p3435_p2 = scmp.lt.s32.totalorder %s3429_s11, %s3429_s11 }
   0x8   :  { %p3436_p3 = por %p3435_p2, %p3434_p1 }
   0xa   :  { %p3437_p4 = pnand %p3436_p3, %p3430_p0 }
   0xc   :  { %3440 = shalt.err (!%p3437_p4)  }
   0xd   :  { %s3825_s12 = smov [#allocation9]   ;;  %s3441_s13 = scalar_lea.vmem %s19_s10, 16 }
   0xe   :  { %17 = dma.vmem_to_smem %s15_s29, 128, %s3825_s12, [#allocation8] }
   0xf   :  { %p3442_p5 = scmp.ne.s32.totalorder %s19_s10, %s3441_s13  ;;  %p3446_p6 = scmp.lt.s32.totalorder %s19_s10, %s19_s10 }
  0x10   :  { %p3447_p7 = scmp.lt.s32.totalorder %s3441_s13, %s3441_s13 }
  0x12   :  { %p3448_p8 = por %p3447_p7, %p3446_p6 }
  0x14   :  { %p3449_p9 = pnand %p3448_p8, %p3442_p5 }
  0x16   :  { %3452 = shalt.err (!%p3449_p9)  }
  0x17   :  { %s3826_s0 = smov [#allocation10]  }
  0x18   :  { %21 = dma.vmem_to_smem %s19_s10, 16, %s3826_s0, [#allocation8] }
  0x19   :  { %3777 = dma.done.wait [#allocation8], 144 }
  0x1a   :  { %3778 = vsyncadd [#allocation8], 4294967152 }
  0x1b   :  { %23 = sfence }
  0x1c   :  { %s3904_s1 = smov 0  }
  0x1d LB: > { %5103 = sst [smem:[#allocation29_spill]] %s3791_s1  ;;  %s3910_s14 = sadd.s32 4294967295, %s3791_s1   ;;  %s3791_s1 = sphi %s3904_s1, %s29_s1  }
  0x1e   : > { %p2939_p10 = scmp.ge.s32.totalorder %s3791_s1, 1  ;;  %p187_p11 = scmp.lt.s32.totalorder %s3791_s1, 3 }
  0x20   : > { %p188_p12 = pnand %p2939_p10, %p187_p11 }
  0x22   : > { %191 = sbr.rel (%p188_p12) target bundleno = 1447 (0x5a7), region = 28 }
  0x29   : > { %p213_p13 = scmp.lt.s32.totalorder %s3910_s14, 1  ;;  %s222_s15 = ssub.s32 0, %s3910_s14 }
  0x2a   : > { %p221_p0 = scmp.lt.s32.totalorder %s3910_s14, 0  ;;  %s2942_s17 = smin.u32 %s3910_s14, %s222_s15 }
  0x2b   : > { %s214_s16 = scalar_select %p213_p13, %s3910_s14, 1 }
  0x2c   : > { %s224_s19 = sand.u32 1, %s2942_s17   ;;  %s5104_s5 = sld [smem:[#allocation34_spill]] }
  0x2d   : > { %s2940_s18 = sshll.u32 %s214_s16, 2  ;;  %s5106_s6 = sld [smem:[#allocation35_spill]] }
  0x2e   : > { %s225_s26 = ssub.s32 0, %s224_s19  ;;  %p2945_p2 = scmp.ne.s32.totalorder %s3910_s14, 0 }
  0x2f   : > { %s5120_s26 = smov (!%p221_p0, %s225_s26), %s224_s19  ;;  %s3932_s28 = smov (!%p2945_p2), 0  }
  0x30   : > { %p2944_p1 = scmp.lt.s32.totalorder %s5120_s26, 0  ;;  %s231_s27 = sadd.s32 2, %s5120_s26 }
  0x31   : > { %236 = sbr.rel (%p2945_p2) target bundleno = 422 (0x1a6), region = 32 }
  0x32   : > { %s3922_s22 = scalar_lea.vmem %s5104_s5, %s2940_s18  ;;  %s5122_s27 = smov (!%p2944_p1, %s231_s27), %s5120_s26 }
  0x33   : > { %5105 = sst [smem:[#allocation30_spill]] %s3922_s22  ;;  %s3927_s25 = scalar_lea.vmem %s5106_s6, %s2940_s18 }
  0x34   : > { %5107 = sst [smem:[#allocation31_spill]] %s3927_s25 }
  0x38 LB: >> { %s243_s29 = sshra.s32 %s3795_s28, 7  ;;  %s247_s30 = sand.u32 127, %s3795_s28  ;;  %s3795_s28 = sphi %s3932_s28, %s242_s28  }
  0x39   : >> { %s2946_s9 = sshll.u32 %s243_s29, 9  ;;  %s256_s10 = sshrl.u32 %s3795_s28, 3 }
  0x3a   : >> { %s248_s11 = sadd.s32 %s2946_s9, %s247_s30  ;;  %s257_s12 = sand.u32 7, %s3795_s28  }
  0x3b   : >> { %s249_s13 = sld [smem:[#allocation9 + %s248_s11]]  ;;  %s2949_s0 = sshll.u32 %s256_s10, 4 }
  0x3c   : >> { %s259_s15 = sadd.s32 %s2949_s0, %s257_s12  ;;  %s3949_s10 = scalar_lea.hbm %s5089_s4, 2048 }
  0x3d   : >> { %s260_s16 = scalar_lea.vmem [#allocation2], %s259_s15 }
  0x3e   : >> { %s262_s17 = sshll.u32 %s260_s16, 4  ;;  %s3941_s17 = int_to_ptr.vmem [resolvable:$true] %s262_s17 }
  0x41   : >> { %s250_s18 = sshrl.u32 %s249_s13, 3  ;;  %s251_s19 = sand.u32 7, %s249_s13  }
  0x42   : >> { %s2947_s20 = sshll.u32 %s250_s18, 4 }
  0x43   : >> { %s253_s21 = sadd.s32 %s2947_s20, %s251_s19 }
  0x44   : >> { %s2948_s23 = sshll.u32 %s253_s21, 4 }
  0x45   : >> { %s255_s5 = scalar_lea.hbm %s5089_s4, %s2948_s23 }
  0x46   : >> { %s3453_s29 = scalar_lea.hbm %s255_s5, 32  ;;  %p3456_p4 = scmp.lt.u32.totalorder %s255_s5, %s5089_s4 }
  0x47   : >> { %p3454_p3 = scmp.ne.s32.totalorder %s255_s5, %s3453_s29  ;;  %p3457_p5 = scmp.lt.u32.totalorder %s3949_s10, %s3453_s29 }
  0x48   : >> { %p3459_p7 = scmp.lt.u32.totalorder %s3453_s29, %s255_s5 }
  0x49   : >> { %p3458_p6 = por %p3457_p5, %p3456_p4 }
  0x4b   : >> { %p3460_p8 = por %p3459_p7, %p3458_p6 }
  0x4d   : >> { %p3461_p9 = pnand %p3460_p8, %p3454_p3 }
  0x4f   : >> { %3464 = shalt.err (!%p3461_p9)  }
  0x50   : >> { %s3465_s13 = scalar_lea.vmem %s3941_s17, 32  ;;  %s3827_s0 = smov [#allocation2]  }
  0x51   : >> { %p3466_p10 = scmp.ne.s32.totalorder %s3941_s17, %s3465_s13  ;;  %s3467_s15 = sshll.u32 %s3827_s0, 4  ;;  %s3957_s15 = int_to_ptr.vmem [resolvable:$false] %s3467_s15 }
  0x52   : >> { %s3960_s16 = scalar_lea.vmem %s3957_s15, 32768  ;;  %p3470_p11 = scmp.lt.s32.totalorder %s3941_s17, %s3957_s15 }
  0x53   : >> { %p3471_p12 = scmp.lt.s32.totalorder %s3960_s16, %s3465_s13 }
  0x55   : >> { %p3472_p13 = por %p3471_p12, %p3470_p11 }
  0x57   : >> { %p3473_p0 = pnand %p3472_p13, %p3466_p10 }
  0x59   : >> { %3476 = shalt.err (!%p3473_p0)  }
  0x5a   : >> { %s3828_s18 = smov 128   ;;  %s3829_s19 = smov 1  }
  0x5b   : >> { %265 = dma.hbm_to_vmem [thread:$0]  %s255_s5, 32, %s3941_s17, [#allocation6], %s3828_s18, %s3828_s18, %s3829_s19 }
  0x5c   : >> { %s242_s28 = sadd.s32 1, %s3795_s28  }
  0x5d   : >> { %p239_p1 = scmp.ge.s32.totalorder %s242_s28, 128  }
  0x5e   : > { %s3969_s20 = smov (%p239_p1), 0  }
  0x5f   : > { %241 = sbr.rel (!%p239_p1) target bundleno = 56 (0x38), region = 197 }
  0x66 LB: >> { %s272_s21 = sshra.s32 %s3799_s20, 7  ;;  %s276_s23 = sand.u32 127, %s3799_s20  ;;  %s3799_s20 = sphi %s3969_s20, %s271_s20  }
  0x67   : >> { %s2950_s5 = sshll.u32 %s272_s21, 9  ;;  %s277_s17 = sadd.s32 128, %s276_s23 }
  0x68   : >> { %s278_s24 = sadd.s32 %s2950_s5, %s277_s17  ;;  %s286_s26 = sshrl.u32 %s3799_s20, 3 }
  0x69   : >> { %s279_s29 = sld [smem:[#allocation9 + %s278_s24]]  ;;  %s287_s28 = sand.u32 7, %s3799_s20  }
  0x6a   : >> { %s2953_s30 = sshll.u32 %s286_s26, 4 }
  0x6b   : >> { %s2767_s9 = sadd.s32 %s2953_s30, %s287_s28 }
  0x6c   : >> { %s2768_s11 = scalar_lea.vmem [#allocation2], %s2767_s9 }
  0x6d   : >> { %s2769_s12 = scalar_lea.vmem %s2768_s11, 256 [#allocation2] }
  0x6e   : >> { %s294_s13 = sshll.u32 %s2769_s12, 4  ;;  %s295_s13 = int_to_ptr.vmem [resolvable:$true] %s294_s13 }
  0x6f   : >> { %s280_s0 = sshrl.u32 %s279_s29, 3  ;;  %s281_s18 = sand.u32 7, %s279_s29  }
  0x70   : >> { %s2951_s19 = sshll.u32 %s280_s0, 4 }
  0x71   : >> { %s283_s6 = sadd.s32 %s2951_s19, %s281_s18 }
  0x72   : >> { %s2952_s1 = sshll.u32 %s283_s6, 4 }
  0x73   : >> { %s285_s21 = scalar_lea.hbm %s5089_s4, %s2952_s1 }
  0x74   : >> { %s3477_s23 = scalar_lea.hbm %s285_s21, 32  ;;  %p3480_p3 = scmp.lt.u32.totalorder %s285_s21, %s5089_s4 }
  0x75   : >> { %p3478_p2 = scmp.ne.s32.totalorder %s285_s21, %s3477_s23  ;;  %p3481_p4 = scmp.lt.u32.totalorder %s3949_s10, %s3477_s23 }
  0x76   : >> { %p3483_p6 = scmp.lt.u32.totalorder %s3477_s23, %s285_s21 }
  0x77   : >> { %p3482_p5 = por %p3481_p4, %p3480_p3 }
  0x79   : >> { %p3484_p7 = por %p3483_p6, %p3482_p5 }
  0x7b   : >> { %p3485_p8 = pnand %p3484_p7, %p3478_p2 }
  0x7d   : >> { %3488 = shalt.err (!%p3485_p8)  }
  0x7e   : >> { %s3489_s24 = scalar_lea.vmem %s295_s13, 32  ;;  %p3494_p10 = scmp.lt.s32.totalorder %s295_s13, %s3957_s15 }
  0x7f   : >> { %p3490_p9 = scmp.ne.s32.totalorder %s295_s13, %s3489_s24  ;;  %p3495_p11 = scmp.lt.s32.totalorder %s3960_s16, %s3489_s24 }
  0x81   : >> { %p3496_p12 = por %p3495_p11, %p3494_p10 }
  0x83   : >> { %p3497_p13 = pnand %p3496_p12, %p3490_p9 }
  0x85   : >> { %3500 = shalt.err (!%p3497_p13)  }
  0x86   : >> { %s3830_s6 = smov 128   ;;  %s3831_s7 = smov 1  }
  0x87   : >> { %297 = dma.hbm_to_vmem [thread:$0]  %s285_s21, 32, %s295_s13, [#allocation6 + $0x1], %s3830_s6, %s3830_s6, %s3831_s7 }
  0x88   : >> { %s271_s20 = sadd.s32 1, %s3799_s20  }
  0x89   : >> { %p268_p0 = scmp.ge.s32.totalorder %s271_s20, 128  }
  0x8a   : > { %s3990_s8 = smov (%p268_p0), 0  }
  0x8b   : > { %270 = sbr.rel (!%p268_p0) target bundleno = 102 (0x66), region = 208 }
  0x92 LB: >> { %s304_s1 = sshra.s32 %s3803_s8, 7  ;;  %s308_s26 = sand.u32 127, %s3803_s8  ;;  %s3803_s8 = sphi %s3990_s8, %s303_s8  }
  0x93   : >> { %s2954_s29 = sshll.u32 %s304_s1, 9  ;;  %s309_s28 = sadd.s32 256, %s308_s26 }
  0x94   : >> { %s310_s30 = sadd.s32 %s2954_s29, %s309_s28  ;;  %s318_s9 = sshrl.u32 %s3803_s8, 3 }
  0x95   : >> { %s311_s11 = sld [smem:[#allocation9 + %s310_s30]]  ;;  %s319_s20 = sand.u32 7, %s3803_s8  }
  0x96   : >> { %s2957_s12 = sshll.u32 %s318_s9, 4 }
  0x97   : >> { %s2775_s13 = sadd.s32 %s2957_s12, %s319_s20 }
  0x98   : >> { %s2776_s0 = scalar_lea.vmem [#allocation2], %s2775_s13 }
  0x99   : >> { %s2777_s18 = scalar_lea.vmem %s2776_s0, 512 [#allocation2] }
  0x9a   : >> { %s326_s19 = sshll.u32 %s2777_s18, 4  ;;  %s327_s19 = int_to_ptr.vmem [resolvable:$true] %s326_s19 }
  0x9b   : >> { %s312_s21 = sshrl.u32 %s311_s11, 3  ;;  %s313_s23 = sand.u32 7, %s311_s11  }
  0x9c   : >> { %s2955_s5 = sshll.u32 %s312_s21, 4 }
  0x9d   : >> { %s315_s17 = sadd.s32 %s2955_s5, %s313_s23 }
  0x9e   : >> { %s2956_s24 = sshll.u32 %s315_s17, 4 }
  0x9f   : >> { %s317_s1 = scalar_lea.hbm %s5089_s4, %s2956_s24 }
  0xa0   : >> { %s3501_s26 = scalar_lea.hbm %s317_s1, 32  ;;  %p3504_p2 = scmp.lt.u32.totalorder %s317_s1, %s5089_s4 }
  0xa1   : >> { %p3502_p1 = scmp.ne.s32.totalorder %s317_s1, %s3501_s26  ;;  %p3505_p3 = scmp.lt.u32.totalorder %s3949_s10, %s3501_s26 }
  0xa2   : >> { %p3507_p5 = scmp.lt.u32.totalorder %s3501_s26, %s317_s1 }
  0xa3   : >> { %p3506_p4 = por %p3505_p3, %p3504_p2 }
  0xa5   : >> { %p3508_p6 = por %p3507_p5, %p3506_p4 }
  0xa7   : >> { %p3509_p7 = pnand %p3508_p6, %p3502_p1 }
  0xa9   : >> { %3512 = shalt.err (!%p3509_p7)  }
  0xaa   : >> { %s3513_s30 = scalar_lea.vmem %s327_s19, 32  ;;  %p3518_p9 = scmp.lt.s32.totalorder %s327_s19, %s3957_s15 }
  0xab   : >> { %p3514_p8 = scmp.ne.s32.totalorder %s327_s19, %s3513_s30  ;;  %p3519_p10 = scmp.lt.s32.totalorder %s3960_s16, %s3513_s30 }
  0xad   : >> { %p3520_p11 = por %p3519_p10, %p3518_p9 }
  0xaf   : >> { %p3521_p12 = pnand %p3520_p11, %p3514_p8 }
  0xb1   : >> { %3524 = shalt.err (!%p3521_p12)  }
  0xb2   : >> { %s3832_s9 = smov 128   ;;  %s3833_s11 = smov 1  }
  0xb3   : >> { %329 = dma.hbm_to_vmem [thread:$0]  %s317_s1, 32, %s327_s19, [#allocation6 + $0x2], %s3832_s9, %s3832_s9, %s3833_s11 }
  0xb4   : >> { %s303_s8 = sadd.s32 1, %s3803_s8  }
  0xb5   : >> { %p300_p13 = scmp.ge.s32.totalorder %s303_s8, 128  }
  0xb6   : > { %s4011_s20 = smov (%p300_p13), 0  }
  0xb7   : > { %302 = sbr.rel (!%p300_p13) target bundleno = 146 (0x92), region = 219 }
  0xbe LB: >> { %s336_s12 = sshra.s32 %s3807_s20, 7  ;;  %s340_s13 = sand.u32 127, %s3807_s20  ;;  %s3807_s20 = sphi %s4011_s20, %s335_s20  }
  0xbf   : >> { %s2958_s0 = sshll.u32 %s336_s12, 9  ;;  %s341_s18 = sadd.s32 384, %s340_s13 }
  0xc0   : >> { %s342_s19 = sadd.s32 %s2958_s0, %s341_s18  ;;  %s350_s21 = sshrl.u32 %s3807_s20, 3 }
  0xc1   : >> { %s343_s23 = sld [smem:[#allocation9 + %s342_s19]]  ;;  %s351_s8 = sand.u32 7, %s3807_s20  }
  0xc2   : >> { %s2961_s5 = sshll.u32 %s350_s21, 4 }
  0xc3   : >> { %s2783_s17 = sadd.s32 %s2961_s5, %s351_s8 }
  0xc4   : >> { %s2784_s24 = scalar_lea.vmem [#allocation2], %s2783_s17 }
  0xc5   : >> { %s2785_s6 = scalar_lea.vmem %s2784_s24, 768 [#allocation2] }
  0xc6   : >> { %s358_s7 = sshll.u32 %s2785_s6, 4  ;;  %s359_s7 = int_to_ptr.vmem [resolvable:$true] %s358_s7 }
  0xc7   : >> { %s344_s1 = sshrl.u32 %s343_s23, 3  ;;  %s345_s26 = sand.u32 7, %s343_s23  }
  0xc8   : >> { %s2959_s29 = sshll.u32 %s344_s1, 4 }
  0xc9   : >> { %s347_s28 = sadd.s32 %s2959_s29, %s345_s26 }
  0xca   : >> { %s2960_s30 = sshll.u32 %s347_s28, 4 }
  0xcb   : >> { %s349_s12 = scalar_lea.hbm %s5089_s4, %s2960_s30 }
  0xcc   : >> { %s3525_s13 = scalar_lea.hbm %s349_s12, 32  ;;  %p3528_p1 = scmp.lt.u32.totalorder %s349_s12, %s5089_s4 }
  0xcd   : >> { %p3526_p0 = scmp.ne.s32.totalorder %s349_s12, %s3525_s13  ;;  %p3529_p2 = scmp.lt.u32.totalorder %s3949_s10, %s3525_s13 }
  0xce   : >> { %p3531_p4 = scmp.lt.u32.totalorder %s3525_s13, %s349_s12 }
  0xcf   : >> { %p3530_p3 = por %p3529_p2, %p3528_p1 }
  0xd1   : >> { %p3532_p5 = por %p3531_p4, %p3530_p3 }
  0xd3   : >> { %p3533_p6 = pnand %p3532_p5, %p3526_p0 }
  0xd5   : >> { %3536 = shalt.err (!%p3533_p6)  }
  0xd6   : >> { %s3537_s19 = scalar_lea.vmem %s359_s7, 32  ;;  %p3542_p8 = scmp.lt.s32.totalorder %s359_s7, %s3957_s15 }
  0xd7   : >> { %p3538_p7 = scmp.ne.s32.totalorder %s359_s7, %s3537_s19  ;;  %p3543_p9 = scmp.lt.s32.totalorder %s3960_s16, %s3537_s19 }
  0xd9   : >> { %p3544_p10 = por %p3543_p9, %p3542_p8 }
  0xdb   : >> { %p3545_p11 = pnand %p3544_p10, %p3538_p7 }
  0xdd   : >> { %3548 = shalt.err (!%p3545_p11)  }
  0xde   : >> { %s3834_s21 = smov 128   ;;  %s3835_s23 = smov 1  }
  0xdf   : >> { %361 = dma.hbm_to_vmem [thread:$0]  %s349_s12, 32, %s359_s7, [#allocation6 + $0x3], %s3834_s21, %s3834_s21, %s3835_s23 }
  0xe0   : >> { %s335_s20 = sadd.s32 1, %s3807_s20  }
  0xe1   : >> { %p332_p12 = scmp.ge.s32.totalorder %s335_s20, 128  }
  0xe2   : > { %s5108_s2 = sld [smem:[#allocation32_spill]] (%p332_p12)  ;;  %vm425_vm0 = vcmask (%p332_p12), 1040384   ;;  %s5109_s3 = sld [smem:[#allocation33_spill]] (%p332_p12) }
  0xe3   : > { %334 = sbr.rel (!%p332_p12) target bundleno = 190 (0xbe), region = 230  ;;  %s362_s12 = sld [smem:[#allocation10]] (%p332_p12) }
  0xe4   : > { %s4096_s13 = sld [smem:[#allocation10 + $0x1]] (%p332_p12)  ;;  %s4098_s0 = sld [smem:[#allocation10 + $0x2]] (%p332_p12) }
  0xe5   : > { %s4100_s19 = sld [smem:[#allocation10 + $0x3]] (%p332_p12)  ;;  %s3836_s17 = smov (%p332_p12), [#allocation4]  }
  0xe6   : > { %s370_s24 = sshll.u32 (%p332_p12), %s3836_s17, 4  ;;  %s4105_s24 = int_to_ptr.vmem [resolvable:$true] %s370_s24 }
  0xe8   : > { %v4035_v0 = vld [vmem:[%s5108_s2 + $0x2] sm:$0x1] (%p332_p12)  ;;  %v4040_v1 = vld [vmem:[%s5108_s2] sm:$0x1] (%p332_p12)  ;;  %v4049_v4 = vld [vmem:[%s5108_s2 + $0x3] sm:$0x1] (%p332_p12) }
  0xe9   : > { %v423_v2 = vmul.f32 (%p332_p12), %v4035_v0, %v4035_v0  ;;  %v421_v3 = vmul.f32 (%p332_p12), %v4040_v1, %v4040_v1  ;;  %v4054_v5 = vld [vmem:[%s5108_s2 + $0x1] sm:$0x1] (%p332_p12)  ;;  %v424_v6 = vmul.f32 (%p332_p12), %v4049_v4, %v4049_v4  ;;  %v4068_v9 = vld [vmem:[%s5109_s3] sm:$0x1] (%p332_p12)  ;;  %v4081_v16 = vld [vmem:[%s5109_s3 + $0x3] sm:$0x1] (%p332_p12) }
  0xea   : > { %v422_v7 = vmul.f32 %v4054_v5, %v4054_v5  ;;  %v4063_v8 = vld [vmem:[%s5109_s3 + $0x1] sm:$0x1]  ;;  %v478_v15 = vmul.f32 %v4068_v9, %v4068_v9  ;;  %v4086_v17 = vld [vmem:[%s5109_s3 + $0x2] sm:$0x1]  ;;  %v481_v20 = vmul.f32 %v4081_v16, %v4081_v16  ;;  %s363_s18 = sshrl.u32 %s362_s12, 3  ;;  %s364_s21 = sand.u32 7, %s362_s12  }
  0xeb   : > { %v432_v10 = vsel %vm425_vm0, %v423_v2, 0.0  ;;  %v426_v11 = vsel %vm425_vm0, %v421_v3, 0.0  ;;  %v435_v12 = vsel %vm425_vm0, %v424_v6, 0.0  ;;  %v479_v14 = vmul.f32 %v4063_v8, %v4063_v8  ;;  %s2962_s23 = sshll.u32 %s363_s18, 4  ;;  %s375_s16 = sshrl.u32 %s4096_s13, 3 }
  0xec   : > { %433 = vadd.xlane.f32.xlu1 %v432_v10  ;;  %427 = vadd.xlane.f32.xlu0 %v426_v11  ;;  %v429_v13 = vsel %vm425_vm0, %v422_v7, 0.0  ;;  %v482_v19 = vsel %vm425_vm0, %v478_v15, 0.0  ;;  %v480_v21 = vmul.f32 %v4086_v17, %v4086_v17  ;;  %v491_v22 = vsel %vm425_vm0, %v481_v20, 0.0  ;;  %s366_s8 = sadd.s32 %s2962_s23, %s364_s21 }
  0xed   : > { %v485_v18 = vsel %vm425_vm0, %v479_v14, 0.0  ;;  %s2963_s5 = sshll.u32 %s366_s8, 4 }
  0xee   : > { %v488_v23 = vsel %vm425_vm0, %v480_v21, 0.0  ;;  %s368_s15 = scalar_lea.hbm %s5089_s4, %s2963_s5 }
  0xef   : > { %s3549_s7 = scalar_lea.hbm %s368_s15, 32  ;;  %p3552_p0 = scmp.lt.u32.totalorder %s368_s15, %s5089_s4 }
  0xf0   : > { %436 = vadd.xlane.f32.xlu1 %v435_v12  ;;  %430 = vadd.xlane.f32.xlu0 %v429_v13  ;;  %p3550_p13 = scmp.ne.s32.totalorder %s368_s15, %s3549_s7  ;;  %p3553_p1 = scmp.lt.u32.totalorder %s3949_s10, %s3549_s7 }
  0xf1   : > { %p3555_p3 = scmp.lt.u32.totalorder %s3549_s7, %s368_s15 }
  0xf2   : > { %p3554_p2 = por %p3553_p1, %p3552_p0 }
  0xf4   : > { %486 = vadd.xlane.f32.xlu1 %v485_v18  ;;  %483 = vadd.xlane.f32.xlu0 %v482_v19  ;;  %p3556_p4 = por %p3555_p3, %p3554_p2 }
  0xf6   : > { %p3557_p5 = pnand %p3556_p4, %p3550_p13 }
  0xf8   : > { %492 = vadd.xlane.f32.xlu1 %v491_v22  ;;  %489 = vadd.xlane.f32.xlu0 %v488_v23 }
  0xf9   : > { %3560 = shalt.err (!%p3557_p5)  }
  0xfa   : > { %s3561_s29 = scalar_lea.vmem %s4105_s24, 32  ;;  %s4115_s28 = scalar_lea.vmem %s4105_s24, 128 }
  0xfb   : > { %p3562_p6 = scmp.ne.s32.totalorder %s4105_s24, %s3561_s29  ;;  %p3566_p7 = scmp.lt.s32.totalorder %s4105_s24, %s4105_s24 }
  0xfc   : > { %p3567_p8 = scmp.lt.s32.totalorder %s4115_s28, %s3561_s29 }
  0xfe   : > { %p3568_p9 = por %p3567_p8, %p3566_p7 }
 0x100   : > { %p3569_p10 = pnand %p3568_p9, %p3562_p6 }
 0x102   : > { %3572 = shalt.err (!%p3569_p10)  }
 0x103   : > { %s3837_s30 = smov 128   ;;  %s3838_s9 = smov 16  }
 0x104   : > { %s3839_s11 = smov 1   ;;  %s376_s12 = sand.u32 7, %s4096_s13  }
 0x105   : > { %373 = dma.hbm_to_vmem [thread:$0]  %s368_s15, 32, %s4105_s24, [#allocation7], %s3837_s30, %s3838_s9, %s3839_s11 }
 0x106   : > { %s2965_s18 = sshll.u32 %s375_s16, 4  ;;  %s3840_s8 = smov [#allocation4 + $0x2]  }
 0x107   : > { %s378_s21 = sadd.s32 %s2965_s18, %s376_s12  ;;  %s383_s5 = sshll.u32 %s3840_s8, 4  ;;  %s384_s5 = int_to_ptr.vmem [resolvable:$true] %s383_s5 }
 0x108   : > { %s2966_s23 = sshll.u32 %s378_s21, 4 }
 0x109   : > { %s380_s20 = scalar_lea.hbm %s5089_s4, %s2966_s23 }
 0x10a   : > { %s3573_s7 = scalar_lea.hbm %s380_s20, 32  ;;  %p3576_p12 = scmp.lt.u32.totalorder %s380_s20, %s5089_s4 }
 0x10b   : > { %p3574_p11 = scmp.ne.s32.totalorder %s380_s20, %s3573_s7  ;;  %p3577_p13 = scmp.lt.u32.totalorder %s3949_s10, %s3573_s7 }
 0x10c   : > { %p3579_p1 = scmp.lt.u32.totalorder %s3573_s7, %s380_s20 }
 0x10d   : > { %p3578_p0 = por %p3577_p13, %p3576_p12 }
 0x10f   : > { %p3580_p2 = por %p3579_p1, %p3578_p0 }
 0x111   : > { %p3581_p3 = pnand %p3580_p2, %p3574_p11 }
 0x113   : > { %3584 = shalt.err (!%p3581_p3)  }
 0x114   : > { %s3585_s13 = scalar_lea.vmem %s384_s5, 32  ;;  %p3590_p5 = scmp.lt.s32.totalorder %s384_s5, %s4105_s24 }
 0x115   : > { %p3586_p4 = scmp.ne.s32.totalorder %s384_s5, %s3585_s13  ;;  %p3591_p6 = scmp.lt.s32.totalorder %s4115_s28, %s3585_s13 }
 0x117   : > { %p3592_p7 = por %p3591_p6, %p3590_p5 }
 0x119   : > { %p3593_p8 = pnand %p3592_p7, %p3586_p4 }
 0x11b   : > { %3596 = shalt.err (!%p3593_p8)  }
 0x11c   : > { %386 = dma.hbm_to_vmem [thread:$0]  %s380_s20, 32, %s384_s5, [#allocation7], %s3837_s30, %s3838_s9, %s3839_s11 }
 0x11d   : > { %s388_s15 = sshrl.u32 %s4098_s0, 3  ;;  %s389_s16 = sand.u32 7, %s4098_s0  }
 0x11e   : > { %s2968_s29 = sshll.u32 %s388_s15, 4  ;;  %s3841_s18 = smov [#allocation4 + $0x4]  }
 0x11f   : > { %s391_s12 = sadd.s32 %s2968_s29, %s389_s16  ;;  %s396_s21 = sshll.u32 %s3841_s18, 4  ;;  %s397_s21 = int_to_ptr.vmem [resolvable:$true] %s396_s21 }
 0x120   : > { %s2969_s23 = sshll.u32 %s391_s12, 4  ;;  %s401_s7 = sshrl.u32 %s4100_s19, 3 }
 0x121   : > { %s393_s6 = scalar_lea.hbm %s5089_s4, %s2969_s23 }
 0x122   : > { %s3597_s1 = scalar_lea.hbm %s393_s6, 32  ;;  %p3600_p10 = scmp.lt.u32.totalorder %s393_s6, %s5089_s4 }
 0x123   : > { %p3598_p9 = scmp.ne.s32.totalorder %s393_s6, %s3597_s1  ;;  %p3601_p11 = scmp.lt.u32.totalorder %s3949_s10, %s3597_s1 }
 0x124   : > { %p3603_p13 = scmp.lt.u32.totalorder %s3597_s1, %s393_s6 }
 0x125   : > { %p3602_p12 = por %p3601_p11, %p3600_p10 }
 0x127   : > { %p3604_p0 = por %p3603_p13, %p3602_p12 }
 0x129   : > { %p3605_p1 = pnand %p3604_p0, %p3598_p9 }
 0x12b   : > { %3608 = shalt.err (!%p3605_p1)  }
 0x12c   : > { %s3609_s0 = scalar_lea.vmem %s397_s21, 32  ;;  %p3614_p3 = scmp.lt.s32.totalorder %s397_s21, %s4105_s24 }
 0x12d   : > { %p3610_p2 = scmp.ne.s32.totalorder %s397_s21, %s3609_s0  ;;  %p3615_p4 = scmp.lt.s32.totalorder %s4115_s28, %s3609_s0 }
 0x12f   : > { %p3616_p5 = por %p3615_p4, %p3614_p3 }
 0x131   : > { %p3617_p6 = pnand %p3616_p5, %p3610_p2 }
 0x133   : > { %3620 = shalt.err (!%p3617_p6)  }
 0x134   : > { %399 = dma.hbm_to_vmem [thread:$0]  %s393_s6, 32, %s397_s21, [#allocation7], %s3837_s30, %s3838_s9, %s3839_s11 }
 0x135   : > { %s402_s5 = sand.u32 7, %s4100_s19   ;;  %s2971_s20 = sshll.u32 %s401_s7, 4 }
 0x136   : > { %s404_s15 = sadd.s32 %s2971_s20, %s402_s5  ;;  %s3842_s29 = smov [#allocation4 + $0x6]  }
 0x137   : > { %s2972_s16 = sshll.u32 %s404_s15, 4  ;;  %s409_s12 = sshll.u32 %s3842_s29, 4  ;;  %s410_s12 = int_to_ptr.vmem [resolvable:$true] %s409_s12 }
 0x138   : > { %s406_s8 = scalar_lea.hbm %s5089_s4, %s2972_s16 }
 0x139   : > { %s3621_s17 = scalar_lea.hbm %s406_s8, 32  ;;  %p3624_p8 = scmp.lt.u32.totalorder %s406_s8, %s5089_s4 }
 0x13a   : > { %p3622_p7 = scmp.ne.s32.totalorder %s406_s8, %s3621_s17  ;;  %p3625_p9 = scmp.lt.u32.totalorder %s3949_s10, %s3621_s17 }
 0x13b   : > { %p3627_p11 = scmp.lt.u32.totalorder %s3621_s17, %s406_s8 }
 0x13c   : > { %p3626_p10 = por %p3625_p9, %p3624_p8 }
 0x13e   : > { %p3628_p12 = por %p3627_p11, %p3626_p10 }
 0x140   : > { %p3629_p13 = pnand %p3628_p12, %p3622_p7 }
 0x142   : > { %3632 = shalt.err (!%p3629_p13)  }
 0x143   : > { %s3633_s19 = scalar_lea.vmem %s410_s12, 32  ;;  %p3638_p1 = scmp.lt.s32.totalorder %s410_s12, %s4105_s24 }
 0x144   : > { %p3634_p0 = scmp.ne.s32.totalorder %s410_s12, %s3633_s19  ;;  %p3639_p2 = scmp.lt.s32.totalorder %s4115_s28, %s3633_s19 }
 0x146   : > { %p3640_p3 = por %p3639_p2, %p3638_p1 }
 0x148   : > { %p3641_p4 = pnand %p3640_p3, %p3634_p0 }
 0x14a   : > { %3644 = shalt.err (!%p3641_p4)  }
 0x14b   : > { %412 = dma.hbm_to_vmem [thread:$0]  %s406_s8, 32, %s410_s12, [#allocation7], %s3837_s30, %s3838_s9, %s3839_s11  ;;  %v534_v40 = vlaneseq }
 0x14c   : > { %s3843_s21 = smov 0.0  }
 0x14d   : > { %547 = sst [smem:[#allocation5]] %s3843_s21 }
 0x14e   : > { %549 = sst [smem:[#allocation5 + $0x1]] %s3843_s21 }
 0x179   : > { %v434_v24 = vpop.xlane.xlu1 %433  ;;  %v428_v25 = vpop.xlane.xlu0 %427 }
 0x17a   : > { %3125 = vrsqrt.f32 %v434_v24  ;;  %vm454_vm1 = vcmp.eq.f32.partialorder %v434_v24, inf  ;;  %vm456_vm2 = vcmp.eq.f32.partialorder %v434_v24, 0.0  ;;  %v457_v35 = vand.u32 2147483648, %v434_v24 }
 0x17b   : > { %3127 = vrsqrt.f32 %v428_v25  ;;  %vm440_vm3 = vcmp.eq.f32.partialorder %v428_v25, inf  ;;  %v443_v38 = vand.u32 2147483648, %v428_v25  ;;  %vm442_vm4 = vcmp.eq.f32.partialorder %v428_v25, 0.0 }
 0x17d   : > { %v437_v26 = vpop.xlane.xlu1 %436  ;;  %v431_v27 = vpop.xlane.xlu0 %430 }
 0x17e   : > { %3129 = vrsqrt.f32 %v437_v26  ;;  %vm461_vm5 = vcmp.eq.f32.partialorder %v437_v26, inf  ;;  %vm463_vm6 = vcmp.eq.f32.partialorder %v437_v26, 0.0  ;;  %v464_v48 = vand.u32 2147483648, %v437_v26 }
 0x17f   : > { %3131 = vrsqrt.f32 %v431_v27  ;;  %vm447_vm7 = vcmp.eq.f32.partialorder %v431_v27, inf  ;;  %v450_v51 = vand.u32 2147483648, %v431_v27  ;;  %vm449_vm8 = vcmp.eq.f32.partialorder %v431_v27, 0.0 }
 0x181   : > { %v487_v28 = vpop.xlane.xlu1 %486  ;;  %v484_v29 = vpop.xlane.xlu0 %483 }
 0x182   : > { %3133 = vrsqrt.f32 %v487_v28  ;;  %vm503_vm9 = vcmp.eq.f32.partialorder %v487_v28, inf  ;;  %vm505_vm10 = vcmp.eq.f32.partialorder %v487_v28, 0.0  ;;  %v506_v60 = vand.u32 2147483648, %v487_v28 }
 0x183   : > { %3135 = vrsqrt.f32 %v484_v29  ;;  %vm496_vm11 = vcmp.eq.f32.partialorder %v484_v29, inf  ;;  %v499_v63 = vand.u32 2147483648, %v484_v29  ;;  %vm498_vm12 = vcmp.eq.f32.partialorder %v484_v29, 0.0 }
 0x184   : > { %v3126_v30 = vpop.eup %3125 }
 0x185   : > { %v3128_v31 = vpop.eup %3127  ;;  %v453_v32 = vmul.f32 %v3126_v30, %v434_v24  ;;  %v4165_v33 = vpop.xlane.xlu1 %492 }
 0x186   : > { %v4167_v34 = vpop.xlane.xlu0 %489  ;;  %v439_v36 = vmul.f32 %v3128_v31, %v428_v25  ;;  %3137 = vrsqrt.f32 %v4165_v33  ;;  %vm517_vm13 = vcmp.eq.f32.partialorder %v4165_v33, inf  ;;  %vm519_vm14 = vcmp.eq.f32.partialorder %v4165_v33, 0.0 }
 0x187   : > { %v455_v37 = vsel %vm454_vm1, %v434_v24, %v453_v32  ;;  %3139 = vrsqrt.f32 %v4167_v34  ;;  %v520_v14 = vand.u32 2147483648, %v4165_v33  ;;  %vm510_vm15 = vcmp.eq.f32.partialorder %v4167_v34, inf }
 0x188   : > { %v3130_v39 = vpop.eup %3129  ;;  %v458_v41 = vsel %vm456_vm2, %v457_v35, %v455_v37  ;;  %v441_v42 = vsel %vm440_vm3, %v428_v25, %v439_v36  ;;  %v513_v19 = vand.u32 2147483648, %v4167_v34  ;;  %vm512_vm0 = vcmp.eq.f32.partialorder %v4167_v34, 0.0 }
 0x189   : > { %v3132_v43 = vpop.eup %3131  ;;  %v468_v44 = vadd.f32 1e-07, %v458_v41  ;;  %v444_v45 = vsel %vm442_vm4, %v443_v38, %v441_v42  ;;  %v460_v46 = vmul.f32 %v3130_v39, %v437_v26  ;;  %vm4181_vm1 = vcmp.lt.s32.totalorder %v534_v40, 128 }
 0x18a   : > { %v466_v47 = vadd.f32 1e-07, %v444_v45  ;;  %v446_v49 = vmul.f32 %v3132_v43, %v431_v27 }
 0x18b   : > { %3141 = vrcp.f32 %v468_v44  ;;  %v462_v50 = vsel %vm461_vm5, %v437_v26, %v460_v46 }
 0x18c   : > { %v3134_v52 = vpop.eup %3133  ;;  %3143 = vrcp.f32 %v466_v47  ;;  %v465_v53 = vsel %vm463_vm6, %v464_v48, %v462_v50  ;;  %v448_v54 = vsel %vm447_vm7, %v431_v27, %v446_v49 }
 0x18d   : > { %v3136_v55 = vpop.eup %3135  ;;  %v469_v56 = vadd.f32 1e-07, %v465_v53  ;;  %v451_v57 = vsel %vm449_vm8, %v450_v51, %v448_v54  ;;  %v502_v58 = vmul.f32 %v3134_v52, %v487_v28 }
 0x18e   : > { %v467_v59 = vadd.f32 1e-07, %v451_v57  ;;  %v495_v61 = vmul.f32 %v3136_v55, %v484_v29 }
 0x18f   : > { %3145 = vrcp.f32 %v469_v56  ;;  %v504_v62 = vsel %vm503_vm9, %v487_v28, %v502_v58 }
 0x190   : > { %v3138_v2 = vpop.eup %3137  ;;  %3147 = vrcp.f32 %v467_v59  ;;  %v507_v3 = vsel %vm505_vm10, %v506_v60, %v504_v62  ;;  %v497_v6 = vsel %vm496_vm11, %v484_v29, %v495_v61 }
 0x191   : > { %v3140_v7 = vpop.eup %3139  ;;  %v523_v10 = vadd.f32 1e-07, %v507_v3  ;;  %v500_v11 = vsel %vm498_vm12, %v499_v63, %v497_v6  ;;  %v516_v12 = vmul.f32 %v3138_v2, %v4165_v33 }
 0x192   : > { %v522_v13 = vadd.f32 1e-07, %v500_v11  ;;  %v509_v15 = vmul.f32 %v3140_v7, %v4167_v34 }
 0x193   : > { %3149 = vrcp.f32 %v523_v10  ;;  %v518_v18 = vsel %vm517_vm13, %v4165_v33, %v516_v12 }
 0x194   : > { %3151 = vrcp.f32 %v522_v13  ;;  %v521_v20 = vsel %vm519_vm14, %v520_v14, %v518_v18  ;;  %v511_v21 = vsel %vm510_vm15, %v4167_v34, %v509_v15 }
 0x195   : > { %v3142_v22 = vpop.eup %3141  ;;  %v525_v24 = vadd.f32 1e-07, %v521_v20  ;;  %v514_v25 = vsel %vm512_vm0, %v513_v19, %v511_v21 }
 0x196   : > { %v3144_v26 = vpop.eup %3143  ;;  %v475_v27 = vmul.f32 %v3142_v22, %v4035_v0  ;;  %v524_v28 = vadd.f32 1e-07, %v514_v25 }
 0x197   : > { %v471_v29 = vmul.f32 %v3144_v26, %v4040_v1  ;;  %3153 = vrcp.f32 %v525_v24 }
 0x198   : > { %540 = vst.msk [vmem:[#allocation3 + $0x4] sm:$0x1] %vm4181_vm1, %v475_v27  ;;  %3155 = vrcp.f32 %v524_v28 }
 0x199   : > { %v3146_v30 = vpop.eup %3145  ;;  %538 = vst.msk [vmem:[#allocation3] sm:$0x1] %vm4181_vm1, %v471_v29 }
 0x19a   : > { %v3148_v31 = vpop.eup %3147  ;;  %v477_v32 = vmul.f32 %v3146_v30, %v4049_v4 }
 0x19b   : > { %v473_v33 = vmul.f32 %v3148_v31, %v4054_v5 }
 0x19c   : > { %541 = vst.msk [vmem:[#allocation3 + $0x6] sm:$0x1] %vm4181_vm1, %v477_v32 }
 0x19d   : > { %v3150_v0 = vpop.eup %3149  ;;  %539 = vst.msk [vmem:[#allocation3 + $0x2] sm:$0x1] %vm4181_vm1, %v473_v33 }
 0x19e   : > { %v3152_v1 = vpop.eup %3151  ;;  %v529_v34 = vmul.f32 %v3150_v0, %v4063_v8 }
 0x19f   : > { %v527_v35 = vmul.f32 %v3152_v1, %v4068_v9 }
 0x1a0   : > { %543 = vst.msk [vmem:[#allocation3 + $0x3] sm:$0x1] %vm4181_vm1, %v529_v34 }
 0x1a1   : > { %v3154_v36 = vpop.eup %3153  ;;  %542 = vst.msk [vmem:[#allocation3 + $0x1] sm:$0x1] %vm4181_vm1, %v527_v35 }
 0x1a2   : > { %v3156_v4 = vpop.eup %3155  ;;  %v533_v5 = vmul.f32 %v3154_v36, %v4081_v16 }
 0x1a3   : > { %v531_v37 = vmul.f32 %v3156_v4, %v4086_v17 }
 0x1a4   : > { %545 = vst.msk [vmem:[#allocation3 + $0x7] sm:$0x1] %vm4181_vm1, %v533_v5 }
 0x1a5   : > { %544 = vst.msk [vmem:[#allocation3 + $0x5] sm:$0x1] %vm4181_vm1, %v531_v37 }
 0x1a6 PF: > { %s2973_s10 = sshll.u32 %s5122_s27, 2 }
 0x1a7   : > { %s551_s24 = scalar_lea.sflag [#allocation6], %s2973_s10 }
 0x1a8   : > { %3779 = dma.done.wait %s551_s24, 4096 }
 0x1a9   : > { %3780 = vsyncadd %s551_s24, 4294963200  ;;  %s2806_s28 = scalar_lea.sflag %s551_s24, 1 [#allocation6] }
 0x1aa   : > { %3781 = dma.done.wait %s2806_s28, 4096 }
 0x1ab   : > { %3782 = vsyncadd %s2806_s28, 4294963200  ;;  %s2809_s30 = scalar_lea.sflag %s551_s24, 2 [#allocation6] }
 0x1ac   : > { %3783 = dma.done.wait %s2809_s30, 4096 }
 0x1ad   : > { %3784 = vsyncadd %s2809_s30, 4294963200  ;;  %s2812_s9 = scalar_lea.sflag %s551_s24, 3 [#allocation6] }
 0x1ae   : > { %3785 = dma.done.wait %s2812_s9, 4096 }
 0x1af   : > { %3786 = vsyncadd %s2812_s9, 4294963200  ;;  %s568_s11 = sadd.s32 1, %s3910_s14 }
 0x1b0   : > { %p2977_p5 = scmp.ge.s32.totalorder %s568_s11, 2 }
 0x1b1   : > { %s573_s6 = ssub.s32 (!%p2977_p5), 1, %s5122_s27  ;;  %s3020_s7 = sshll.u32 (!%p2977_p5), %s3910_s14, 7 }
 0x1b2   : > { %572 = sbr.rel (%p2977_p5) target bundleno = 623 (0x26f), region = 64  ;;  %s4213_s13 = sadd.s32 (!%p2977_p5), 128, %s3020_s7 }
 0x1b3   : > { %s4215_s0 = smov (!%p2977_p5), 0  }
 0x1b9 LB: >> { %s4222_s5 = sshll.u32 %s573_s6, 10  ;;  %s581_s20 = sadd.s32 %s3811_s0, %s4213_s13  ;;  %s3811_s0 = sphi %s4215_s0, %s580_s0  }
 0x1ba   : >> { %s595_s15 = sshrl.u32 %s3811_s0, 3  ;;  %s582_s16 = sshra.s32 %s581_s20, 7 }
 0x1bb   : >> { %s586_s29 = sand.u32 127, %s581_s20  ;;  %s2979_s12 = sshll.u32 %s582_s16, 9 }
 0x1bc   : >> { %s596_s18 = sand.u32 7, %s3811_s0   ;;  %s587_s23 = sadd.s32 %s2979_s12, %s586_s29 }
 0x1bd   : >> { %s2982_s8 = sshll.u32 %s595_s15, 4  ;;  %s588_s17 = sld [smem:[#allocation9 + %s587_s23]] }
 0x1be   : >> { %s598_s1 = sadd.s32 %s2982_s8, %s596_s18  ;;  %s2984_s19 = sshll.u32 %s573_s6, 2 }
 0x1bf   : >> { %s600_s26 = sadd.s32 %s4222_s5, %s598_s1  ;;  %s4238_s15 = scalar_lea.sflag [#allocation6], %s2984_s19 }
 0x1c0   : >> { %s601_s21 = scalar_lea.vmem [#allocation2], %s600_s26  ;;  %s4245_s23 = scalar_lea.hbm %s5089_s4, 2048 }
 0x1c1   : >> { %s605_s10 = sshll.u32 %s601_s21, 4  ;;  %s4231_s10 = int_to_ptr.vmem [resolvable:$true] %s605_s10 }
 0x1c3   : >> { %s589_s24 = sshrl.u32 %s588_s17, 3  ;;  %s590_s28 = sand.u32 7, %s588_s17  }
 0x1c4   : >> { %s2980_s30 = sshll.u32 %s589_s24, 4 }
 0x1c5   : >> { %s592_s9 = sadd.s32 %s2980_s30, %s590_s28 }
 0x1c6   : >> { %s2981_s11 = sshll.u32 %s592_s9, 4 }
 0x1c7   : >> { %s4236_s16 = scalar_lea.hbm %s5089_s4, %s2981_s11 }
 0x1c8   : >> { %s3645_s29 = scalar_lea.hbm %s4236_s16, 32  ;;  %p3648_p7 = scmp.lt.u32.totalorder %s4236_s16, %s5089_s4 }
 0x1c9   : >> { %p3646_p6 = scmp.ne.s32.totalorder %s4236_s16, %s3645_s29  ;;  %p3649_p8 = scmp.lt.u32.totalorder %s4245_s23, %s3645_s29 }
 0x1ca   : >> { %p3651_p10 = scmp.lt.u32.totalorder %s3645_s29, %s4236_s16 }
 0x1cb   : >> { %p3650_p9 = por %p3649_p8, %p3648_p7 }
 0x1cd   : >> { %p3652_p11 = por %p3651_p10, %p3650_p9 }
 0x1cf   : >> { %p3653_p12 = pnand %p3652_p11, %p3646_p6 }
 0x1d1   : >> { %3656 = shalt.err (!%p3653_p12)  }
 0x1d2   : >> { %s3657_s1 = scalar_lea.vmem %s4231_s10, 32  ;;  %s3844_s26 = smov [#allocation2]  }
 0x1d3   : >> { %p3658_p13 = scmp.ne.s32.totalorder %s4231_s10, %s3657_s1  ;;  %s3659_s19 = sshll.u32 %s3844_s26, 4  ;;  %s4255_s19 = int_to_ptr.vmem [resolvable:$false] %s3659_s19 }
 0x1d4   : >> { %s4258_s21 = scalar_lea.vmem %s4255_s19, 32768  ;;  %p3662_p0 = scmp.lt.s32.totalorder %s4231_s10, %s4255_s19 }
 0x1d5   : >> { %p3663_p1 = scmp.lt.s32.totalorder %s4258_s21, %s3657_s1 }
 0x1d7   : >> { %p3664_p2 = por %p3663_p1, %p3662_p0 }
 0x1d9   : >> { %p3665_p3 = pnand %p3664_p2, %p3658_p13 }
 0x1db   : >> { %3668 = shalt.err (!%p3665_p3)  }
 0x1dc   : >> { %s3845_s24 = smov 128   ;;  %s3846_s28 = smov 1  }
 0x1dd   : >> { %608 = dma.hbm_to_vmem [thread:$0]  %s4236_s16, 32, %s4231_s10, %s4238_s15, %s3845_s24, %s3845_s24, %s3846_s28 }
 0x1de   : >> { %s580_s0 = sadd.s32 1, %s3811_s0  }
 0x1df   : >> { %p577_p4 = scmp.ge.s32.totalorder %s580_s0, 128  }
 0x1e0   : > { %s4269_s30 = smov (%p577_p4), 0  }
 0x1e1   : > { %579 = sbr.rel (!%p577_p4) target bundleno = 441 (0x1b9), region = 241 }
 0x1e8 LB: >> { %s615_s10 = sadd.s32 %s3815_s30, %s4213_s13  ;;  %s630_s9 = sshrl.u32 %s3815_s30, 3  ;;  %s3815_s30 = sphi %s4269_s30, %s614_s30  }
 0x1e9   : >> { %s616_s11 = sshra.s32 %s615_s10, 7  ;;  %s620_s7 = sand.u32 127, %s615_s10 }
 0x1ea   : >> { %s2985_s20 = sshll.u32 %s616_s11, 9  ;;  %s621_s0 = sadd.s32 128, %s620_s7 }
 0x1eb   : >> { %s622_s16 = sadd.s32 %s2985_s20, %s621_s0  ;;  %s631_s6 = sand.u32 7, %s3815_s30  }
 0x1ec   : >> { %s623_s29 = sld [smem:[#allocation9 + %s622_s16]]  ;;  %s2988_s12 = sshll.u32 %s630_s9, 4 }
 0x1ed   : >> { %s2829_s18 = sadd.s32 %s2988_s12, %s631_s6  ;;  %s2836_s26 = scalar_lea.sflag %s4238_s15, 1 [#allocation6] }
 0x1ee   : >> { %s2831_s8 = sadd.s32 %s4222_s5, %s2829_s18 }
 0x1ef   : >> { %s2832_s17 = scalar_lea.vmem [#allocation2], %s2831_s8 }
 0x1f0   : >> { %s2833_s1 = scalar_lea.vmem %s2832_s17, 256 [#allocation2] }
 0x1f1   : >> { %s642_s24 = sshll.u32 %s2833_s1, 4  ;;  %s643_s24 = int_to_ptr.vmem [resolvable:$true] %s642_s24 }
 0x1f2   : >> { %s624_s28 = sshrl.u32 %s623_s29, 3  ;;  %s625_s2 = sand.u32 7, %s623_s29  }
 0x1f3   : >> { %s2986_s3 = sshll.u32 %s624_s28, 4 }
 0x1f4   : >> { %s627_s22 = sadd.s32 %s2986_s3, %s625_s2 }
 0x1f5   : >> { %s2987_s25 = sshll.u32 %s627_s22, 4 }
 0x1f6   : >> { %s629_s7 = scalar_lea.hbm %s5089_s4, %s2987_s25 }
 0x1f7   : >> { %s3669_s20 = scalar_lea.hbm %s629_s7, 32  ;;  %p3672_p6 = scmp.lt.u32.totalorder %s629_s7, %s5089_s4 }
 0x1f8   : >> { %p3670_p5 = scmp.ne.s32.totalorder %s629_s7, %s3669_s20  ;;  %p3673_p7 = scmp.lt.u32.totalorder %s4245_s23, %s3669_s20 }
 0x1f9   : >> { %p3675_p9 = scmp.lt.u32.totalorder %s3669_s20, %s629_s7 }
 0x1fa   : >> { %p3674_p8 = por %p3673_p7, %p3672_p6 }
 0x1fc   : >> { %p3676_p10 = por %p3675_p9, %p3674_p8 }
 0x1fe   : >> { %p3677_p11 = pnand %p3676_p10, %p3670_p5 }
 0x200   : >> { %3680 = shalt.err (!%p3677_p11)  }
 0x201   : >> { %s3681_s16 = scalar_lea.vmem %s643_s24, 32  ;;  %p3686_p13 = scmp.lt.s32.totalorder %s643_s24, %s4255_s19 }
 0x202   : >> { %p3682_p12 = scmp.ne.s32.totalorder %s643_s24, %s3681_s16  ;;  %p3687_p0 = scmp.lt.s32.totalorder %s4258_s21, %s3681_s16 }
 0x204   : >> { %p3688_p1 = por %p3687_p0, %p3686_p13 }
 0x206   : >> { %p3689_p2 = pnand %p3688_p1, %p3682_p12 }
 0x208   : >> { %3692 = shalt.err (!%p3689_p2)  }
 0x209   : >> { %s3847_s2 = smov 128   ;;  %s3848_s3 = smov 1  }
 0x20a   : >> { %645 = dma.hbm_to_vmem [thread:$0]  %s629_s7, 32, %s643_s24, %s2836_s26, %s3847_s2, %s3847_s2, %s3848_s3 }
 0x20b   : >> { %s614_s30 = sadd.s32 1, %s3815_s30  }
 0x20c   : >> { %p611_p3 = scmp.ge.s32.totalorder %s614_s30, 128  }
 0x20d   : > { %s4294_s22 = smov (%p611_p3), 0  }
 0x20e   : > { %613 = sbr.rel (!%p611_p3) target bundleno = 488 (0x1e8), region = 252 }
 0x215 LB: >> { %s652_s25 = sadd.s32 %s3819_s22, %s4213_s13  ;;  %s667_s6 = sshrl.u32 %s3819_s22, 3  ;;  %s3819_s22 = sphi %s4294_s22, %s651_s22  }
 0x216   : >> { %s653_s29 = sshra.s32 %s652_s25, 7  ;;  %s657_s12 = sand.u32 127, %s652_s25 }
 0x217   : >> { %s2991_s18 = sshll.u32 %s653_s29, 9  ;;  %s658_s30 = sadd.s32 256, %s657_s12 }
 0x218   : >> { %s659_s8 = sadd.s32 %s2991_s18, %s658_s30  ;;  %s668_s17 = sand.u32 7, %s3819_s22  }
 0x219   : >> { %s660_s1 = sld [smem:[#allocation9 + %s659_s8]]  ;;  %s2994_s26 = sshll.u32 %s667_s6, 4 }
 0x21a   : >> { %s2842_s24 = sadd.s32 %s2994_s26, %s668_s17  ;;  %s2849_s7 = scalar_lea.sflag %s4238_s15, 2 [#allocation6] }
 0x21b   : >> { %s2844_s28 = sadd.s32 %s4222_s5, %s2842_s24 }
 0x21c   : >> { %s2845_s10 = scalar_lea.vmem [#allocation2], %s2844_s28 }
 0x21d   : >> { %s2846_s11 = scalar_lea.vmem %s2845_s10, 512 [#allocation2] }
 0x21e   : >> { %s679_s20 = sshll.u32 %s2846_s11, 4  ;;  %s680_s20 = int_to_ptr.vmem [resolvable:$true] %s679_s20 }
 0x21f   : >> { %s661_s9 = sshrl.u32 %s660_s1, 3  ;;  %s662_s0 = sand.u32 7, %s660_s1  }
 0x220   : >> { %s2992_s16 = sshll.u32 %s661_s9, 4 }
 0x221   : >> { %s664_s2 = sadd.s32 %s2992_s16, %s662_s0 }
 0x222   : >> { %s2993_s3 = sshll.u32 %s664_s2, 4 }
 0x223   : >> { %s666_s12 = scalar_lea.hbm %s5089_s4, %s2993_s3 }
 0x224   : >> { %s3693_s18 = scalar_lea.hbm %s666_s12, 32  ;;  %p3696_p5 = scmp.lt.u32.totalorder %s666_s12, %s5089_s4 }
 0x225   : >> { %p3694_p4 = scmp.ne.s32.totalorder %s666_s12, %s3693_s18  ;;  %p3697_p6 = scmp.lt.u32.totalorder %s4245_s23, %s3693_s18 }
 0x226   : >> { %p3699_p8 = scmp.lt.u32.totalorder %s3693_s18, %s666_s12 }
 0x227   : >> { %p3698_p7 = por %p3697_p6, %p3696_p5 }
 0x229   : >> { %p3700_p9 = por %p3699_p8, %p3698_p7 }
 0x22b   : >> { %p3701_p10 = pnand %p3700_p9, %p3694_p4 }
 0x22d   : >> { %3704 = shalt.err (!%p3701_p10)  }
 0x22e   : >> { %s3705_s8 = scalar_lea.vmem %s680_s20, 32  ;;  %p3710_p12 = scmp.lt.s32.totalorder %s680_s20, %s4255_s19 }
 0x22f   : >> { %p3706_p11 = scmp.ne.s32.totalorder %s680_s20, %s3705_s8  ;;  %p3711_p13 = scmp.lt.s32.totalorder %s4258_s21, %s3705_s8 }
 0x231   : >> { %p3712_p0 = por %p3711_p13, %p3710_p12 }
 0x233   : >> { %p3713_p1 = pnand %p3712_p0, %p3706_p11 }
 0x235   : >> { %3716 = shalt.err (!%p3713_p1)  }
 0x236   : >> { %s3849_s17 = smov 128   ;;  %s3850_s1 = smov 1  }
 0x237   : >> { %682 = dma.hbm_to_vmem [thread:$0]  %s666_s12, 32, %s680_s20, %s2849_s7, %s3849_s17, %s3849_s17, %s3850_s1 }
 0x238   : >> { %s651_s22 = sadd.s32 1, %s3819_s22  }
 0x239   : >> { %p648_p2 = scmp.ge.s32.totalorder %s651_s22, 128  }
 0x23a   : > { %s4319_s26 = smov (%p648_p2), 0  }
 0x23b   : > { %650 = sbr.rel (!%p648_p2) target bundleno = 533 (0x215), region = 263 }
 0x242 LB: >> { %s689_s24 = sadd.s32 %s3823_s26, %s4213_s13  ;;  %s704_s28 = sshrl.u32 %s3823_s26, 3  ;;  %s3823_s26 = sphi %s4319_s26, %s688_s26  }
 0x243   : >> { %s690_s10 = sshra.s32 %s689_s24, 7  ;;  %s694_s11 = sand.u32 127, %s689_s24 }
 0x244   : >> { %s2997_s7 = sshll.u32 %s690_s10, 9  ;;  %s695_s22 = sadd.s32 384, %s694_s11 }
 0x245   : >> { %s696_s20 = sadd.s32 %s2997_s7, %s695_s22  ;;  %s705_s9 = sand.u32 7, %s3823_s26  }
 0x246   : >> { %s697_s0 = sld [smem:[#allocation9 + %s696_s20]]  ;;  %s3000_s16 = sshll.u32 %s704_s28, 4 }
 0x247   : >> { %s2855_s2 = sadd.s32 %s3000_s16, %s705_s9  ;;  %s2862_s12 = scalar_lea.sflag %s4238_s15, 3 [#allocation6] }
 0x248   : >> { %s2857_s3 = sadd.s32 %s4222_s5, %s2855_s2 }
 0x249   : >> { %s2858_s25 = scalar_lea.vmem [#allocation2], %s2857_s3 }
 0x24a   : >> { %s2859_s29 = scalar_lea.vmem %s2858_s25, 768 [#allocation2] }
 0x24b   : >> { %s716_s18 = sshll.u32 %s2859_s29, 4  ;;  %s717_s18 = int_to_ptr.vmem [resolvable:$true] %s716_s18 }
 0x24c   : >> { %s698_s6 = sshrl.u32 %s697_s0, 3  ;;  %s699_s30 = sand.u32 7, %s697_s0  }
 0x24d   : >> { %s2998_s8 = sshll.u32 %s698_s6, 4 }
 0x24e   : >> { %s701_s17 = sadd.s32 %s2998_s8, %s699_s30 }
 0x24f   : >> { %s2999_s1 = sshll.u32 %s701_s17, 4 }
 0x250   : >> { %s703_s11 = scalar_lea.hbm %s5089_s4, %s2999_s1 }
 0x251   : >> { %s3717_s7 = scalar_lea.hbm %s703_s11, 32  ;;  %p3720_p4 = scmp.lt.u32.totalorder %s703_s11, %s5089_s4 }
 0x252   : >> { %p3718_p3 = scmp.ne.s32.totalorder %s703_s11, %s3717_s7  ;;  %p3721_p5 = scmp.lt.u32.totalorder %s4245_s23, %s3717_s7 }
 0x253   : >> { %p3723_p7 = scmp.lt.u32.totalorder %s3717_s7, %s703_s11 }
 0x254   : >> { %p3722_p6 = por %p3721_p5, %p3720_p4 }
 0x256   : >> { %p3724_p8 = por %p3723_p7, %p3722_p6 }
 0x258   : >> { %p3725_p9 = pnand %p3724_p8, %p3718_p3 }
 0x25a   : >> { %3728 = shalt.err (!%p3725_p9)  }
 0x25b   : >> { %s3729_s20 = scalar_lea.vmem %s717_s18, 32  ;;  %p3734_p11 = scmp.lt.s32.totalorder %s717_s18, %s4255_s19 }
 0x25c   : >> { %p3730_p10 = scmp.ne.s32.totalorder %s717_s18, %s3729_s20  ;;  %p3735_p12 = scmp.lt.s32.totalorder %s4258_s21, %s3729_s20 }
 0x25e   : >> { %p3736_p13 = por %p3735_p12, %p3734_p11 }
 0x260   : >> { %p3737_p0 = pnand %p3736_p13, %p3730_p10 }
 0x262   : >> { %3740 = shalt.err (!%p3737_p0)  }
 0x263   : >> { %s3851_s9 = smov 128   ;;  %s3852_s0 = smov 1  }
 0x264   : >> { %719 = dma.hbm_to_vmem [thread:$0]  %s703_s11, 32, %s717_s18, %s2862_s12, %s3851_s9, %s3851_s9, %s3852_s0 }
 0x265   : >> { %s688_s26 = sadd.s32 1, %s3823_s26  }
 0x266   : >> { %p685_p1 = scmp.ge.s32.totalorder %s688_s26, 128  }
 0x268   : > { %687 = sbr.rel (!%p685_p1) target bundleno = 578 (0x242), region = 274 }
 0x26f PF: > { %s3022_s16 = sshll.u32 %s5122_s27, 10  ;;  %v859_v8 = vlaneseq  ;;  %v851_v16 = vld [vmem:[#allocation3] sm:$0x3]  ;;  %v852_v53 = vld [vmem:[#allocation3 + $0x2] sm:$0x3]  ;;  %vm1742_vm2 = vcmask 130112  }
 0x270   : > { %s4351_s2 = scalar_lea.vmem [#allocation2], %s3022_s16  ;;  %v853_v12 = vld [vmem:[#allocation3 + $0x4] sm:$0x3]  ;;  %v854_v33 = vld [vmem:[#allocation3 + $0x6] sm:$0x3]  ;;  %vm1749_vm3 = vcmask 195712  }
 0x271   : > { %v4346_v9 = vshrl.u32 %v859_v8, 7  ;;  %v727_v38 = vld [vmem:[%s4351_s2 + $0x20] sm:$0xff]  ;;  %v729_v41 = vld [vmem:[%s4351_s2 + $0x30] sm:$0xff]  ;;  %v726_v63 = vld [vmem:[%s4351_s2 + $0x18] sm:$0xff]  ;;  %vm1756_vm4 = vcmask 261312   ;;  %vm1763_vm5 = vcmask 326912  }
 0x272   : > { %v723_v39 = vld [vmem:[%s4351_s2] sm:$0xff]  ;;  %v725_v42 = vld [vmem:[%s4351_s2 + $0x10] sm:$0xff]  ;;  %v724_v2 = vld [vmem:[%s4351_s2 + $0x8] sm:$0xff]  ;;  %vm1770_vm6 = vcmask 392512   ;;  %vm1777_vm7 = vcmask 458112   ;;  %vm1784_vm8 = vcmask 523712  }
 0x273   : > { %v4349_v17 = vsub.s32 0, %v4346_v9  ;;  %v733_v47 = vld [vmem:[%s4351_s2 + $0x50] sm:$0xff]  ;;  %v731_v48 = vld [vmem:[%s4351_s2 + $0x40] sm:$0xff]  ;;  %v4376_v57 = vsub.s32 1, %v4346_v9  ;;  %v758_v10 = vld [vmem:[%s4351_s2 + $0x118] sm:$0xff]  ;;  %vm1791_vm9 = vcmask 589312  }
 0x274   : > { %v737_v51 = vld [vmem:[%s4351_s2 + $0x70] sm:$0xff]  ;;  %v735_v52 = vld [vmem:[%s4351_s2 + $0x60] sm:$0xff]  ;;  %v756_v11 = vld [vmem:[%s4351_s2 + $0x108] sm:$0xff]  ;;  %vm1798_vm10 = vcmask 654912   ;;  %vm1805_vm11 = vcmask 720512   ;;  %vm1812_vm12 = vcmask 786112  }
 0x275   : > { %v4356_v40 = vrot.slane %v851_v16, %v4349_v17  ;;  %v4373_v56 = vrot.slane %v852_v53, %v4349_v17  ;;  %v757_v58 = vld [vmem:[%s4351_s2 + $0x110] sm:$0xff]  ;;  %v755_v59 = vld [vmem:[%s4351_s2 + $0x100] sm:$0xff]  ;;  %v4383_v62 = vrot.slane %v851_v16, %v4376_v57  ;;  %v4390_v7 = vrot.slane %v852_v53, %v4376_v57  ;;  %v728_v22 = vld [vmem:[%s4351_s2 + $0x28] sm:$0xff]  ;;  %s3005_s27 = sshll.u32 %s3910_s14, 7  ;;  %s5112_s13 = sld [smem:[#allocation31_spill]] }
 0x276   : > { %v4397_v15 = vrot.slane %v853_v12, %v4349_v17  ;;  %v787_v18 = vld [vmem:[%s4351_s2 + $0x200] sm:$0xff]  ;;  %v789_v23 = vld [vmem:[%s4351_s2 + $0x210] sm:$0xff]  ;;  %v4408_v26 = vrot.slane %v853_v12, %v4376_v57  ;;  %v788_v27 = vld [vmem:[%s4351_s2 + $0x208] sm:$0xff]  ;;  %v4419_v34 = vrot.slane %v854_v33, %v4349_v17  ;;  %vm1819_vm13 = vcmask 851712   ;;  %s5113_s5 = sld [smem:[#allocation30_spill]]  ;;  %s2476_s15 = sld [smem:[#allocation5]] }
 0x277   : > { %v903_v43 = vmul.f32 %v4356_v40, %v727_v38  ;;  %v899_v44 = vmul.f32 %v4356_v40, %v723_v39  ;;  %v905_v45 = vmul.f32 %v4356_v40, %v729_v41  ;;  %v901_v46 = vmul.f32 %v4356_v40, %v725_v42  ;;  %v759_v19 = vld [vmem:[%s4351_s2 + $0x120] sm:$0xff]  ;;  %v760_v28 = vld [vmem:[%s4351_s2 + $0x128] sm:$0xff]  ;;  %v761_v31 = vld [vmem:[%s4351_s2 + $0x130] sm:$0xff]  ;;  %s3006_s23 = sld [smem:[#allocation5 + $0x1]]  ;;  %p3007_p2 = scmp.ne.s32.totalorder %s3910_s14, 1 }
 0x278   : > { %v909_v49 = vmul.f32 %v4356_v40, %v733_v47  ;;  %v907_v50 = vmul.f32 %v4356_v40, %v731_v48  ;;  %v913_v54 = vmul.f32 %v4356_v40, %v737_v51  ;;  %v911_v55 = vmul.f32 %v4356_v40, %v735_v52  ;;  %v790_v32 = vld [vmem:[%s4351_s2 + $0x218] sm:$0xff]  ;;  %v819_v35 = vld [vmem:[%s4351_s2 + $0x300] sm:$0xff]  ;;  %v821_v16 = vld [vmem:[%s4351_s2 + $0x310] sm:$0xff]  ;;  %s5114_s6 = sld [smem:[#allocation36_spill]] (!%p3007_p2) }
 0x279   : > { %1031 = vadd.xlane.f32.xlu1 %v903_v43  ;;  %1027 = vadd.xlane.f32.xlu0 %v899_v44  ;;  %v933_v60 = vmul.f32 %v4373_v56, %v757_v58  ;;  %v931_v61 = vmul.f32 %v4373_v56, %v755_v59  ;;  %v902_v3 = vmul.f32 %v4383_v62, %v726_v63  ;;  %v791_v36 = vld [vmem:[%s4351_s2 + $0x220] sm:$0xff]  ;;  %v730_v37 = vld [vmem:[%s4351_s2 + $0x38] sm:$0xff]  ;;  %v792_v39 = vld [vmem:[%s4351_s2 + $0x228] sm:$0xff]  ;;  %vm1826_vm14 = vcmask 917312  }
 0x27a   : > { %v900_v6 = vmul.f32 %v4383_v62, %v724_v2  ;;  %v934_v13 = vmul.f32 %v4390_v7, %v758_v10  ;;  %v932_v14 = vmul.f32 %v4390_v7, %v756_v11  ;;  %v963_v20 = vmul.f32 %v4397_v15, %v787_v18  ;;  %v762_v41 = vld [vmem:[%s4351_s2 + $0x138] sm:$0xff]  ;;  %v732_v53 = vld [vmem:[%s4351_s2 + $0x48] sm:$0xff]  ;;  %v765_v63 = vld [vmem:[%s4351_s2 + $0x150] sm:$0xff] }
 0x27b   : > { %v935_v21 = vmul.f32 %v4373_v56, %v759_v19  ;;  %v904_v24 = vmul.f32 %v4383_v62, %v728_v22  ;;  %v965_v25 = vmul.f32 %v4397_v15, %v789_v23  ;;  %v964_v29 = vmul.f32 %v4408_v26, %v788_v27  ;;  %v794_v58 = vld [vmem:[%s4351_s2 + $0x238] sm:$0xff]  ;;  %v764_v59 = vld [vmem:[%s4351_s2 + $0x148] sm:$0xff]  ;;  %v825_v10 = vld [vmem:[%s4351_s2 + $0x330] sm:$0xff] }
 0x27c   : > { %v936_v30 = vmul.f32 %v4390_v7, %v760_v28  ;;  %v937_v0 = vmul.f32 %v4373_v56, %v761_v31  ;;  %v966_v1 = vmul.f32 %v4408_v26, %v790_v32  ;;  %v995_v4 = vmul.f32 %v4419_v34, %v819_v35  ;;  %v824_v2 = vld [vmem:[%s4351_s2 + $0x328] sm:$0xff]  ;;  %v795_v11 = vld [vmem:[%s4351_s2 + $0x240] sm:$0xff]  ;;  %v734_v18 = vld [vmem:[%s4351_s2 + $0x58] sm:$0xff] }
 0x27d   : > { %1033 = vadd.xlane.f32.xlu1 %v905_v45  ;;  %1029 = vadd.xlane.f32.xlu0 %v901_v46  ;;  %v967_v5 = vmul.f32 %v4397_v15, %v791_v36  ;;  %v906_v38 = vmul.f32 %v4383_v62, %v730_v37  ;;  %v997_v17 = vmul.f32 %v4419_v34, %v821_v16  ;;  %v822_v45 = vld [vmem:[%s4351_s2 + $0x318] sm:$0xff]  ;;  %v820_v46 = vld [vmem:[%s4351_s2 + $0x308] sm:$0xff]  ;;  %v767_v27 = vld [vmem:[%s4351_s2 + $0x160] sm:$0xff]  ;;  %vm1833_vm15 = vcmask 982912  }
 0x27e   : > { %v968_v42 = vmul.f32 %v4408_v26, %v792_v39  ;;  %v938_v43 = vmul.f32 %v4390_v7, %v762_v41  ;;  %v4434_v44 = vrot.slane %v854_v33, %v4376_v57  ;;  %v1001_v12 = vmul.f32 %v4419_v34, %v825_v10  ;;  %v796_v22 = vld [vmem:[%s4351_s2 + $0x248] sm:$0xff]  ;;  %v827_v31 = vld [vmem:[%s4351_s2 + $0x340] sm:$0xff] }
 0x27f   : > { %v1003_v33 = vmul.f32 %v4419_v34, %v827_v31  ;;  %vm1840_vm0 = vcmask 1048512   ;;  %vm2079_vm1 = vcmask 1041409  }
 0x280   : > { %v998_v47 = vmul.f32 %v4434_v44, %v822_v45  ;;  %v996_v48 = vmul.f32 %v4434_v44, %v820_v46 }
 0x281   : > { %1037 = vadd.xlane.f32.xlu1 %v909_v49  ;;  %1035 = vadd.xlane.f32.xlu0 %v907_v50  ;;  %v793_v49 = vld [vmem:[%s4351_s2 + $0x230] sm:$0xff]  ;;  %v763_v50 = vld [vmem:[%s4351_s2 + $0x140] sm:$0xff] }
 0x282   : > { %v969_v51 = vmul.f32 %v4397_v15, %v793_v49  ;;  %v939_v52 = vmul.f32 %v4373_v56, %v763_v50 }
 0x285   : > { %1041 = vadd.xlane.f32.xlu1 %v913_v54  ;;  %1039 = vadd.xlane.f32.xlu0 %v911_v55  ;;  %v823_v54 = vld [vmem:[%s4351_s2 + $0x320] sm:$0xff]  ;;  %v908_v55 = vmul.f32 %v4383_v62, %v732_v53 }
 0x286   : > { %v999_v57 = vmul.f32 %v4419_v34, %v823_v54 }
 0x289   : > { %1061 = vadd.xlane.f32.xlu1 %v933_v60  ;;  %1059 = vadd.xlane.f32.xlu0 %v931_v61  ;;  %v970_v60 = vmul.f32 %v4408_v26, %v794_v58  ;;  %v940_v61 = vmul.f32 %v4390_v7, %v764_v59 }
 0x28d   : > { %1157 = vadd.xlane.f32.xlu1 %v902_v3  ;;  %1155 = vadd.xlane.f32.xlu0 %v900_v6  ;;  %v941_v3 = vmul.f32 %v4373_v56, %v765_v63  ;;  %v1000_v6 = vmul.f32 %v4434_v44, %v824_v2 }
 0x291   : > { %1189 = vadd.xlane.f32.xlu1 %v934_v13  ;;  %1187 = vadd.xlane.f32.xlu0 %v932_v14  ;;  %v971_v13 = vmul.f32 %v4397_v15, %v795_v11  ;;  %v766_v14 = vld [vmem:[%s4351_s2 + $0x158] sm:$0xff] }
 0x292   : > { %v942_v19 = vmul.f32 %v4390_v7, %v766_v14 }
 0x295   : > { %1091 = vadd.xlane.f32.xlu1 %v963_v20  ;;  %1063 = vadd.xlane.f32.xlu0 %v935_v21  ;;  %v910_v20 = vmul.f32 %v4383_v62, %v734_v18  ;;  %v826_v21 = vld [vmem:[%s4351_s2 + $0x338] sm:$0xff] }
 0x296   : > { %v1002_v23 = vmul.f32 %v4434_v44, %v826_v21 }
 0x299   : > { %1159 = vadd.xlane.f32.xlu1 %v904_v24  ;;  %1093 = vadd.xlane.f32.xlu0 %v965_v25  ;;  %v972_v24 = vmul.f32 %v4408_v26, %v796_v22  ;;  %v797_v25 = vld [vmem:[%s4351_s2 + $0x250] sm:$0xff] }
 0x29a   : > { %v973_v28 = vmul.f32 %v4397_v15, %v797_v25 }
 0x29d   : > { %1219 = vadd.xlane.f32.xlu1 %v964_v29  ;;  %1191 = vadd.xlane.f32.xlu0 %v936_v30  ;;  %v943_v29 = vmul.f32 %v4373_v56, %v767_v27  ;;  %v736_v30 = vld [vmem:[%s4351_s2 + $0x68] sm:$0xff] }
 0x29e   : > { %v912_v32 = vmul.f32 %v4383_v62, %v736_v30 }
 0x2a1   : > { %1065 = vadd.xlane.f32.xlu1 %v937_v0  ;;  %1221 = vadd.xlane.f32.xlu0 %v966_v1  ;;  %v798_v0 = vld [vmem:[%s4351_s2 + $0x258] sm:$0xff]  ;;  %v768_v1 = vld [vmem:[%s4351_s2 + $0x168] sm:$0xff] }
 0x2a2   : > { %v974_v35 = vmul.f32 %v4408_v26, %v798_v0  ;;  %v944_v36 = vmul.f32 %v4390_v7, %v768_v1  ;;  %v775_v0 = vld [vmem:[%s4351_s2 + $0x1a0] sm:$0xff] }
 0x2a3   : > { %v743_v1 = vld [vmem:[%s4351_s2 + $0xa0] sm:$0xff] }
 0x2a5   : > { %1123 = vadd.xlane.f32.xlu1 %v995_v4  ;;  %1095 = vadd.xlane.f32.xlu0 %v967_v5  ;;  %v769_v4 = vld [vmem:[%s4351_s2 + $0x170] sm:$0xff]  ;;  %v828_v5 = vld [vmem:[%s4351_s2 + $0x348] sm:$0xff] }
 0x2a6   : > { %v945_v37 = vmul.f32 %v4373_v56, %v769_v4  ;;  %v1004_v16 = vmul.f32 %v4434_v44, %v828_v5 }
 0x2a9   : > { %1161 = vadd.xlane.f32.xlu1 %v906_v38  ;;  %1125 = vadd.xlane.f32.xlu0 %v997_v17  ;;  %v829_v38 = vld [vmem:[%s4351_s2 + $0x350] sm:$0xff]  ;;  %v799_v17 = vld [vmem:[%s4351_s2 + $0x260] sm:$0xff] }
 0x2aa   : > { %v1005_v39 = vmul.f32 %v4419_v34, %v829_v38  ;;  %v975_v41 = vmul.f32 %v4397_v15, %v799_v17  ;;  %v4533_v38 = vand.u32 127, %v859_v8 }
 0x2ad   : > { %1223 = vadd.xlane.f32.xlu1 %v968_v42  ;;  %1193 = vadd.xlane.f32.xlu0 %v938_v43  ;;  %v770_v42 = vld [vmem:[%s4351_s2 + $0x178] sm:$0xff] }
 0x2ae   : > { %v738_v43 = vld [vmem:[%s4351_s2 + $0x78] sm:$0xff]  ;;  %v946_v45 = vmul.f32 %v4390_v7, %v770_v42  ;;  %v805_v42 = vld [vmem:[%s4351_s2 + $0x290] sm:$0xff] }
 0x2af   : > { %v914_v46 = vmul.f32 %v4383_v62, %v738_v43 }
 0x2b1   : > { %1253 = vadd.xlane.f32.xlu1 %v998_v47  ;;  %1251 = vadd.xlane.f32.xlu0 %v996_v48  ;;  %v830_v47 = vld [vmem:[%s4351_s2 + $0x358] sm:$0xff]  ;;  %v800_v48 = vld [vmem:[%s4351_s2 + $0x268] sm:$0xff] }
 0x2b2   : > { %v1006_v49 = vmul.f32 %v4434_v44, %v830_v47  ;;  %v976_v50 = vmul.f32 %v4408_v26, %v800_v48 }
 0x2b5   : > { %1097 = vadd.xlane.f32.xlu1 %v969_v51  ;;  %1067 = vadd.xlane.f32.xlu0 %v939_v52  ;;  %v771_v51 = vld [vmem:[%s4351_s2 + $0x180] sm:$0xff] }
 0x2b6   : > { %v739_v52 = vld [vmem:[%s4351_s2 + $0x80] sm:$0xff]  ;;  %v947_v53 = vmul.f32 %v4373_v56, %v771_v51 }
 0x2b7   : > { %v915_v54 = vmul.f32 %v4356_v40, %v739_v52 }
 0x2b9   : > { %1163 = vadd.xlane.f32.xlu1 %v908_v55  ;;  %1127 = vadd.xlane.f32.xlu0 %v999_v57  ;;  %v831_v55 = vld [vmem:[%s4351_s2 + $0x360] sm:$0xff]  ;;  %v801_v57 = vld [vmem:[%s4351_s2 + $0x270] sm:$0xff] }
 0x2ba   : > { %v1007_v58 = vmul.f32 %v4419_v34, %v831_v55  ;;  %v977_v59 = vmul.f32 %v4397_v15, %v801_v57 }
 0x2bd   : > { %1225 = vadd.xlane.f32.xlu1 %v970_v60  ;;  %1195 = vadd.xlane.f32.xlu0 %v940_v61  ;;  %v772_v60 = vld [vmem:[%s4351_s2 + $0x188] sm:$0xff] }
 0x2be   : > { %v740_v61 = vld [vmem:[%s4351_s2 + $0x88] sm:$0xff]  ;;  %v948_v63 = vmul.f32 %v4390_v7, %v772_v60 }
 0x2bf   : > { %v916_v2 = vmul.f32 %v4383_v62, %v740_v61 }
 0x2c1   : > { %1069 = vadd.xlane.f32.xlu1 %v941_v3  ;;  %1255 = vadd.xlane.f32.xlu0 %v1000_v6  ;;  %v832_v3 = vld [vmem:[%s4351_s2 + $0x368] sm:$0xff]  ;;  %v802_v6 = vld [vmem:[%s4351_s2 + $0x278] sm:$0xff] }
 0x2c2   : > { %v1008_v10 = vmul.f32 %v4434_v44, %v832_v3  ;;  %v978_v11 = vmul.f32 %v4408_v26, %v802_v6  ;;  %v806_v3 = vld [vmem:[%s4351_s2 + $0x298] sm:$0xff] }
 0x2c5   : > { %1129 = vadd.xlane.f32.xlu1 %v1001_v12  ;;  %1099 = vadd.xlane.f32.xlu0 %v971_v13  ;;  %v773_v12 = vld [vmem:[%s4351_s2 + $0x190] sm:$0xff] }
 0x2c6   : > { %v741_v13 = vld [vmem:[%s4351_s2 + $0x90] sm:$0xff]  ;;  %v949_v14 = vmul.f32 %v4373_v56, %v773_v12 }
 0x2c7   : > { %v917_v18 = vmul.f32 %v4356_v40, %v741_v13  ;;  %v4553_v13 = vsub.s32 %v4533_v38, %v4346_v9 }
 0x2c9   : > { %1197 = vadd.xlane.f32.xlu1 %v942_v19  ;;  %1165 = vadd.xlane.f32.xlu0 %v910_v20  ;;  %v833_v19 = vld [vmem:[%s4351_s2 + $0x370] sm:$0xff]  ;;  %v803_v20 = vld [vmem:[%s4351_s2 + $0x280] sm:$0xff] }
 0x2ca   : > { %v1009_v21 = vmul.f32 %v4419_v34, %v833_v19  ;;  %v979_v22 = vmul.f32 %v4397_v15, %v803_v20  ;;  %v982_v20 = vmul.f32 %v4408_v26, %v806_v3 }
 0x2cd   : > { %1257 = vadd.xlane.f32.xlu1 %v1002_v23  ;;  %1227 = vadd.xlane.f32.xlu0 %v972_v24  ;;  %v774_v23 = vld [vmem:[%s4351_s2 + $0x198] sm:$0xff] }
 0x2ce   : > { %v742_v24 = vld [vmem:[%s4351_s2 + $0x98] sm:$0xff]  ;;  %v950_v25 = vmul.f32 %v4390_v7, %v774_v23  ;;  %v1765_v23 = vadd.s32 4294967256, %v4533_v38 }
 0x2cf   : > { %v918_v27 = vmul.f32 %v4383_v62, %v742_v24 }
 0x2d1   : > { %1101 = vadd.xlane.f32.xlu1 %v973_v28  ;;  %1071 = vadd.xlane.f32.xlu0 %v943_v29  ;;  %v834_v28 = vld [vmem:[%s4351_s2 + $0x378] sm:$0xff]  ;;  %v804_v29 = vld [vmem:[%s4351_s2 + $0x288] sm:$0xff] }
 0x2d2   : > { %v1010_v30 = vmul.f32 %v4434_v44, %v834_v28  ;;  %v980_v31 = vmul.f32 %v4408_v26, %v804_v29 }
 0x2d5   : > { %1167 = vadd.xlane.f32.xlu1 %v912_v32  ;;  %1131 = vadd.xlane.f32.xlu0 %v1003_v33 }
 0x2d9   : > { %1229 = vadd.xlane.f32.xlu1 %v974_v35  ;;  %1199 = vadd.xlane.f32.xlu0 %v944_v36 }
 0x2dd   : > { %1073 = vadd.xlane.f32.xlu1 %v945_v37  ;;  %1259 = vadd.xlane.f32.xlu0 %v1004_v16  ;;  %v951_v37 = vmul.f32 %v4373_v56, %v775_v0  ;;  %v919_v16 = vmul.f32 %v4356_v40, %v743_v1  ;;  %v745_v0 = vld [vmem:[%s4351_s2 + $0xb0] sm:$0xff] }
 0x2e1   : > { %1133 = vadd.xlane.f32.xlu1 %v1005_v39  ;;  %1103 = vadd.xlane.f32.xlu0 %v975_v41  ;;  %v835_v41 = vld [vmem:[%s4351_s2 + $0x380] sm:$0xff] }
 0x2e2   : > { %v1011_v48 = vmul.f32 %v4419_v34, %v835_v41  ;;  %v921_v41 = vmul.f32 %v4356_v40, %v745_v0 }
 0x2e5   : > { %1201 = vadd.xlane.f32.xlu1 %v946_v45  ;;  %1169 = vadd.xlane.f32.xlu0 %v914_v46 }
 0x2e9   : > { %1261 = vadd.xlane.f32.xlu1 %v1006_v49  ;;  %1231 = vadd.xlane.f32.xlu0 %v976_v50  ;;  %v981_v49 = vmul.f32 %v4397_v15, %v805_v42  ;;  %v1744_v50 = vadd.s32 4294967280, %v4533_v38  ;;  %v837_v42 = vld [vmem:[%s4351_s2 + $0x390] sm:$0xff] }
 0x2eb   : > { %v4548_v6 = vsub.s32 %v1744_v50, %v4346_v9 }
 0x2ed   : > { %1075 = vadd.xlane.f32.xlu1 %v947_v53  ;;  %1043 = vadd.xlane.f32.xlu0 %v915_v54  ;;  %v776_v53 = vld [vmem:[%s4351_s2 + $0x1a8] sm:$0xff] }
 0x2ee   : > { %v744_v54 = vld [vmem:[%s4351_s2 + $0xa8] sm:$0xff]  ;;  %v952_v61 = vmul.f32 %v4390_v7, %v776_v53 }
 0x2f1   : > { %1135 = vadd.xlane.f32.xlu1 %v1007_v58  ;;  %1105 = vadd.xlane.f32.xlu0 %v977_v59  ;;  %v1751_v58 = vadd.s32 4294967272, %v4533_v38 }
 0x2f5   : > { %1203 = vadd.xlane.f32.xlu1 %v948_v63  ;;  %1171 = vadd.xlane.f32.xlu0 %v916_v2  ;;  %v920_v63 = vmul.f32 %v4383_v62, %v744_v54  ;;  %v836_v2 = vld [vmem:[%s4351_s2 + $0x388] sm:$0xff]  ;;  %v1013_v54 = vmul.f32 %v4419_v34, %v837_v42 }
 0x2f6   : > { %v1012_v19 = vmul.f32 %v4434_v44, %v836_v2 }
 0x2f9   : > { %1263 = vadd.xlane.f32.xlu1 %v1008_v10  ;;  %1233 = vadd.xlane.f32.xlu0 %v978_v11  ;;  %v1737_v10 = vadd.s32 4294967288, %v4533_v38 }
 0x2fd   : > { %1077 = vadd.xlane.f32.xlu1 %v949_v14  ;;  %1045 = vadd.xlane.f32.xlu0 %v917_v18 }
 0x301   : > { %1137 = vadd.xlane.f32.xlu1 %v1009_v21  ;;  %1107 = vadd.xlane.f32.xlu0 %v979_v22  ;;  %v4558_v22 = vsub.s32 %v1751_v58, %v4346_v9 }
 0x305   : > { %1205 = vadd.xlane.f32.xlu1 %v950_v25  ;;  %1173 = vadd.xlane.f32.xlu0 %v918_v27  ;;  %v777_v27 = vld [vmem:[%s4351_s2 + $0x1b0] sm:$0xff] }
 0x306   : > { %v1032_v32 = vpop.xlane.xlu1 %1031  ;;  %v1028_v33 = vpop.xlane.xlu0 %1027 }
 0x307   : > { %v1285_v35 = vmul.f32 2.0, %v1032_v32  ;;  %v1283_v36 = vmul.f32 2.0, %v1028_v33 }
 0x309   : > { %v1351_v4 = vmul.f32 1.442695, %v1285_v35  ;;  %v1347_v5 = vmul.f32 1.442695, %v1283_v36  ;;  %1265 = vadd.xlane.f32.xlu1 %v1010_v30  ;;  %1235 = vadd.xlane.f32.xlu0 %v980_v31  ;;  %v4564_v30 = vsub.s32 %v1737_v10, %v4346_v9  ;;  %v1758_v31 = vadd.s32 4294967264, %v4533_v38 }
 0x30a   : > { %v1034_v17 = vpop.xlane.xlu1 %1033  ;;  %v1030_v39 = vpop.xlane.xlu0 %1029 }
 0x30b   : > { %3157 = vpow2.f32 %v1351_v4  ;;  %v1286_v43 = vmul.f32 2.0, %v1034_v17  ;;  %v1284_v45 = vmul.f32 2.0, %v1030_v39  ;;  %v1779_v4 = vadd.s32 4294967240, %v4533_v38 }
 0x30c   : > { %3159 = vpow2.f32 %v1347_v5  ;;  %v953_v5 = vmul.f32 %v4373_v56, %v777_v27 }
 0x30d   : > { %v1353_v46 = vmul.f32 1.442695, %v1286_v43  ;;  %v1349_v47 = vmul.f32 1.442695, %v1284_v45  ;;  %1079 = vadd.xlane.f32.xlu1 %v951_v37  ;;  %1047 = vadd.xlane.f32.xlu0 %v919_v16  ;;  %v4572_v16 = vsub.s32 %v1765_v23, %v4346_v9  ;;  %v807_v43 = vld [vmem:[%s4351_s2 + $0x2a0] sm:$0xff] }
 0x30e   : > { %v1038_v51 = vpop.xlane.xlu1 %1037  ;;  %v1036_v52 = vpop.xlane.xlu0 %1035 }
 0x30f   : > { %3161 = vpow2.f32 %v1353_v46  ;;  %v1288_v55 = vmul.f32 2.0, %v1038_v51  ;;  %v1287_v57 = vmul.f32 2.0, %v1036_v52 }
 0x310   : > { %3163 = vpow2.f32 %v1349_v47  ;;  %v4579_v47 = vsub.s32 %v1758_v31, %v4346_v9  ;;  %v838_v31 = vld [vmem:[%s4351_s2 + $0x398] sm:$0xff] }
 0x311   : > { %v1357_v59 = vmul.f32 1.442695, %v1288_v55  ;;  %v1355_v60 = vmul.f32 1.442695, %v1287_v57  ;;  %1139 = vadd.xlane.f32.xlu1 %v1011_v48  ;;  %1109 = vadd.xlane.f32.xlu0 %v981_v49  ;;  %v1772_v48 = vadd.s32 4294967248, %v4533_v38  ;;  %v983_v55 = vmul.f32 %v4397_v15, %v807_v43 }
 0x312   : > { %v1042_v11 = vpop.xlane.xlu1 %1041  ;;  %v1040_v12 = vpop.xlane.xlu0 %1039 }
 0x313   : > { %3165 = vpow2.f32 %v1357_v59  ;;  %v1290_v14 = vmul.f32 2.0, %v1042_v11  ;;  %v1289_v18 = vmul.f32 2.0, %v1040_v12  ;;  %v4587_v59 = vsub.s32 %v1779_v4, %v4346_v9  ;;  %v808_v4 = vld [vmem:[%s4351_s2 + $0x2a8] sm:$0xff] }
 0x314   : > { %3167 = vpow2.f32 %v1355_v60  ;;  %v4592_v10 = vsub.s32 %v1772_v48, %v4346_v9  ;;  %v779_v48 = vld [vmem:[%s4351_s2 + $0x1c0] sm:$0xff] }
 0x315   : > { %v3158_v21 = vpop.eup %3157  ;;  %v1361_v24 = vmul.f32 1.442695, %v1290_v14  ;;  %v1359_v25 = vmul.f32 1.442695, %v1289_v18  ;;  %1207 = vadd.xlane.f32.xlu1 %v952_v61  ;;  %1175 = vadd.xlane.f32.xlu0 %v920_v63  ;;  %v778_v14 = vld [vmem:[%s4351_s2 + $0x1b8] sm:$0xff] }
 0x316   : > { %v3160_v28 = vpop.eup %3159  ;;  %v1748_v29 = vrot.slane %v3158_v21, %v4548_v6  ;;  %v1062_v32 = vpop.xlane.xlu1 %1061  ;;  %v746_v18 = vld [vmem:[%s4351_s2 + $0xb8] sm:$0xff] }
 0x317   : > { %v1060_v33 = vpop.xlane.xlu0 %1059  ;;  %v1736_v1 = vrot.slane %v3160_v28, %v4553_v13  ;;  %3169 = vpow2.f32 %v1361_v24  ;;  %v1300_v35 = vmul.f32 2.0, %v1062_v32  ;;  %v954_v28 = vmul.f32 %v4390_v7, %v778_v14 }
 0x318   : > { %v1299_v36 = vmul.f32 2.0, %v1060_v33  ;;  %3171 = vpow2.f32 %v1359_v25 }
 0x319   : > { %v3162_v37 = vpop.eup %3161  ;;  %v1381_v17 = vmul.f32 1.442695, %v1300_v35  ;;  %1267 = vadd.xlane.f32.xlu1 %v1012_v19  ;;  %1237 = vadd.xlane.f32.xlu0 %v982_v20 }
 0x31a   : > { %v1379_v39 = vmul.f32 1.442695, %v1299_v36  ;;  %v3164_v45 = vpop.eup %3163  ;;  %v1755_v46 = vrot.slane %v3162_v37, %v4558_v22  ;;  %v1158_v49 = vpop.xlane.xlu1 %1157 }
 0x31b   : > { %v1156_v50 = vpop.xlane.xlu0 %1155  ;;  %v1741_v51 = vrot.slane %v3164_v45, %v4564_v30  ;;  %3173 = vpow2.f32 %v1381_v17  ;;  %v1476_v52 = vmul.f32 2.0, %v1158_v49 }
 0x31c   : > { %v1475_v53 = vmul.f32 2.0, %v1156_v50  ;;  %3175 = vpow2.f32 %v1379_v39  ;;  %v1014_v39 = vmul.f32 %v4434_v44, %v838_v31 }
 0x31d   : > { %v3166_v57 = vpop.eup %3165  ;;  %v1743_v58 = vsel %vm1742_vm2, %v1741_v51, %v1736_v1  ;;  %v1541_v60 = vmul.f32 1.442695, %v1476_v52  ;;  %1081 = vadd.xlane.f32.xlu1 %v953_v5  ;;  %1049 = vadd.xlane.f32.xlu0 %v921_v41 }
 0x31e   : > { %v1539_v61 = vmul.f32 1.442695, %v1475_v53  ;;  %v3168_v63 = vpop.eup %3167  ;;  %v1750_v2 = vsel %vm1749_vm3, %v1748_v29, %v1743_v58  ;;  %v1769_v3 = vrot.slane %v3166_v57, %v4572_v16  ;;  %v1190_v11 = vpop.xlane.xlu1 %1189  ;;  %v922_v29 = vmul.f32 %v4383_v62, %v746_v18  ;;  %v747_v53 = vld [vmem:[%s4351_s2 + $0xc0] sm:$0xff] }
 0x31f   : > { %v1188_v12 = vpop.xlane.xlu0 %1187  ;;  %v1757_v19 = vsel %vm1756_vm4, %v1755_v46, %v1750_v2  ;;  %v1762_v20 = vrot.slane %v3168_v63, %v4579_v47  ;;  %3177 = vpow2.f32 %v1541_v60  ;;  %v1492_v21 = vmul.f32 2.0, %v1190_v11 }
 0x320   : > { %3179 = vpow2.f32 %v1539_v61  ;;  %v1491_v23 = vmul.f32 2.0, %v1188_v12  ;;  %v984_v46 = vmul.f32 %v4408_v26, %v808_v4  ;;  %v955_v60 = vmul.f32 %v4373_v56, %v779_v48  ;;  %v839_v12 = vld [vmem:[%s4351_s2 + $0x3a0] sm:$0xff] }
 0x321   : > { %v3170_v24 = vpop.eup %3169  ;;  %v1764_v25 = vsel %vm1763_vm5, %v1762_v20, %v1757_v19  ;;  %v1573_v27 = vmul.f32 1.442695, %v1492_v21  ;;  %1141 = vadd.xlane.f32.xlu1 %v1013_v54  ;;  %1111 = vadd.xlane.f32.xlu0 %v983_v55  ;;  %v923_v11 = vmul.f32 %v4356_v40, %v747_v53  ;;  %v809_v21 = vld [vmem:[%s4351_s2 + $0x2b0] sm:$0xff] }
 0x322   : > { %v3172_v32 = vpop.eup %3171  ;;  %v1783_v33 = vrot.slane %v3170_v24, %v4587_v59  ;;  %v1771_v0 = vsel %vm1770_vm6, %v1769_v3, %v1764_v25  ;;  %v1571_v1 = vmul.f32 1.442695, %v1491_v23  ;;  %v1092_v35 = vpop.xlane.xlu1 %1091 }
 0x323   : > { %v1064_v36 = vpop.xlane.xlu0 %1063  ;;  %v1776_v5 = vrot.slane %v3172_v32, %v4592_v10  ;;  %3181 = vpow2.f32 %v1573_v27  ;;  %v1315_v37 = vmul.f32 2.0, %v1092_v35  ;;  %v1015_v27 = vmul.f32 %v4419_v34, %v839_v12 }
 0x324   : > { %v1301_v17 = vmul.f32 2.0, %v1064_v36  ;;  %3183 = vpow2.f32 %v1571_v1 }
 0x325   : > { %v3174_v41 = vpop.eup %3173  ;;  %v1778_v42 = vsel %vm1777_vm7, %v1776_v5, %v1771_v0  ;;  %v1411_v43 = vmul.f32 1.442695, %v1315_v37  ;;  %1209 = vadd.xlane.f32.xlu1 %v954_v28  ;;  %1177 = vadd.xlane.f32.xlu0 %v922_v29  ;;  %v780_v0 = vld [vmem:[%s4351_s2 + $0x1c8] sm:$0xff] }
 0x326   : > { %v1383_v45 = vmul.f32 1.442695, %v1301_v17  ;;  %v3176_v49 = vpop.eup %3175  ;;  %v1849_v50 = vrot.slane %v3174_v41, %v4564_v30  ;;  %v1160_v51 = vpop.xlane.xlu1 %1159  ;;  %v4613_v54 = vsel %vm1784_vm8, %v1783_v33, %v1778_v42  ;;  %v985_v33 = vmul.f32 %v4397_v15, %v809_v21  ;;  %v748_v5 = vld [vmem:[%s4351_s2 + $0xc8] sm:$0xff] }
 0x327   : > { %v1094_v52 = vpop.xlane.xlu0 %1093  ;;  %v1845_v55 = vrot.slane %v3176_v49, %v4553_v13  ;;  %3185 = vpow2.f32 %v1411_v43  ;;  %v1477_v57 = vmul.f32 2.0, %v1160_v51  ;;  %v956_v41 = vmul.f32 %v4390_v7, %v780_v0  ;;  %v840_v49 = vld [vmem:[%s4351_s2 + $0x3a8] sm:$0xff] }
 0x328   : > { %v1316_v58 = vmul.f32 2.0, %v1094_v52  ;;  %3187 = vpow2.f32 %v1383_v45  ;;  %v924_v48 = vmul.f32 %v4383_v62, %v748_v5 }
 0x329   : > { %v3178_v61 = vpop.eup %3177  ;;  %v1850_v63 = vsel %vm1742_vm2, %v1849_v50, %v1845_v55  ;;  %v1543_v2 = vmul.f32 1.442695, %v1477_v57  ;;  %1269 = vadd.xlane.f32.xlu1 %v1014_v39  ;;  %1239 = vadd.xlane.f32.xlu0 %v984_v46  ;;  %v810_v55 = vld [vmem:[%s4351_s2 + $0x2b8] sm:$0xff] }
 0x32a   : > { %v1413_v3 = vmul.f32 1.442695, %v1316_v58  ;;  %v3180_v14 = vpop.eup %3179  ;;  %v2158_v18 = vrot.slane %v3178_v61, %v4564_v30  ;;  %v1220_v19 = vpop.xlane.xlu1 %1219  ;;  %v1016_v61 = vmul.f32 %v4434_v44, %v840_v49 }
 0x32b   : > { %v1192_v20 = vpop.xlane.xlu0 %1191  ;;  %v2154_v23 = vrot.slane %v3180_v14, %v4553_v13  ;;  %3189 = vpow2.f32 %v1543_v2  ;;  %v1507_v24 = vmul.f32 2.0, %v1220_v19  ;;  %v986_v14 = vmul.f32 %v4408_v26, %v810_v55 }
 0x32c   : > { %v1493_v25 = vmul.f32 2.0, %v1192_v20  ;;  %3191 = vpow2.f32 %v1413_v3 }
 0x32d   : > { %v3182_v28 = vpop.eup %3181  ;;  %v2159_v29 = vsel %vm1742_vm2, %v2158_v18, %v2154_v23  ;;  %v1603_v31 = vmul.f32 1.442695, %v1507_v24  ;;  %1083 = vadd.xlane.f32.xlu1 %v955_v60  ;;  %1051 = vadd.xlane.f32.xlu0 %v923_v11  ;;  %v781_v18 = vld [vmem:[%s4351_s2 + $0x1d0] sm:$0xff] }
 0x32e   : > { %v1575_v32 = vmul.f32 1.442695, %v1493_v25  ;;  %v3184_v1 = vpop.eup %3183  ;;  %v2237_v35 = vrot.slane %v3182_v28, %v4564_v30  ;;  %v1066_v36 = vpop.xlane.xlu1 %1065  ;;  %v749_v24 = vld [vmem:[%s4351_s2 + $0xd0] sm:$0xff] }
 0x32f   : > { %v1222_v4 = vpop.xlane.xlu0 %1221  ;;  %v2233_v37 = vrot.slane %v3184_v1, %v4553_v13  ;;  %3193 = vpow2.f32 %v1603_v31  ;;  %v1302_v17 = vmul.f32 2.0, %v1066_v36  ;;  %v957_v31 = vmul.f32 %v4373_v56, %v781_v18  ;;  %v841_v36 = vld [vmem:[%s4351_s2 + $0x3b0] sm:$0xff] }
 0x330   : > { %v1508_v39 = vmul.f32 2.0, %v1222_v4  ;;  %3195 = vpow2.f32 %v1575_v32 }
 0x331   : > { %v3186_v42 = vpop.eup %3185  ;;  %v2238_v43 = vsel %vm1742_vm2, %v2237_v35, %v2233_v37  ;;  %v1385_v45 = vmul.f32 1.442695, %v1302_v17  ;;  %1143 = vadd.xlane.f32.xlu1 %v1015_v27  ;;  %1113 = vadd.xlane.f32.xlu0 %v985_v33  ;;  %v925_v35 = vmul.f32 %v4356_v40, %v749_v24  ;;  %v811_v17 = vld [vmem:[%s4351_s2 + $0x2c0] sm:$0xff] }
 0x332   : > { %v1605_v46 = vmul.f32 1.442695, %v1508_v39  ;;  %v3188_v50 = vpop.eup %3187  ;;  %v1924_v51 = vrot.slane %v3186_v42, %v4553_v13  ;;  %v1124_v52 = vpop.xlane.xlu1 %1123 }
 0x333   : > { %v1096_v53 = vpop.xlane.xlu0 %1095  ;;  %v1854_v57 = vrot.slane %v3188_v50, %v4548_v6  ;;  %3197 = vpow2.f32 %v1385_v45  ;;  %v1331_v58 = vmul.f32 2.0, %v1124_v52  ;;  %v1017_v45 = vmul.f32 %v4419_v34, %v841_v36  ;;  %v782_v52 = vld [vmem:[%s4351_s2 + $0x1d8] sm:$0xff] }
 0x334   : > { %v1317_v60 = vmul.f32 2.0, %v1096_v53  ;;  %3199 = vpow2.f32 %v1605_v46 }
 0x335   : > { %v3190_v2 = vpop.eup %3189  ;;  %v1855_v3 = vsel %vm1749_vm3, %v1854_v57, %v1850_v63  ;;  %v1443_v11 = vmul.f32 1.442695, %v1331_v58  ;;  %1211 = vadd.xlane.f32.xlu1 %v956_v41  ;;  %1179 = vadd.xlane.f32.xlu0 %v924_v48 }
 0x336   : > { %v1415_v12 = vmul.f32 1.442695, %v1317_v60  ;;  %v3192_v19 = vpop.eup %3191  ;;  %v2163_v20 = vrot.slane %v3190_v2, %v4548_v6  ;;  %v1162_v21 = vpop.xlane.xlu1 %1161  ;;  %v750_v60 = vld [vmem:[%s4351_s2 + $0xd8] sm:$0xff] }
 0x337   : > { %v1126_v23 = vpop.xlane.xlu0 %1125  ;;  %v1928_v25 = vrot.slane %v3192_v19, %v4564_v30  ;;  %3201 = vpow2.f32 %v1443_v11  ;;  %v1478_v27 = vmul.f32 2.0, %v1162_v21  ;;  %v926_v21 = vmul.f32 %v4383_v62, %v750_v60  ;;  %v843_v60 = vld [vmem:[%s4351_s2 + $0x3c0] sm:$0xff] }
 0x338   : > { %v1332_v28 = vmul.f32 2.0, %v1126_v23  ;;  %v4645_v63 = vsel %vm1749_vm3, %v2163_v20, %v2159_v29  ;;  %3203 = vpow2.f32 %v1415_v12  ;;  %v958_v12 = vmul.f32 %v4390_v7, %v782_v52  ;;  %v842_v23 = vld [vmem:[%s4351_s2 + $0x3b8] sm:$0xff] }
 0x339   : > { %v3194_v32 = vpop.eup %3193  ;;  %v1929_v33 = vsel %vm1742_vm2, %v1928_v25, %v1924_v51  ;;  %v1545_v0 = vmul.f32 1.442695, %v1478_v27  ;;  %1271 = vadd.xlane.f32.xlu1 %v1016_v61  ;;  %1241 = vadd.xlane.f32.xlu0 %v986_v14  ;;  %v987_v51 = vmul.f32 %v4397_v15, %v811_v17 }
 0x33a   : > { %v1445_v1 = vmul.f32 1.442695, %v1332_v28  ;;  %v3196_v4 = vpop.eup %3195  ;;  %v2312_v5 = vrot.slane %v3194_v32, %v4553_v13  ;;  %v1224_v37 = vpop.xlane.xlu1 %1223  ;;  %v812_v28 = vld [vmem:[%s4351_s2 + $0x2c8] sm:$0xff] }
 0x33b   : > { %v1194_v29 = vpop.xlane.xlu0 %1193  ;;  %v2242_v39 = vrot.slane %v3196_v4, %v4548_v6  ;;  %3205 = vpow2.f32 %v1545_v0  ;;  %v1509_v41 = vmul.f32 2.0, %v1224_v37  ;;  %v988_v37 = vmul.f32 %v4408_v26, %v812_v28 }
 0x33c   : > { %v1494_v42 = vmul.f32 2.0, %v1194_v29  ;;  %3207 = vpow2.f32 %v1445_v1  ;;  %v1018_v1 = vmul.f32 %v4434_v44, %v842_v23  ;;  %v783_v29 = vld [vmem:[%s4351_s2 + $0x1e0] sm:$0xff]  ;;  %v1019_v23 = vmul.f32 %v4419_v34, %v843_v60 }
 0x33d   : > { %v3198_v46 = vpop.eup %3197  ;;  %v4656_v48 = vsel %vm1749_vm3, %v2242_v39, %v2238_v43  ;;  %v1607_v49 = vmul.f32 1.442695, %v1509_v41  ;;  %1085 = vadd.xlane.f32.xlu1 %v957_v31  ;;  %1053 = vadd.xlane.f32.xlu0 %v925_v35 }
 0x33e   : > { %v1577_v50 = vmul.f32 1.442695, %v1494_v42  ;;  %v3200_v53 = vpop.eup %3199  ;;  %v1859_v55 = vrot.slane %v3198_v46, %v4558_v22  ;;  %v1254_v57 = vpop.xlane.xlu1 %1253 }
 0x33f   : > { %v1252_v58 = vpop.xlane.xlu0 %1251  ;;  %v2316_v61 = vrot.slane %v3200_v53, %v4564_v30  ;;  %3209 = vpow2.f32 %v1607_v49  ;;  %v1524_v2 = vmul.f32 2.0, %v1254_v57 }
 0x340   : > { %v1523_v43 = vmul.f32 2.0, %v1252_v58  ;;  %v4664_v11 = vsel %vm1756_vm4, %v1859_v55, %v1855_v3  ;;  %3211 = vpow2.f32 %v1577_v50 }
 0x341   : > { %v3202_v14 = vpop.eup %3201  ;;  %v2317_v18 = vsel %vm1742_vm2, %v2316_v61, %v2312_v5  ;;  %v1637_v19 = vmul.f32 1.442695, %v1524_v2  ;;  %1145 = vadd.xlane.f32.xlu1 %v1017_v45  ;;  %1115 = vadd.xlane.f32.xlu0 %v987_v51  ;;  %v751_v45 = vld [vmem:[%s4351_s2 + $0xe0] sm:$0xff]  ;;  %v959_v51 = vmul.f32 %v4373_v56, %v783_v29 }
 0x342   : > { %v1635_v20 = vmul.f32 1.442695, %v1523_v43  ;;  %v3204_v24 = vpop.eup %3203  ;;  %v2003_v25 = vrot.slane %v3202_v14, %v4553_v13  ;;  %v1098_v27 = vpop.xlane.xlu1 %1097  ;;  %v927_v58 = vmul.f32 %v4356_v40, %v751_v45 }
 0x343   : > { %v1068_v3 = vpop.xlane.xlu0 %1067  ;;  %v1933_v31 = vrot.slane %v3204_v24, %v4548_v6  ;;  %3213 = vpow2.f32 %v1637_v19  ;;  %v1318_v32 = vmul.f32 2.0, %v1098_v27 }
 0x344   : > { %v1303_v0 = vmul.f32 2.0, %v1068_v3  ;;  %3215 = vpow2.f32 %v1635_v20 }
 0x345   : > { %v3206_v35 = vpop.eup %3205  ;;  %v4675_v36 = vsel %vm1749_vm3, %v1933_v31, %v1929_v33  ;;  %v1417_v4 = vmul.f32 1.442695, %v1318_v32  ;;  %1213 = vadd.xlane.f32.xlu1 %v958_v12  ;;  %1181 = vadd.xlane.f32.xlu0 %v926_v21  ;;  %v813_v12 = vld [vmem:[%s4351_s2 + $0x2d0] sm:$0xff]  ;;  %v784_v31 = vld [vmem:[%s4351_s2 + $0x1e8] sm:$0xff] }
 0x346   : > { %v1387_v5 = vmul.f32 1.442695, %v1303_v0  ;;  %v3208_v17 = vpop.eup %3207  ;;  %v2168_v39 = vrot.slane %v3206_v35, %v4558_v22  ;;  %v1164_v41 = vpop.xlane.xlu1 %1163  ;;  %v989_v28 = vmul.f32 %v4397_v15, %v813_v12  ;;  %v752_v35 = vld [vmem:[%s4351_s2 + $0xe8] sm:$0xff]  ;;  %v785_v12 = vld [vmem:[%s4351_s2 + $0x1f0] sm:$0xff] }
 0x347   : > { %v1128_v42 = vpop.xlane.xlu0 %1127  ;;  %v2007_v46 = vrot.slane %v3208_v17, %v4564_v30  ;;  %3217 = vpow2.f32 %v1417_v4  ;;  %v1479_v49 = vmul.f32 2.0, %v1164_v41 }
 0x348   : > { %v1333_v33 = vmul.f32 2.0, %v1128_v42  ;;  %v4684_v50 = vsel %vm1756_vm4, %v2168_v39, %v4645_v63  ;;  %3219 = vpow2.f32 %v1387_v5  ;;  %v844_v42 = vld [vmem:[%s4351_s2 + $0x3c8] sm:$0xff] }
 0x349   : > { %v3210_v52 = vpop.eup %3209  ;;  %v4688_v53 = vsel %vm1742_vm2, %v2007_v46, %v2003_v25  ;;  %v1547_v55 = vmul.f32 1.442695, %v1479_v49  ;;  %1273 = vadd.xlane.f32.xlu1 %v1018_v1  ;;  %1243 = vadd.xlane.f32.xlu0 %v988_v37  ;;  %v960_v37 = vmul.f32 %v4390_v7, %v784_v31 }
 0x34a   : > { %v1447_v57 = vmul.f32 1.442695, %v1333_v33  ;;  %v3212_v61 = vpop.eup %3211  ;;  %v2321_v2 = vrot.slane %v3210_v52, %v4548_v6  ;;  %v1226_v43 = vpop.xlane.xlu1 %1225  ;;  %v814_v33 = vld [vmem:[%s4351_s2 + $0x2d8] sm:$0xff] }
 0x34b   : > { %v1196_v63 = vpop.xlane.xlu0 %1195  ;;  %v2247_v14 = vrot.slane %v3212_v61, %v4558_v22  ;;  %3221 = vpow2.f32 %v1547_v55  ;;  %v1510_v19 = vmul.f32 2.0, %v1226_v43 }
 0x34c   : > { %v1495_v20 = vmul.f32 2.0, %v1196_v63  ;;  %v4696_v21 = vsel %vm1749_vm3, %v2321_v2, %v2317_v18  ;;  %3223 = vpow2.f32 %v1447_v57  ;;  %v990_v63 = vmul.f32 %v4408_v26, %v814_v33 }
 0x34d   : > { %v3214_v24 = vpop.eup %3213  ;;  %v4701_v25 = vsel %vm1756_vm4, %v2247_v14, %v4656_v48  ;;  %v1609_v27 = vmul.f32 1.442695, %v1510_v19  ;;  %1087 = vadd.xlane.f32.xlu1 %v959_v51  ;;  %1055 = vadd.xlane.f32.xlu0 %v927_v58  ;;  %v1020_v58 = vmul.f32 %v4434_v44, %v844_v42 }
 0x34e   : > { %v1579_v3 = vmul.f32 1.442695, %v1495_v20  ;;  %v3216_v32 = vpop.eup %3215  ;;  %v2395_v0 = vrot.slane %v3214_v24, %v4564_v30  ;;  %v1070_v18 = vpop.xlane.xlu1 %1069  ;;  %v928_v30 = vmul.f32 %v4383_v62, %v752_v35  ;;  %v845_v35 = vld [vmem:[%s4351_s2 + $0x3d0] sm:$0xff] }
 0x34f   : > { %v1256_v1 = vpop.xlane.xlu0 %1255  ;;  %v2391_v4 = vrot.slane %v3216_v32, %v4553_v13  ;;  %3225 = vpow2.f32 %v1609_v27  ;;  %v1304_v5 = vmul.f32 2.0, %v1070_v18 }
 0x350   : > { %v1525_v48 = vmul.f32 2.0, %v1256_v1  ;;  %3227 = vpow2.f32 %v1579_v3 }
 0x351   : > { %v3218_v29 = vpop.eup %3217  ;;  %v4710_v17 = vsel %vm1742_vm2, %v2395_v0, %v2391_v4  ;;  %v1389_v39 = vmul.f32 1.442695, %v1304_v5  ;;  %1147 = vadd.xlane.f32.xlu1 %v1019_v23  ;;  %1117 = vadd.xlane.f32.xlu0 %v989_v28  ;;  %v753_v23 = vld [vmem:[%s4351_s2 + $0xf0] sm:$0xff]  ;;  %v961_v28 = vmul.f32 %v4373_v56, %v785_v12  ;;  %vm2081_vm2 = vcmask 1042434  }
 0x352   : > { %v1639_v41 = vmul.f32 1.442695, %v1525_v48  ;;  %v3220_v45 = vpop.eup %3219  ;;  %v1938_v13 = vrot.slane %v3218_v29, %v4558_v22  ;;  %v1130_v46 = vpop.xlane.xlu1 %1129  ;;  %v929_v1 = vmul.f32 %v4356_v40, %v753_v23  ;;  %v1021_v40 = vmul.f32 %v4419_v34, %v845_v35  ;;  %v847_v35 = vld [vmem:[%s4351_s2 + $0x3e0] sm:$0xff] }
 0x353   : > { %v1100_v49 = vpop.xlane.xlu0 %1099  ;;  %v1864_v51 = vrot.slane %v3220_v45, %v4579_v47  ;;  %3229 = vpow2.f32 %v1389_v39  ;;  %v1334_v52 = vmul.f32 2.0, %v1130_v46  ;;  %v786_v46 = vld [vmem:[%s4351_s2 + $0x1f8] sm:$0xff] }
 0x354   : > { %v1319_v55 = vmul.f32 2.0, %v1100_v49  ;;  %v4719_v57 = vsel %vm1756_vm4, %v1938_v13, %v4675_v36  ;;  %3231 = vpow2.f32 %v1639_v41 }
 0x355   : > { %v3222_v60 = vpop.eup %3221  ;;  %v1865_v61 = vsel %vm1763_vm5, %v1864_v51, %v4664_v11  ;;  %v1449_v2 = vmul.f32 1.442695, %v1334_v52  ;;  %1215 = vadd.xlane.f32.xlu1 %v960_v37  ;;  %1183 = vadd.xlane.f32.xlu0 %v928_v30  ;;  %v815_v37 = vld [vmem:[%s4351_s2 + $0x2e0] sm:$0xff]  ;;  %v754_v52 = vld [vmem:[%s4351_s2 + $0xf8] sm:$0xff] }
 0x356   : > { %v1419_v43 = vmul.f32 1.442695, %v1319_v55  ;;  %v3224_v14 = vpop.eup %3223  ;;  %v2173_v19 = vrot.slane %v3222_v60, %v4579_v47  ;;  %v1198_v20 = vpop.xlane.xlu1 %1197  ;;  %v991_v13 = vmul.f32 %v4397_v15, %v815_v37 }
 0x357   : > { %v1166_v36 = vpop.xlane.xlu0 %1165  ;;  %v2012_v24 = vrot.slane %v3224_v14, %v4548_v6  ;;  %3233 = vpow2.f32 %v1449_v2  ;;  %v1496_v27 = vmul.f32 2.0, %v1198_v20  ;;  %v962_v2 = vmul.f32 %v4390_v7, %v786_v46  ;;  %v848_v46 = vld [vmem:[%s4351_s2 + $0x3e8] sm:$0xff] }
 0x358   : > { %v1480_v3 = vmul.f32 2.0, %v1166_v36  ;;  %v4731_v11 = vsel %vm1763_vm5, %v2173_v19, %v4684_v50  ;;  %3235 = vpow2.f32 %v1419_v43  ;;  %v846_v19 = vld [vmem:[%s4351_s2 + $0x3d8] sm:$0xff] }
 0x359   : > { %v3226_v31 = vpop.eup %3225  ;;  %v2013_v32 = vsel %vm1749_vm3, %v2012_v24, %v4688_v53  ;;  %v1581_v0 = vmul.f32 1.442695, %v1496_v27  ;;  %1275 = vadd.xlane.f32.xlu1 %v1020_v58  ;;  %1245 = vadd.xlane.f32.xlu0 %v990_v63  ;;  %v816_v24 = vld [vmem:[%s4351_s2 + $0x2e8] sm:$0xff] }
 0x35a   : > { %v1549_v18 = vmul.f32 1.442695, %v1480_v3  ;;  %v3228_v4 = vpop.eup %3227  ;;  %v2326_v5 = vrot.slane %v3226_v31, %v4558_v22  ;;  %v1258_v48 = vpop.xlane.xlu1 %1257 }
 0x35b   : > { %v1228_v50 = vpop.xlane.xlu0 %1227  ;;  %v2252_v56 = vrot.slane %v3228_v4, %v4579_v47  ;;  %3237 = vpow2.f32 %v1581_v0  ;;  %v1526_v29 = vmul.f32 2.0, %v1258_v48 }
 0x35c   : > { %v1511_v39 = vmul.f32 2.0, %v1228_v50  ;;  %v4743_v53 = vsel %vm1756_vm4, %v2326_v5, %v4696_v21  ;;  %3239 = vpow2.f32 %v1549_v18  ;;  %v817_v50 = vld [vmem:[%s4351_s2 + $0x2f0] sm:$0xff] }
 0x35d   : > { %v3230_v41 = vpop.eup %3229  ;;  %v2253_v30 = vsel %vm1763_vm5, %v2252_v56, %v4701_v25  ;;  %v1641_v42 = vmul.f32 1.442695, %v1526_v29  ;;  %1089 = vadd.xlane.f32.xlu1 %v961_v28  ;;  %1057 = vadd.xlane.f32.xlu0 %v929_v1  ;;  %v992_v1 = vmul.f32 %v4408_v26, %v816_v24 }
 0x35e   : > { %v1611_v45 = vmul.f32 1.442695, %v1511_v39  ;;  %v3232_v49 = vpop.eup %3231  ;;  %v1869_v33 = vrot.slane %v3230_v41, %v4572_v16  ;;  %v1102_v51 = vpop.xlane.xlu1 %1101  ;;  %v1023_v39 = vmul.f32 %v4419_v34, %v847_v35 }
 0x35f   : > { %v1072_v21 = vpop.xlane.xlu0 %1071  ;;  %v2400_v55 = vrot.slane %v3232_v49, %v4548_v6  ;;  %3241 = vpow2.f32 %v1641_v42  ;;  %v1320_v58 = vmul.f32 2.0, %v1102_v51  ;;  %v930_v6 = vmul.f32 %v4383_v62, %v754_v52 }
 0x360   : > { %v1305_v60 = vmul.f32 2.0, %v1072_v21  ;;  %v4754_v25 = vsel %vm1770_vm6, %v1869_v33, %v1865_v61  ;;  %3243 = vpow2.f32 %v1611_v45  ;;  %v1022_v62 = vmul.f32 %v4434_v44, %v846_v19  ;;  %v818_v21 = vld [vmem:[%s4351_s2 + $0x2f8] sm:$0xff] }
 0x361   : > { %v3234_v43 = vpop.eup %3233  ;;  %v2401_v63 = vsel %vm1749_vm3, %v2400_v55, %v4710_v17  ;;  %v1421_v12 = vmul.f32 1.442695, %v1320_v58  ;;  %1149 = vadd.xlane.f32.xlu1 %v1021_v40  ;;  %1119 = vadd.xlane.f32.xlu0 %v991_v13  ;;  %v993_v13 = vmul.f32 %v4397_v15, %v817_v50  ;;  %v1024_v15 = vmul.f32 %v4434_v44, %v848_v46 }
 0x362   : > { %v1391_v14 = vmul.f32 1.442695, %v1305_v60  ;;  %v3236_v20 = vpop.eup %3235  ;;  %v2017_v36 = vrot.slane %v3234_v43, %v4558_v22  ;;  %v1168_v23 = vpop.xlane.xlu1 %1167  ;;  %vm2083_vm3 = vcmask 1043459  }
 0x363   : > { %v1132_v61 = vpop.xlane.xlu0 %1131  ;;  %v1943_v7 = vrot.slane %v3236_v20, %v4579_v47  ;;  %3245 = vpow2.f32 %v1421_v12  ;;  %v1481_v27 = vmul.f32 2.0, %v1168_v23  ;;  %v994_v12 = vmul.f32 %v4408_v26, %v818_v21 }
 0x364   : > { %v1335_v3 = vmul.f32 2.0, %v1132_v61  ;;  %v4765_v17 = vsel %vm1756_vm4, %v2017_v36, %v2013_v32  ;;  %3247 = vpow2.f32 %v1391_v14  ;;  %v850_v14 = vld [vmem:[%s4351_s2 + $0x3f8] sm:$0xff]  ;;  %v849_v36 = vld [vmem:[%s4351_s2 + $0x3f0] sm:$0xff] }
 0x365   : > { %v3238_v28 = vpop.eup %3237  ;;  %v1944_v31 = vsel %vm1763_vm5, %v1943_v7, %v4719_v57  ;;  %v1551_v0 = vmul.f32 1.442695, %v1481_v27  ;;  %1217 = vadd.xlane.f32.xlu1 %v962_v2  ;;  %1185 = vadd.xlane.f32.xlu0 %v930_v6  ;;  %v1026_v7 = vmul.f32 %v4434_v44, %v850_v14 }
 0x366   : > { %v1451_v18 = vmul.f32 1.442695, %v1335_v3  ;;  %v3240_v4 = vpop.eup %3239  ;;  %v2257_v5 = vrot.slane %v3238_v28, %v4572_v16  ;;  %v1230_v48 = vpop.xlane.xlu1 %1229  ;;  %v1025_v28 = vmul.f32 %v4419_v34, %v849_v36 }
 0x367   : > { %v1200_v32 = vpop.xlane.xlu0 %1199  ;;  %v2178_v37 = vrot.slane %v3240_v4, %v4572_v16  ;;  %3249 = vpow2.f32 %v1551_v0  ;;  %v1512_v56 = vmul.f32 2.0, %v1230_v48 }
 0x368   : > { %v1497_v29 = vmul.f32 2.0, %v1200_v32  ;;  %v4776_v57 = vsel %vm1770_vm6, %v2257_v5, %v2253_v30  ;;  %3251 = vpow2.f32 %v1451_v18 }
 0x369   : > { %v3242_v40 = vpop.eup %3241  ;;  %v2179_v41 = vsel %vm1770_vm6, %v2178_v37, %v4731_v11  ;;  %v1613_v42 = vmul.f32 1.442695, %v1512_v56  ;;  %1277 = vadd.xlane.f32.xlu1 %v1022_v62  ;;  %1247 = vadd.xlane.f32.xlu0 %v992_v1 }
 0x36a   : > { %v1583_v45 = vmul.f32 1.442695, %v1497_v29  ;;  %v3244_v49 = vpop.eup %3243  ;;  %v2405_v33 = vrot.slane %v3242_v40, %v4558_v22  ;;  %v1074_v51 = vpop.xlane.xlu1 %1073 }
 0x36b   : > { %v1260_v30 = vpop.xlane.xlu0 %1259  ;;  %v2331_v52 = vrot.slane %v3244_v49, %v4579_v47  ;;  %3253 = vpow2.f32 %v1613_v42  ;;  %v1306_v55 = vmul.f32 2.0, %v1074_v51 }
 0x36c   : > { %v1527_v58 = vmul.f32 2.0, %v1260_v30  ;;  %v4787_v11 = vsel %vm1756_vm4, %v2405_v33, %v2401_v63  ;;  %3255 = vpow2.f32 %v1583_v45 }
 0x36d   : > { %v3246_v60 = vpop.eup %3245  ;;  %v2332_v22 = vsel %vm1763_vm5, %v2331_v52, %v4743_v53  ;;  %v1393_v2 = vmul.f32 1.442695, %v1306_v55  ;;  %1151 = vadd.xlane.f32.xlu1 %v1023_v39  ;;  %1121 = vadd.xlane.f32.xlu0 %v993_v13 }
 0x36e   : > { %v1643_v43 = vmul.f32 1.442695, %v1527_v58  ;;  %v3248_v6 = vpop.eup %3247  ;;  %v1948_v19 = vrot.slane %v3246_v60, %v4572_v16  ;;  %v1134_v20 = vpop.xlane.xlu1 %1133 }
 0x36f   : > { %v1104_v63 = vpop.xlane.xlu0 %1103  ;;  %v1874_v23 = vrot.slane %v3248_v6, %v4592_v10  ;;  %3257 = vpow2.f32 %v1393_v2  ;;  %v1336_v61 = vmul.f32 2.0, %v1134_v20 }
 0x370   : > { %v1321_v24 = vmul.f32 2.0, %v1104_v63  ;;  %v4798_v53 = vsel %vm1770_vm6, %v1948_v19, %v1944_v31  ;;  %3259 = vpow2.f32 %v1643_v43 }
 0x371   : > { %v3250_v27 = vpop.eup %3249  ;;  %v1875_v26 = vsel %vm1777_vm7, %v1874_v23, %v4754_v25  ;;  %v1453_v3 = vmul.f32 1.442695, %v1336_v61  ;;  %1279 = vadd.xlane.f32.xlu1 %v1024_v15  ;;  %1249 = vadd.xlane.f32.xlu0 %v994_v12 }
 0x372   : > { %v1423_v62 = vmul.f32 1.442695, %v1321_v24  ;;  %v3252_v0 = vpop.eup %3251  ;;  %v2183_v18 = vrot.slane %v3250_v27, %v4592_v10  ;;  %v1202_v1 = vpop.xlane.xlu1 %1201 }
 0x373   : > { %v1170_v35 = vpop.xlane.xlu0 %1169  ;;  %v2022_v31 = vrot.slane %v3252_v0, %v4579_v47  ;;  %3261 = vpow2.f32 %v1453_v3  ;;  %v1498_v4 = vmul.f32 2.0, %v1202_v1 }
 0x374   : > { %v1482_v44 = vmul.f32 2.0, %v1170_v35  ;;  %v4807_v5 = vsel %vm1777_vm7, %v2183_v18, %v2179_v41  ;;  %3263 = vpow2.f32 %v1423_v62 }
 0x375   : > { %v3254_v25 = vpop.eup %3253  ;;  %v2023_v48 = vsel %vm1763_vm5, %v2022_v31, %v4765_v17  ;;  %v1585_v32 = vmul.f32 1.442695, %v1498_v4  ;;  %1281 = vadd.xlane.f32.xlu1 %v1026_v7  ;;  %1153 = vadd.xlane.f32.xlu0 %v1025_v28  ;;  %v1786_v7 = vadd.s32 4294967232, %v4533_v38 }
 0x376   : > { %v1553_v34 = vmul.f32 1.442695, %v1482_v44  ;;  %v3256_v50 = vpop.eup %3255  ;;  %v2336_v37 = vrot.slane %v3254_v25, %v4572_v16  ;;  %v1262_v56 = vpop.xlane.xlu1 %1261 }
 0x377   : > { %v1232_v29 = vpop.xlane.xlu0 %1231  ;;  %v2262_v39 = vrot.slane %v3256_v50, %v4592_v10  ;;  %3265 = vpow2.f32 %v1585_v32  ;;  %v1528_v40 = vmul.f32 2.0, %v1262_v56  ;;  %v4834_v44 = vsub.s32 %v1786_v7, %v4346_v9 }
 0x378   : > { %v1513_v41 = vmul.f32 2.0, %v1232_v29  ;;  %v2337_v42 = vsel %vm1770_vm6, %v2336_v37, %v2332_v22  ;;  %3267 = vpow2.f32 %v1553_v34 }
 0x379   : > { %v3258_v45 = vpop.eup %3257  ;;  %v2263_v17 = vsel %vm1777_vm7, %v2262_v39, %v4776_v57  ;;  %v1645_v13 = vmul.f32 1.442695, %v1528_v40 }
 0x37a   : > { %v1615_v46 = vmul.f32 1.442695, %v1513_v41  ;;  %v3260_v49 = vpop.eup %3259  ;;  %v1879_v33 = vrot.slane %v3258_v45, %v4587_v59  ;;  %v1076_v51 = vpop.xlane.xlu1 %1075 }
 0x37b   : > { %v1044_v30 = vpop.xlane.xlu0 %1043  ;;  %v2410_v21 = vrot.slane %v3260_v49, %v4579_v47  ;;  %3269 = vpow2.f32 %v1645_v13  ;;  %v1307_v52 = vmul.f32 2.0, %v1076_v51 }
 0x37c   : > { %v1291_v55 = vmul.f32 2.0, %v1044_v30  ;;  %v1880_v58 = vsel %vm1784_vm8, %v1879_v33, %v1875_v26  ;;  %3271 = vpow2.f32 %v1615_v46 }
 0x37d   : > { %v3262_v15 = vpop.eup %3261  ;;  %v2411_v60 = vsel %vm1763_vm5, %v2410_v21, %v4787_v11  ;;  %v1395_v57 = vmul.f32 1.442695, %v1307_v52  ;;  %vm2478_vm5 = vcmask 1043456  }
 0x37e   : > { %v1363_v22 = vmul.f32 1.442695, %v1291_v55  ;;  %v3264_v2 = vpop.eup %3263  ;;  %v2027_v43 = vrot.slane %v3262_v15, %v4572_v16  ;;  %v1136_v12 = vpop.xlane.xlu1 %1135 }
 0x37f   : > { %v1106_v14 = vpop.xlane.xlu0 %1105  ;;  %v1953_v6 = vrot.slane %v3264_v2, %v4592_v10  ;;  %3273 = vpow2.f32 %v1395_v57  ;;  %v1337_v47 = vmul.f32 2.0, %v1136_v12 }
 0x380   : > { %v1322_v19 = vmul.f32 2.0, %v1106_v14  ;;  %v2028_v20 = vsel %vm1770_vm6, %v2027_v43, %v2023_v48  ;;  %3275 = vpow2.f32 %v1363_v22 }
 0x381   : > { %v3266_v63 = vpop.eup %3265  ;;  %v1954_v36 = vsel %vm1777_vm7, %v1953_v6, %v4798_v53  ;;  %v1455_v11 = vmul.f32 1.442695, %v1337_v47  ;;  %v1793_v47 = vadd.s32 4294967224, %v4533_v38 }
 0x382   : > { %v1425_v23 = vmul.f32 1.442695, %v1322_v19  ;;  %v3268_v61 = vpop.eup %3267  ;;  %v2267_v24 = vrot.slane %v3266_v63, %v4587_v59  ;;  %v1204_v27 = vpop.xlane.xlu1 %1203 }
 0x383   : > { %v1172_v26 = vpop.xlane.xlu0 %1171  ;;  %v2188_v3 = vrot.slane %v3268_v61, %v4587_v59  ;;  %3277 = vpow2.f32 %v1455_v11  ;;  %v1499_v62 = vmul.f32 2.0, %v1204_v27 }
 0x384   : > { %v1483_v28 = vmul.f32 2.0, %v1172_v26  ;;  %v2268_v0 = vsel %vm1784_vm8, %v2267_v24, %v2263_v17  ;;  %3279 = vpow2.f32 %v1425_v23 }
 0x385   : > { %v3270_v18 = vpop.eup %3269  ;;  %v2189_v53 = vsel %vm1784_vm8, %v2188_v3, %v4807_v5  ;;  %v1587_v1 = vmul.f32 1.442695, %v1499_v62  ;;  %v4855_v62 = vsub.s32 %v1793_v47, %v4346_v9 }
 0x386   : > { %v1555_v35 = vmul.f32 1.442695, %v1483_v28  ;;  %v3272_v31 = vpop.eup %3271  ;;  %v2415_v4 = vrot.slane %v3270_v18, %v4572_v16  ;;  %v1264_v25 = vpop.xlane.xlu1 %1263 }
 0x387   : > { %v1234_v48 = vpop.xlane.xlu0 %1233  ;;  %v2341_v32 = vrot.slane %v3272_v31, %v4592_v10  ;;  %3281 = vpow2.f32 %v1587_v1  ;;  %v1529_v34 = vmul.f32 2.0, %v1264_v25 }
 0x388   : > { %v1514_v50 = vmul.f32 2.0, %v1234_v48  ;;  %v2416_v37 = vsel %vm1770_vm6, %v2415_v4, %v2411_v60  ;;  %3283 = vpow2.f32 %v1555_v35  ;;  %vm2513_vm6 = vcmp.eq.s32.totalorder (!%p3007_p2), %v4533_v38, 1 }
 0x389   : > { %v3274_v56 = vpop.eup %3273  ;;  %v2342_v5 = vsel %vm1777_vm7, %v2341_v32, %v2337_v42  ;;  %v1647_v29 = vmul.f32 1.442695, %v1529_v34 }
 0x38a   : > { %v1617_v39 = vmul.f32 1.442695, %v1514_v50  ;;  %v3276_v16 = vpop.eup %3275  ;;  %v1884_v40 = vrot.slane %v3274_v56, %v4834_v44  ;;  %v1078_v41 = vpop.xlane.xlu1 %1077 }
 0x38b   : > { %v1046_v45 = vpop.xlane.xlu0 %1045  ;;  %v1790_v17 = vrot.slane %v3276_v16, %v4834_v44  ;;  %3285 = vpow2.f32 %v1647_v29  ;;  %v1308_v13 = vmul.f32 2.0, %v1078_v41 }
 0x38c   : > { %v1292_v46 = vmul.f32 2.0, %v1046_v45  ;;  %v1885_v49 = vsel %vm1791_vm9, %v1884_v40, %v1880_v58  ;;  %3287 = vpow2.f32 %v1617_v39 }
 0x38d   : > { %v3278_v33 = vpop.eup %3277  ;;  %v1792_v42 = vsel %vm1791_vm9, %v1790_v17, %v4613_v54  ;;  %v1397_v51 = vmul.f32 1.442695, %v1308_v13 }
 0x38e   : > { %v1365_v30 = vmul.f32 1.442695, %v1292_v46  ;;  %v3280_v21 = vpop.eup %3279  ;;  %v2032_v52 = vrot.slane %v3278_v33, %v4592_v10  ;;  %v1138_v55 = vpop.xlane.xlu1 %1137 }
 0x38f   : > { %v1108_v15 = vpop.xlane.xlu0 %1107  ;;  %v1958_v60 = vrot.slane %v3280_v21, %v4587_v59  ;;  %3289 = vpow2.f32 %v1397_v51  ;;  %v1338_v57 = vmul.f32 2.0, %v1138_v55 }
 0x390   : > { %v1323_v22 = vmul.f32 2.0, %v1108_v15  ;;  %v2033_v2 = vsel %vm1777_vm7, %v2032_v52, %v2028_v20  ;;  %3291 = vpow2.f32 %v1365_v30 }
 0x391   : > { %v3282_v58 = vpop.eup %3281  ;;  %v1959_v43 = vsel %vm1784_vm8, %v1958_v60, %v1954_v36  ;;  %v1457_v12 = vmul.f32 1.442695, %v1338_v57  ;;  %v1800_v57 = vadd.s32 4294967216, %v4533_v38 }
 0x392   : > { %v1427_v54 = vmul.f32 1.442695, %v1323_v22  ;;  %v3284_v14 = vpop.eup %3283  ;;  %v2272_v6 = vrot.slane %v3282_v58, %v4834_v44  ;;  %v1206_v19 = vpop.xlane.xlu1 %1205 }
 0x393   : > { %v1174_v63 = vpop.xlane.xlu0 %1173  ;;  %v2193_v11 = vrot.slane %v3284_v14, %v4834_v44  ;;  %3293 = vpow2.f32 %v1457_v12  ;;  %v1500_v23 = vmul.f32 2.0, %v1206_v19 }
 0x394   : > { %v1484_v61 = vmul.f32 2.0, %v1174_v63  ;;  %v2273_v20 = vsel %vm1791_vm9, %v2272_v6, %v2268_v0  ;;  %3295 = vpow2.f32 %v1427_v54 }
 0x395   : > { %v3286_v24 = vpop.eup %3285  ;;  %v2194_v36 = vsel %vm1791_vm9, %v2193_v11, %v2189_v53  ;;  %v1589_v7 = vmul.f32 1.442695, %v1500_v23  ;;  %v4875_v23 = vsub.s32 %v1800_v57, %v4346_v9 }
 0x396   : > { %v1557_v27 = vmul.f32 1.442695, %v1484_v61  ;;  %v3288_v26 = vpop.eup %3287  ;;  %v2420_v3 = vrot.slane %v3286_v24, %v4592_v10  ;;  %v1266_v28 = vpop.xlane.xlu1 %1265 }
 0x397   : > { %v1236_v18 = vpop.xlane.xlu0 %1235  ;;  %v2346_v1 = vrot.slane %v3288_v26, %v4587_v59  ;;  %3297 = vpow2.f32 %v1589_v7  ;;  %v1530_v35 = vmul.f32 2.0, %v1266_v28 }
 0x398   : > { %v1515_v31 = vmul.f32 2.0, %v1236_v18  ;;  %v2421_v0 = vsel %vm1777_vm7, %v2420_v3, %v2416_v37  ;;  %3299 = vpow2.f32 %v1557_v27  ;;  %vm2511_vm7 = vcmp.eq.s32.totalorder (!%p3007_p2), %v4533_v38, 0 }
 0x399   : > { %v3290_v4 = vpop.eup %3289  ;;  %v2347_v53 = vsel %vm1784_vm8, %v2346_v1, %v2342_v5  ;;  %v1649_v25 = vmul.f32 1.442695, %v1530_v35 }
 0x39a   : > { %v1619_v48 = vmul.f32 1.442695, %v1515_v31  ;;  %v3292_v10 = vpop.eup %3291  ;;  %v1889_v32 = vrot.slane %v3290_v4, %v4855_v62  ;;  %v1080_v34 = vpop.xlane.xlu1 %1079 }
 0x39b   : > { %v1048_v50 = vpop.xlane.xlu0 %1047  ;;  %v1797_v56 = vrot.slane %v3292_v10, %v4855_v62  ;;  %3301 = vpow2.f32 %v1649_v25  ;;  %v1309_v29 = vmul.f32 2.0, %v1080_v34 }
 0x39c   : > { %v1293_v39 = vmul.f32 2.0, %v1048_v50  ;;  %v1890_v16 = vsel %vm1798_vm10, %v1889_v32, %v1885_v49  ;;  %3303 = vpow2.f32 %v1619_v48 }
 0x39d   : > { %v3294_v37 = vpop.eup %3293  ;;  %v1799_v40 = vsel %vm1798_vm10, %v1797_v56, %v1792_v42  ;;  %v1399_v5 = vmul.f32 1.442695, %v1309_v29 }
 0x39e   : > { %v1367_v41 = vmul.f32 1.442695, %v1293_v39  ;;  %v3296_v45 = vpop.eup %3295  ;;  %v2037_v17 = vrot.slane %v3294_v37, %v4587_v59  ;;  %v1140_v13 = vpop.xlane.xlu1 %1139 }
 0x39f   : > { %v1110_v46 = vpop.xlane.xlu0 %1109  ;;  %v1963_v33 = vrot.slane %v3296_v45, %v4834_v44  ;;  %3305 = vpow2.f32 %v1399_v5  ;;  %v1339_v51 = vmul.f32 2.0, %v1140_v13 }
 0x3a0   : > { %v1324_v30 = vmul.f32 2.0, %v1110_v46  ;;  %v2038_v21 = vsel %vm1784_vm8, %v2037_v17, %v2033_v2  ;;  %3307 = vpow2.f32 %v1367_v41 }
 0x3a1   : > { %v3298_v49 = vpop.eup %3297  ;;  %v1964_v52 = vsel %vm1791_vm9, %v1963_v33, %v1959_v43  ;;  %v1459_v55 = vmul.f32 1.442695, %v1339_v51  ;;  %v1807_v51 = vadd.s32 4294967208, %v4533_v38 }
 0x3a2   : > { %v1429_v42 = vmul.f32 1.442695, %v1324_v30  ;;  %v3300_v15 = vpop.eup %3299  ;;  %v2277_v60 = vrot.slane %v3298_v49, %v4855_v62  ;;  %v1208_v22 = vpop.xlane.xlu1 %1207 }
 0x3a3   : > { %v1176_v58 = vpop.xlane.xlu0 %1175  ;;  %v2198_v12 = vrot.slane %v3300_v15, %v4855_v62  ;;  %3309 = vpow2.f32 %v1459_v55  ;;  %v1501_v54 = vmul.f32 2.0, %v1208_v22 }
 0x3a4   : > { %v1485_v14 = vmul.f32 2.0, %v1176_v58  ;;  %v2278_v2 = vsel %vm1798_vm10, %v2277_v60, %v2273_v20  ;;  %3311 = vpow2.f32 %v1429_v42 }
 0x3a5   : > { %v3302_v6 = vpop.eup %3301  ;;  %v2199_v43 = vsel %vm1798_vm10, %v2198_v12, %v2194_v36  ;;  %v1591_v47 = vmul.f32 1.442695, %v1501_v54  ;;  %v4895_v54 = vsub.s32 %v1807_v51, %v4346_v9 }
 0x3a6   : > { %v1559_v19 = vmul.f32 1.442695, %v1485_v14  ;;  %v3304_v63 = vpop.eup %3303  ;;  %v2425_v11 = vrot.slane %v3302_v6, %v4587_v59  ;;  %v1268_v61 = vpop.xlane.xlu1 %1267 }
 0x3a7   : > { %v1238_v24 = vpop.xlane.xlu0 %1237  ;;  %v2351_v7 = vrot.slane %v3304_v63, %v4834_v44  ;;  %3313 = vpow2.f32 %v1591_v47  ;;  %v1531_v27 = vmul.f32 2.0, %v1268_v61 }
 0x3a8   : > { %v1516_v26 = vmul.f32 2.0, %v1238_v24  ;;  %v2426_v20 = vsel %vm1784_vm8, %v2425_v11, %v2421_v0  ;;  %3315 = vpow2.f32 %v1559_v19 }
 0x3a9   : > { %v3306_v3 = vpop.eup %3305  ;;  %v2352_v36 = vsel %vm1791_vm9, %v2351_v7, %v2347_v53  ;;  %v1651_v28 = vmul.f32 1.442695, %v1531_v27 }
 0x3aa   : > { %v1621_v18 = vmul.f32 1.442695, %v1516_v26  ;;  %v3308_v59 = vpop.eup %3307  ;;  %v1894_v1 = vrot.slane %v3306_v3, %v4875_v23  ;;  %v1082_v35 = vpop.xlane.xlu1 %1081 }
 0x3ab   : > { %v1050_v31 = vpop.xlane.xlu0 %1049  ;;  %v1804_v4 = vrot.slane %v3308_v59, %v4875_v23  ;;  %3317 = vpow2.f32 %v1651_v28  ;;  %v1310_v25 = vmul.f32 2.0, %v1082_v35 }
 0x3ac   : > { %v1294_v48 = vmul.f32 2.0, %v1050_v31  ;;  %v1895_v10 = vsel %vm1805_vm11, %v1894_v1, %v1890_v16  ;;  %3319 = vpow2.f32 %v1621_v18 }
 0x3ad   : > { %v3310_v0 = vpop.eup %3309  ;;  %v1806_v32 = vsel %vm1805_vm11, %v1804_v4, %v1799_v40  ;;  %v1401_v53 = vmul.f32 1.442695, %v1310_v25 }
 0x3ae   : > { %v1369_v34 = vmul.f32 1.442695, %v1294_v48  ;;  %v3312_v50 = vpop.eup %3311  ;;  %v2042_v56 = vrot.slane %v3310_v0, %v4834_v44  ;;  %v1142_v29 = vpop.xlane.xlu1 %1141 }
 0x3af   : > { %v1112_v39 = vpop.xlane.xlu0 %1111  ;;  %v1968_v37 = vrot.slane %v3312_v50, %v4855_v62  ;;  %3321 = vpow2.f32 %v1401_v53  ;;  %v1340_v5 = vmul.f32 2.0, %v1142_v29 }
 0x3b0   : > { %v1325_v41 = vmul.f32 2.0, %v1112_v39  ;;  %v2043_v45 = vsel %vm1791_vm9, %v2042_v56, %v2038_v21  ;;  %3323 = vpow2.f32 %v1369_v34 }
 0x3b1   : > { %v3314_v16 = vpop.eup %3313  ;;  %v1969_v17 = vsel %vm1798_vm10, %v1968_v37, %v1964_v52  ;;  %v1461_v13 = vmul.f32 1.442695, %v1340_v5  ;;  %v1814_v5 = vadd.s32 4294967200, %v4533_v38 }
 0x3b2   : > { %v1431_v40 = vmul.f32 1.442695, %v1325_v41  ;;  %v3316_v46 = vpop.eup %3315  ;;  %v2282_v33 = vrot.slane %v3314_v16, %v4875_v23  ;;  %v1210_v30 = vpop.xlane.xlu1 %1209 }
 0x3b3   : > { %v1178_v49 = vpop.xlane.xlu0 %1177  ;;  %v2203_v55 = vrot.slane %v3316_v46, %v4875_v23  ;;  %3325 = vpow2.f32 %v1461_v13  ;;  %v1502_v42 = vmul.f32 2.0, %v1210_v30 }
 0x3b4   : > { %v1486_v15 = vmul.f32 2.0, %v1178_v49  ;;  %v2283_v21 = vsel %vm1805_vm11, %v2282_v33, %v2278_v2  ;;  %3327 = vpow2.f32 %v1431_v40 }
 0x3b5   : > { %v3318_v60 = vpop.eup %3317  ;;  %v2204_v52 = vsel %vm1805_vm11, %v2203_v55, %v2199_v43  ;;  %v1593_v57 = vmul.f32 1.442695, %v1502_v42  ;;  %v4915_v42 = vsub.s32 %v1814_v5, %v4346_v9 }
 0x3b6   : > { %v1561_v22 = vmul.f32 1.442695, %v1486_v15  ;;  %v3320_v58 = vpop.eup %3319  ;;  %v2430_v12 = vrot.slane %v3318_v60, %v4834_v44  ;;  %v1270_v14 = vpop.xlane.xlu1 %1269 }
 0x3b7   : > { %v1240_v6 = vpop.xlane.xlu0 %1239  ;;  %v2356_v47 = vrot.slane %v3320_v58, %v4855_v62  ;;  %3329 = vpow2.f32 %v1593_v57  ;;  %v1532_v19 = vmul.f32 2.0, %v1270_v14 }
 0x3b8   : > { %v1517_v63 = vmul.f32 2.0, %v1240_v6  ;;  %v2431_v2 = vsel %vm1791_vm9, %v2430_v12, %v2426_v20  ;;  %3331 = vpow2.f32 %v1561_v22 }
 0x3b9   : > { %v3322_v11 = vpop.eup %3321  ;;  %v2357_v43 = vsel %vm1798_vm10, %v2356_v47, %v2352_v36  ;;  %v1653_v61 = vmul.f32 1.442695, %v1532_v19 }
 0x3ba   : > { %v1623_v24 = vmul.f32 1.442695, %v1517_v63  ;;  %v3324_v44 = vpop.eup %3323  ;;  %v1899_v7 = vrot.slane %v3322_v11, %v4895_v54  ;;  %v1084_v27 = vpop.xlane.xlu1 %1083 }
 0x3bb   : > { %v1052_v26 = vpop.xlane.xlu0 %1051  ;;  %v1811_v3 = vrot.slane %v3324_v44, %v4895_v54  ;;  %3333 = vpow2.f32 %v1653_v61  ;;  %v1311_v28 = vmul.f32 2.0, %v1084_v27 }
 0x3bc   : > { %v1295_v18 = vmul.f32 2.0, %v1052_v26  ;;  %v1900_v59 = vsel %vm1812_vm12, %v1899_v7, %v1895_v10  ;;  %3335 = vpow2.f32 %v1623_v24 }
 0x3bd   : > { %v3326_v20 = vpop.eup %3325  ;;  %v1813_v1 = vsel %vm1812_vm12, %v1811_v3, %v1806_v32  ;;  %v1403_v36 = vmul.f32 1.442695, %v1311_v28 }
 0x3be   : > { %v1371_v35 = vmul.f32 1.442695, %v1295_v18  ;;  %v3328_v31 = vpop.eup %3327  ;;  %v2047_v4 = vrot.slane %v3326_v20, %v4855_v62  ;;  %v1144_v25 = vpop.xlane.xlu1 %1143 }
 0x3bf   : > { %v1114_v48 = vpop.xlane.xlu0 %1113  ;;  %v1973_v0 = vrot.slane %v3328_v31, %v4875_v23  ;;  %3337 = vpow2.f32 %v1403_v36  ;;  %v1341_v53 = vmul.f32 2.0, %v1144_v25 }
 0x3c0   : > { %v1326_v34 = vmul.f32 2.0, %v1114_v48  ;;  %v2048_v50 = vsel %vm1798_vm10, %v2047_v4, %v2043_v45  ;;  %3339 = vpow2.f32 %v1371_v35 }
 0x3c1   : > { %v3330_v10 = vpop.eup %3329  ;;  %v1974_v56 = vsel %vm1805_vm11, %v1973_v0, %v1969_v17  ;;  %v1463_v29 = vmul.f32 1.442695, %v1341_v53  ;;  %v1821_v53 = vadd.s32 4294967192, %v4533_v38 }
 0x3c2   : > { %v1433_v32 = vmul.f32 1.442695, %v1326_v34  ;;  %v3332_v39 = vpop.eup %3331  ;;  %v2287_v37 = vrot.slane %v3330_v10, %v4895_v54  ;;  %v1212_v41 = vpop.xlane.xlu1 %1211 }
 0x3c3   : > { %v1180_v16 = vpop.xlane.xlu0 %1179  ;;  %v2208_v13 = vrot.slane %v3332_v39, %v4895_v54  ;;  %3341 = vpow2.f32 %v1463_v29  ;;  %v1503_v40 = vmul.f32 2.0, %v1212_v41 }
 0x3c4   : > { %v1487_v46 = vmul.f32 2.0, %v1180_v16  ;;  %v2288_v45 = vsel %vm1812_vm12, %v2287_v37, %v2283_v21  ;;  %3343 = vpow2.f32 %v1433_v32 }
 0x3c5   : > { %v3334_v33 = vpop.eup %3333  ;;  %v2209_v17 = vsel %vm1812_vm12, %v2208_v13, %v2204_v52  ;;  %v1595_v51 = vmul.f32 1.442695, %v1503_v40  ;;  %v4935_v40 = vsub.s32 %v1821_v53, %v4346_v9 }
 0x3c6   : > { %v1563_v30 = vmul.f32 1.442695, %v1487_v46  ;;  %v3336_v49 = vpop.eup %3335  ;;  %v2435_v55 = vrot.slane %v3334_v33, %v4855_v62  ;;  %v1272_v15 = vpop.xlane.xlu1 %1271 }
 0x3c7   : > { %v1242_v60 = vpop.xlane.xlu0 %1241  ;;  %v2361_v57 = vrot.slane %v3336_v49, %v4875_v23  ;;  %3345 = vpow2.f32 %v1595_v51  ;;  %v1533_v22 = vmul.f32 2.0, %v1272_v15 }
 0x3c8   : > { %v1518_v58 = vmul.f32 2.0, %v1242_v60  ;;  %v2436_v21 = vsel %vm1798_vm10, %v2435_v55, %v2431_v2  ;;  %3347 = vpow2.f32 %v1563_v30 }
 0x3c9   : > { %v3338_v12 = vpop.eup %3337  ;;  %v2362_v52 = vsel %vm1805_vm11, %v2361_v57, %v2357_v43  ;;  %v1655_v14 = vmul.f32 1.442695, %v1533_v22 }
 0x3ca   : > { %v1625_v6 = vmul.f32 1.442695, %v1518_v58  ;;  %v3340_v62 = vpop.eup %3339  ;;  %v1904_v47 = vrot.slane %v3338_v12, %v4915_v42  ;;  %v1086_v19 = vpop.xlane.xlu1 %1085 }
 0x3cb   : > { %v1054_v63 = vpop.xlane.xlu0 %1053  ;;  %v1818_v11 = vrot.slane %v3340_v62, %v4915_v42  ;;  %3349 = vpow2.f32 %v1655_v14  ;;  %v1312_v61 = vmul.f32 2.0, %v1086_v19 }
 0x3cc   : > { %v1296_v24 = vmul.f32 2.0, %v1054_v63  ;;  %v1905_v44 = vsel %vm1819_vm13, %v1904_v47, %v1900_v59  ;;  %3351 = vpow2.f32 %v1625_v6 }
 0x3cd   : > { %v3342_v2 = vpop.eup %3341  ;;  %v1820_v7 = vsel %vm1819_vm13, %v1818_v11, %v1813_v1  ;;  %v1405_v43 = vmul.f32 1.442695, %v1312_v61 }
 0x3ce   : > { %v1373_v27 = vmul.f32 1.442695, %v1296_v24  ;;  %v3344_v26 = vpop.eup %3343  ;;  %v2052_v3 = vrot.slane %v3342_v2, %v4875_v23  ;;  %v1146_v28 = vpop.xlane.xlu1 %1145 }
 0x3cf   : > { %v1116_v18 = vpop.xlane.xlu0 %1115  ;;  %v1978_v20 = vrot.slane %v3344_v26, %v4895_v54  ;;  %3353 = vpow2.f32 %v1405_v43  ;;  %v1342_v36 = vmul.f32 2.0, %v1146_v28 }
 0x3d0   : > { %v1327_v35 = vmul.f32 2.0, %v1116_v18  ;;  %v2053_v31 = vsel %vm1805_vm11, %v2052_v3, %v2048_v50  ;;  %3355 = vpow2.f32 %v1373_v27 }
 0x3d1   : > { %v3346_v59 = vpop.eup %3345  ;;  %v1979_v4 = vsel %vm1812_vm12, %v1978_v20, %v1974_v56  ;;  %v1465_v25 = vmul.f32 1.442695, %v1342_v36  ;;  %v1828_v36 = vadd.s32 4294967184, %v4533_v38 }
 0x3d2   : > { %v1435_v1 = vmul.f32 1.442695, %v1327_v35  ;;  %v3348_v48 = vpop.eup %3347  ;;  %v2292_v0 = vrot.slane %v3346_v59, %v4915_v42  ;;  %v1214_v34 = vpop.xlane.xlu1 %1213 }
 0x3d3   : > { %v1182_v10 = vpop.xlane.xlu0 %1181  ;;  %v2213_v29 = vrot.slane %v3348_v48, %v4915_v42  ;;  %3357 = vpow2.f32 %v1465_v25  ;;  %v1504_v32 = vmul.f32 2.0, %v1214_v34 }
 0x3d4   : > { %v1488_v39 = vmul.f32 2.0, %v1182_v10  ;;  %v2293_v50 = vsel %vm1819_vm13, %v2292_v0, %v2288_v45  ;;  %3359 = vpow2.f32 %v1435_v1 }
 0x3d5   : > { %v3350_v37 = vpop.eup %3349  ;;  %v2214_v56 = vsel %vm1819_vm13, %v2213_v29, %v2209_v17  ;;  %v1597_v5 = vmul.f32 1.442695, %v1504_v32  ;;  %v4957_v32 = vsub.s32 %v1828_v36, %v4346_v9 }
 0x3d6   : > { %v1565_v41 = vmul.f32 1.442695, %v1488_v39  ;;  %v3352_v16 = vpop.eup %3351  ;;  %v2440_v13 = vrot.slane %v3350_v37, %v4875_v23  ;;  %v1274_v46 = vpop.xlane.xlu1 %1273 }
 0x3d7   : > { %v1244_v33 = vpop.xlane.xlu0 %1243  ;;  %v2366_v51 = vrot.slane %v3352_v16, %v4895_v54  ;;  %3361 = vpow2.f32 %v1597_v5  ;;  %v1534_v30 = vmul.f32 2.0, %v1274_v46 }
 0x3d8   : > { %v1519_v49 = vmul.f32 2.0, %v1244_v33  ;;  %v2441_v45 = vsel %vm1805_vm11, %v2440_v13, %v2436_v21  ;;  %3363 = vpow2.f32 %v1565_v41 }
 0x3d9   : > { %v3354_v55 = vpop.eup %3353  ;;  %v4940_v17 = vsel %vm1812_vm12, %v2366_v51, %v2362_v52  ;;  %v1657_v15 = vmul.f32 1.442695, %v1534_v30 }
 0x3da   : > { %v1627_v60 = vmul.f32 1.442695, %v1519_v49  ;;  %v3356_v23 = vpop.eup %3355  ;;  %v1909_v57 = vrot.slane %v3354_v55, %v4935_v40  ;;  %v1088_v22 = vpop.xlane.xlu1 %1087 }
 0x3db   : > { %v1056_v58 = vpop.xlane.xlu0 %1055  ;;  %v1825_v12 = vrot.slane %v3356_v23, %v4935_v40  ;;  %3365 = vpow2.f32 %v1657_v15  ;;  %v1313_v14 = vmul.f32 2.0, %v1088_v22 }
 0x3dc   : > { %v1297_v6 = vmul.f32 2.0, %v1056_v58  ;;  %3367 = vpow2.f32 %v1627_v60  ;;  %v1910_v21 = vsel %vm1826_vm14, %v1909_v57, %v1905_v44 }
 0x3dd   : > { %v3358_v62 = vpop.eup %3357  ;;  %v1407_v47 = vmul.f32 1.442695, %v1313_v14  ;;  %v1827_v19 = vsel %vm1826_vm14, %v1825_v12, %v1820_v7 }
 0x3de   : > { %v1375_v52 = vmul.f32 1.442695, %v1297_v6  ;;  %v3360_v63 = vpop.eup %3359  ;;  %v2057_v11 = vrot.slane %v3358_v62, %v4895_v54  ;;  %v1148_v61 = vpop.xlane.xlu1 %1147 }
 0x3df   : > { %v1118_v24 = vpop.xlane.xlu0 %1117  ;;  %v1983_v2 = vrot.slane %v3360_v63, %v4915_v42  ;;  %3369 = vpow2.f32 %v1407_v47  ;;  %v1343_v43 = vmul.f32 2.0, %v1148_v61 }
 0x3e0   : > { %v1328_v27 = vmul.f32 2.0, %v1118_v24  ;;  %3371 = vpow2.f32 %v1375_v52  ;;  %v2058_v26 = vsel %vm1812_vm12, %v2057_v11, %v2053_v31 }
 0x3e1   : > { %v3362_v3 = vpop.eup %3361  ;;  %v1467_v44 = vmul.f32 1.442695, %v1343_v43  ;;  %v1984_v18 = vsel %vm1819_vm13, %v1983_v2, %v1979_v4  ;;  %v1835_v43 = vadd.s32 4294967176, %v4533_v38 }
 0x3e2   : > { %v1437_v28 = vmul.f32 1.442695, %v1328_v27  ;;  %v3364_v20 = vpop.eup %3363  ;;  %v2297_v7 = vrot.slane %v3362_v3, %v4935_v40  ;;  %v1216_v35 = vpop.xlane.xlu1 %1215 }
 0x3e3   : > { %v1184_v59 = vpop.xlane.xlu0 %1183  ;;  %v2218_v25 = vrot.slane %v3364_v20, %v4935_v40  ;;  %3373 = vpow2.f32 %v1467_v44  ;;  %v1505_v1 = vmul.f32 2.0, %v1216_v35 }
 0x3e4   : > { %v1489_v48 = vmul.f32 2.0, %v1184_v59  ;;  %3375 = vpow2.f32 %v1437_v28  ;;  %v2298_v31 = vsel %vm1826_vm14, %v2297_v7, %v2293_v50 }
 0x3e5   : > { %v3366_v0 = vpop.eup %3365  ;;  %v1599_v53 = vmul.f32 1.442695, %v1505_v1  ;;  %v2219_v4 = vsel %vm1826_vm14, %v2218_v25, %v2214_v56  ;;  %v4978_v1 = vsub.s32 %v1835_v43, %v4346_v9 }
 0x3e6   : > { %v1567_v34 = vmul.f32 1.442695, %v1489_v48  ;;  %v3368_v10 = vpop.eup %3367  ;;  %v2445_v29 = vrot.slane %v3366_v0, %v4895_v54  ;;  %v1276_v39 = vpop.xlane.xlu1 %1275 }
 0x3e7   : > { %v1246_v37 = vpop.xlane.xlu0 %1245  ;;  %v2371_v5 = vrot.slane %v3368_v10, %v4915_v42  ;;  %3377 = vpow2.f32 %v1599_v53  ;;  %v1535_v41 = vmul.f32 2.0, %v1276_v39 }
 0x3e8   : > { %v1520_v16 = vmul.f32 2.0, %v1246_v37  ;;  %3379 = vpow2.f32 %v1567_v34  ;;  %v2446_v50 = vsel %vm1812_vm12, %v2445_v29, %v2441_v45 }
 0x3e9   : > { %v3370_v13 = vpop.eup %3369  ;;  %v1659_v46 = vmul.f32 1.442695, %v1535_v41  ;;  %v2372_v54 = vsel %vm1819_vm13, %v2371_v5, %v4940_v17 }
 0x3ea   : > { %v1629_v33 = vmul.f32 1.442695, %v1520_v16  ;;  %v3372_v56 = vpop.eup %3371  ;;  %v1914_v51 = vrot.slane %v3370_v13, %v4957_v32  ;;  %v1090_v30 = vpop.xlane.xlu1 %1089 }
 0x3eb   : > { %v1058_v49 = vpop.xlane.xlu0 %1057  ;;  %v1832_v55 = vrot.slane %v3372_v56, %v4957_v32  ;;  %3381 = vpow2.f32 %v1659_v46  ;;  %v1314_v15 = vmul.f32 2.0, %v1090_v30 }
 0x3ec   : > { %v1298_v60 = vmul.f32 2.0, %v1058_v49  ;;  %3383 = vpow2.f32 %v1629_v33  ;;  %v1915_v45 = vsel %vm1833_vm15, %v1914_v51, %v1910_v21 }
 0x3ed   : > { %v3374_v23 = vpop.eup %3373  ;;  %v1409_v57 = vmul.f32 1.442695, %v1314_v15  ;;  %v1834_v58 = vsel %vm1833_vm15, %v1832_v55, %v1827_v19 }
 0x3ee   : > { %v1377_v22 = vmul.f32 1.442695, %v1298_v60  ;;  %v3376_v12 = vpop.eup %3375  ;;  %v2062_v17 = vrot.slane %v3374_v23, %v4915_v42  ;;  %v1150_v14 = vpop.xlane.xlu1 %1149 }
 0x3ef   : > { %v1120_v6 = vpop.xlane.xlu0 %1119  ;;  %v1988_v62 = vrot.slane %v3376_v12, %v4935_v40  ;;  %3385 = vpow2.f32 %v1409_v57  ;;  %v1344_v47 = vmul.f32 2.0, %v1150_v14 }
 0x3f0   : > { %v1329_v52 = vmul.f32 2.0, %v1120_v6  ;;  %3387 = vpow2.f32 %v1377_v22  ;;  %v2063_v63 = vsel %vm1819_vm13, %v2062_v17, %v2058_v26 }
 0x3f1   : > { %v3378_v11 = vpop.eup %3377  ;;  %v1469_v21 = vmul.f32 1.442695, %v1344_v47  ;;  %v1989_v24 = vsel %vm1826_vm14, %v1988_v62, %v1984_v18 }
 0x3f2   : > { %v1439_v61 = vmul.f32 1.442695, %v1329_v52  ;;  %v3380_v2 = vpop.eup %3379  ;;  %v2302_v19 = vrot.slane %v3378_v11, %v4957_v32  ;;  %v1218_v27 = vpop.xlane.xlu1 %1217 }
 0x3f3   : > { %v1186_v3 = vpop.xlane.xlu0 %1185  ;;  %v2223_v44 = vrot.slane %v3380_v2, %v4957_v32  ;;  %3389 = vpow2.f32 %v1469_v21  ;;  %v1506_v28 = vmul.f32 2.0, %v1218_v27 }
 0x3f4   : > { %v1490_v20 = vmul.f32 2.0, %v1186_v3  ;;  %3391 = vpow2.f32 %v1439_v61  ;;  %v2303_v26 = vsel %vm1833_vm15, %v2302_v19, %v2298_v31 }
 0x3f5   : > { %v3382_v7 = vpop.eup %3381  ;;  %v1601_v36 = vmul.f32 1.442695, %v1506_v28  ;;  %v2224_v18 = vsel %vm1833_vm15, %v2223_v44, %v2219_v4 }
 0x3f6   : > { %v1569_v35 = vmul.f32 1.442695, %v1490_v20  ;;  %v3384_v59 = vpop.eup %3383  ;;  %v2450_v25 = vrot.slane %v3382_v7, %v4915_v42  ;;  %v1278_v48 = vpop.xlane.xlu1 %1277 }
 0x3f7   : > { %v1248_v0 = vpop.xlane.xlu0 %1247  ;;  %v2376_v53 = vrot.slane %v3384_v59, %v4935_v40  ;;  %3393 = vpow2.f32 %v1601_v36  ;;  %v1536_v34 = vmul.f32 2.0, %v1278_v48  ;;  %v2473_v59 = vstv %s3005_s27 }
 0x3f8   : > { %v1521_v10 = vmul.f32 2.0, %v1248_v0  ;;  %3395 = vpow2.f32 %v1569_v35  ;;  %v2451_v31 = vsel %vm1819_vm13, %v2450_v25, %v2446_v50 }
 0x3f9   : > { %v3386_v29 = vpop.eup %3385  ;;  %v1661_v39 = vmul.f32 1.442695, %v1536_v34  ;;  %v2377_v4 = vsel %vm1826_vm14, %v2376_v53, %v2372_v54 }
 0x3fa   : > { %v1631_v37 = vmul.f32 1.442695, %v1521_v10  ;;  %v3388_v42 = vpop.eup %3387  ;;  %v1919_v9 = vrot.slane %v3386_v29, %v4978_v1  ;;  %v1152_v5 = vpop.xlane.xlu1 %1151 }
 0x3fb   : > { %v1122_v41 = vpop.xlane.xlu0 %1121  ;;  %v1839_v16 = vrot.slane %v3388_v42, %v4978_v1  ;;  %3397 = vpow2.f32 %v1661_v39  ;;  %v1345_v13 = vmul.f32 2.0, %v1152_v5 }
 0x3fc   : > { %v1330_v46 = vmul.f32 2.0, %v1122_v41  ;;  %3399 = vpow2.f32 %v1631_v37  ;;  %v1920_v50 = vsel %vm1840_vm0, %v1919_v9, %v1915_v45 }
 0x3fd   : > { %v3390_v33 = vpop.eup %3389  ;;  %v1471_v56 = vmul.f32 1.442695, %v1345_v13  ;;  %v1841_v30 = vsel %vm1840_vm0, %v1839_v16, %v1834_v58 }
 0x3fe   : > { %v1441_v51 = vmul.f32 1.442695, %v1330_v46  ;;  %v3392_v54 = vpop.eup %3391  ;;  %v2067_v49 = vrot.slane %v3390_v33, %v4935_v40  ;;  %v1280_v55 = vpop.xlane.xlu1 %1279  ;;  %v2080_v60 = vsel %vm2079_vm1, %v1920_v50, %v1841_v30 }
 0x3ff   : > { %v1250_v15 = vpop.xlane.xlu0 %1249  ;;  %v1993_v23 = vrot.slane %v3392_v54, %v4957_v32  ;;  %3401 = vpow2.f32 %v1471_v56  ;;  %v1537_v57 = vmul.f32 2.0, %v1280_v55 }
 0x400   : > { %v1522_v22 = vmul.f32 2.0, %v1250_v15  ;;  %3403 = vpow2.f32 %v1441_v51  ;;  %v2068_v45 = vsel %vm1826_vm14, %v2067_v49, %v2063_v63 }
 0x401   : > { %v3394_v12 = vpop.eup %3393  ;;  %v1663_v17 = vmul.f32 1.442695, %v1537_v57  ;;  %v1994_v58 = vsel %vm1833_vm15, %v1993_v23, %v1989_v24 }
 0x402   : > { %v1633_v14 = vmul.f32 1.442695, %v1522_v22  ;;  %v3396_v6 = vpop.eup %3395  ;;  %v2307_v62 = vrot.slane %v3394_v12, %v4978_v1  ;;  %v1282_v47 = vpop.xlane.xlu1 %1281 }
 0x403   : > { %v1154_v52 = vpop.xlane.xlu0 %1153  ;;  %v2228_v11 = vrot.slane %v3396_v6, %v4978_v1  ;;  %3405 = vpow2.f32 %v1663_v17  ;;  %v1538_v21 = vmul.f32 2.0, %v1282_v47 }
 0x404   : > { %v1346_v61 = vmul.f32 2.0, %v1154_v52  ;;  %3407 = vpow2.f32 %v1633_v14  ;;  %v2308_v2 = vsel %vm1840_vm0, %v2307_v62, %v2303_v26 }
 0x405   : > { %v3398_v63 = vpop.eup %3397  ;;  %v1665_v19 = vmul.f32 1.442695, %v1538_v21  ;;  %v2229_v27 = vsel %vm1840_vm0, %v2228_v11, %v2224_v18 }
 0x406   : > { %v1473_v43 = vmul.f32 1.442695, %v1346_v61  ;;  %v3400_v24 = vpop.eup %3399  ;;  %v2455_v3 = vrot.slane %v3398_v63, %v4935_v40  ;;  %v2467_v44 = vsel %vm2079_vm1, %v2308_v2, %v2229_v27 }
 0x407   : > { %v2381_v28 = vrot.slane %v3400_v24, %v4957_v32  ;;  %3409 = vpow2.f32 %v1665_v19 }
 0x408   : > { %3411 = vpow2.f32 %v1473_v43  ;;  %v2456_v20 = vsel %vm1826_vm14, %v2455_v3, %v2451_v31  ;;  %v2474_v31 = vadd.s32 %v2473_v59, %v4533_v38 }
 0x409   : > { %v3402_v7 = vpop.eup %3401  ;;  %v2382_v36 = vsel %vm1833_vm15, %v2381_v28, %v2377_v4 }
 0x40a   : > { %v3404_v26 = vpop.eup %3403  ;;  %v2072_v35 = vrot.slane %v3402_v7, %v4957_v32  ;;  %vm2475_vm4 = vcmp.lt.s32.totalorder %v2474_v31, 201 }
 0x40b   : > { %v1998_v18 = vrot.slane %v3404_v26, %v4978_v1 }
 0x40c   : > { %v2073_v40 = vsel %vm1833_vm15, %v2072_v35, %v2068_v45 }
 0x40d   : > { %v3406_v25 = vpop.eup %3405  ;;  %v1999_v48 = vsel %vm1840_vm0, %v1998_v18, %v1994_v58 }
 0x40e   : > { %v3408_v0 = vpop.eup %3407  ;;  %v2460_v53 = vrot.slane %v3406_v25, %v4957_v32  ;;  %v2082_v34 = vsel %vm2081_vm2, %v1999_v48, %v2080_v60 }
 0x40f   : > { %v2386_v10 = vrot.slane %v3408_v0, %v4978_v1 }
 0x410   : > { %v2461_v29 = vsel %vm1833_vm15, %v2460_v53, %v2456_v20 }
 0x411   : > { %v3410_v39 = vpop.eup %3409  ;;  %v2387_v37 = vsel %vm1840_vm0, %v2386_v10, %v2382_v36 }
 0x412   : > { %v3412_v4 = vpop.eup %3411  ;;  %v2465_v42 = vrot.slane %v3410_v39, %v4978_v1  ;;  %v2468_v9 = vsel %vm2081_vm2, %v2387_v37, %v2467_v44 }
 0x413   : > { %v2077_v32 = vrot.slane %v3412_v4, %v4978_v1 }
 0x414   : > { %v2466_v5 = vsel %vm1840_vm0, %v2465_v42, %v2461_v29 }
 0x415   : > { %v2469_v41 = vsel %vm2083_vm3, %v2466_v5, %v2468_v9  ;;  %v2078_v16 = vsel %vm1840_vm0, %v2077_v32, %v2073_v40 }
 0x416   : > { %v2493_v13 = vsel %vm2475_vm4, %v2469_v41, 0.0  ;;  %2471 = vst [vmem:[%s5112_s13] sm:$0xf] %v2469_v41  ;;  %v2084_v46 = vsel %vm2083_vm3, %v2078_v16, %v2082_v34 }
 0x417   : > { %v2494_v50 = vsel %vm2478_vm5, %v2493_v13, 0.0  ;;  %v2477_v33 = vsel %vm2475_vm4, %v2084_v46, 0.0  ;;  %2086 = vst [vmem:[%s5113_s5] sm:$0xf] %v2084_v46 }
 0x418   : > { %2495 = vadd.xlane.f32.xlu1 %v2494_v50  ;;  %v2479_v56 = vsel %vm2478_vm5, %v2477_v33, 0.0 }
 0x419   : > { %2480 = vadd.xlane.f32.xlu0 %v2479_v56 }
 0x4a5   : > { %v2496_v51 = vpop.xlane.xlu1 %2495 }
 0x4a6   : > { %v2497_v30 = vrot.slane %v2496_v51, 4  ;;  %v2481_v54 = vpop.xlane.xlu0 %2480 }
 0x4a7   : > { %v2482_v49 = vrot.slane %v2481_v54, 4 }
 0x4a8   : > { %v2498_v1 = vadd.f32 %v2497_v30, %v2496_v51 }
 0x4a9   : > { %v2483_v55 = vadd.f32 %v2482_v49, %v2481_v54 }
 0x4aa   : > { %v2499_v15 = vrot.slane %v2498_v1, 2 }
 0x4ab   : > { %v2484_v60 = vrot.slane %v2483_v55, 2 }
 0x4ac   : > { %v2500_v23 = vadd.f32 %v2499_v15, %v2498_v1 }
 0x4ad   : > { %v2485_v57 = vadd.f32 %v2484_v60, %v2483_v55 }
 0x4ae   : > { %v2501_v22 = vrot.slane %v2500_v23, 1 }
 0x4af   : > { %v2486_v45 = vrot.slane %v2485_v57, 1 }
 0x4b0   : > { %v2502_v12 = vadd.f32 %v2501_v22, %v2500_v23 }
 0x4b1   : > { %v2487_v17 = vadd.f32 %v2486_v45, %v2485_v57 }
 0x4b3   : > { %3023 = vpush %v2487_v17 }
 0x4b4   : > { %3025 = vpush %v2502_v12 }
 0x4e2   : > { %2510 = sbr.rel (%p3007_p2) target bundleno = 1447 (0x5a7), region = 96 }
 0x4e4   : > { %s3024_s19 = spop %3023 }
 0x4e5   : > { %s2489_s21 = sadd.f32 %s3024_s19, %s2476_s15  ;;  %s3026_s26 = spop %3025 }
 0x4e6   : > { %s2504_s3 = sadd.f32 %s3026_s26, %s3006_s23 }
 0x4e7   : > { %2491 = sst [smem:[#allocation5]] %s2489_s21 }
 0x4e8   : > { %2506 = sst [smem:[#allocation5 + $0x1]] %s2504_s3  ;;  %s2512_s25 = sld [smem:[#allocation5]] (!%p3007_p2) }
 0x4e9   : > { %s3008_s29 = sld [smem:[#allocation5 + $0x1]] }
 0x4ee   : > { %v2517_v58 = vstv %s2512_s25 }
 0x4ef   : > { %v2515_v14 = vstv %s3008_s29 }
 0x4f0   : > { %v2516_v6 = vsel %vm2513_vm6, %v2515_v14, 0.0 }
 0x4f1   : > { %v2518_v62 = vsel %vm2511_vm7, %v2517_v58, %v2516_v6 }
 0x4f2   : > { %2519 = vst [vmem:[%s5114_s6] sm:$0x1] %v2518_v62 }
 0x4f3   : > { %3787 = dma.done.wait [#allocation7], 128 }
 0x4f4   : > { %3788 = vsyncadd [#allocation7], 4294967168  ;;  %v2526_v47 = vld [vmem:[#allocation4 + $0x4] sm:$0x3]  ;;  %v2530_v52 = vld [vmem:[#allocation3 + $0x4] sm:$0x3] }
 0x4f5   : > { %v2524_v11 = vld [vmem:[#allocation4] sm:$0x3]  ;;  %v2538_v21 = vrot.slane %v2526_v47, 1  ;;  %v2550_v61 = vmul.f32 0.5, %v2530_v52  ;;  %v2528_v2 = vld [vmem:[#allocation3] sm:$0x3] }
 0x4f6   : > { %v2536_v63 = vrot.slane %v2524_v11, 1  ;;  %v2581_v19 = vmul.f32 0.5, %v2524_v11  ;;  %v2548_v43 = vmul.f32 0.5, %v2528_v2  ;;  %v2527_v38 = vld [vmem:[#allocation4 + $0x6] sm:$0x3]  ;;  %v2589_v24 = vrot.slane %v2528_v2, 1 }
 0x4f7   : > { %v2531_v27 = vld [vmem:[#allocation3 + $0x6] sm:$0x3]  ;;  %v2546_v3 = vmul.f32 0.5, %v2538_v21  ;;  %v2539_v28 = vrot.slane %v2527_v38, 1  ;;  %v2525_v7 = vld [vmem:[#allocation4 + $0x2] sm:$0x3] }
 0x4f8   : > { %v2544_v44 = vmul.f32 0.5, %v2536_v63  ;;  %v2551_v20 = vmul.f32 0.5, %v2531_v27  ;;  %vm2560_vm8 = vcmask 1040384   ;;  %v2529_v36 = vld [vmem:[#allocation3 + $0x2] sm:$0x3]  ;;  %v2537_v26 = vrot.slane %v2525_v7, 1 }
 0x4f9   : > { %v2582_v35 = vmul.f32 0.5, %v2525_v7  ;;  %v2597_v18 = vmul.f32 0.5, %v2589_v24  ;;  %v2554_v59 = vadd.f32 %v2550_v61, %v2546_v3  ;;  %v2547_v25 = vmul.f32 0.5, %v2539_v28  ;;  %s5117_s8 = sld [smem:[#allocation37_spill]] }
 0x4fa   : > { %v2552_v40 = vadd.f32 %v2548_v43, %v2544_v44  ;;  %v2549_v48 = vmul.f32 0.5, %v2529_v36  ;;  %v2545_v0 = vmul.f32 0.5, %v2537_v26  ;;  %v2590_v53 = vrot.slane %v2529_v36, 1 }
 0x4fb   : > { %v2584_v34 = vmul.f32 0.5, %v2527_v38  ;;  %v2592_v10 = vrot.slane %v2531_v27, 1  ;;  %v2558_v31 = vmul.f32 %v2554_v59, %v2554_v59  ;;  %v2555_v39 = vadd.f32 %v2551_v20, %v2547_v25 }
 0x4fc   : > { %v2556_v29 = vmul.f32 %v2552_v40, %v2552_v40  ;;  %v5025_v37 = vadd.f32 %v2597_v18, %v2581_v19  ;;  %v2553_v4 = vadd.f32 %v2549_v48, %v2545_v0  ;;  %v2598_v42 = vmul.f32 0.5, %v2590_v53 }
 0x4fd   : > { %v2600_v9 = vmul.f32 0.5, %v2592_v10  ;;  %v2583_v32 = vmul.f32 0.5, %v2526_v47  ;;  %v2567_v5 = vsel %vm2560_vm8, %v2558_v31, 0.0  ;;  %v2559_v16 = vmul.f32 %v2555_v39, %v2555_v39 }
 0x4fe   : > { %v2561_v41 = vsel %vm2560_vm8, %v2556_v29, 0.0  ;;  %v2591_v13 = vrot.slane %v2530_v52, 1  ;;  %2568 = vadd.xlane.f32.xlu1 %v2567_v5  ;;  %v2557_v46 = vmul.f32 %v2553_v4, %v2553_v4  ;;  %v2602_v50 = vadd.f32 %v2598_v42, %v2582_v35 }
 0x4ff   : > { %2562 = vadd.xlane.f32.xlu0 %v2561_v41  ;;  %v2570_v33 = vsel %vm2560_vm8, %v2559_v16, 0.0  ;;  %v2605_v56 = vmul.f32 %v5025_v37, %v5025_v37  ;;  %v2604_v51 = vadd.f32 %v2600_v9, %v2584_v34  ;;  %vm5038_vm9 = vcmp.lt.s32.totalorder %v859_v8, 128 }
 0x500   : > { %v2599_v30 = vmul.f32 0.5, %v2591_v13  ;;  %v2564_v54 = vsel %vm2560_vm8, %v2557_v46, 0.0  ;;  %v2606_v49 = vmul.f32 %v2602_v50, %v2602_v50 }
 0x501   : > { %v2609_v15 = vsel %vm2560_vm8, %v2605_v56, 0.0  ;;  %v2608_v60 = vmul.f32 %v2604_v51, %v2604_v51 }
 0x502   : > { %v2603_v1 = vadd.f32 %v2599_v30, %v2583_v32  ;;  %2571 = vadd.xlane.f32.xlu1 %v2570_v33  ;;  %v2612_v55 = vsel %vm2560_vm8, %v2606_v49, 0.0 }
 0x503   : > { %2565 = vadd.xlane.f32.xlu0 %v2564_v54  ;;  %v2618_v57 = vsel %vm2560_vm8, %v2608_v60, 0.0 }
 0x504   : > { %v2607_v23 = vmul.f32 %v2603_v1, %v2603_v1 }
 0x506   : > { %2613 = vadd.xlane.f32.xlu1 %v2612_v55  ;;  %v2615_v22 = vsel %vm2560_vm8, %v2607_v23, 0.0 }
 0x507   : > { %2610 = vadd.xlane.f32.xlu0 %v2609_v15 }
 0x50a   : > { %2619 = vadd.xlane.f32.xlu1 %v2618_v57 }
 0x50b   : > { %2616 = vadd.xlane.f32.xlu0 %v2615_v22 }
 0x58b   : > { %v2569_v45 = vpop.xlane.xlu1 %2568 }
 0x58c   : > { %v2563_v12 = vpop.xlane.xlu0 %2562  ;;  %3413 = vrsqrt.f32 %v2569_v45 }
 0x58d   : > { %3415 = vrsqrt.f32 %v2563_v12 }
 0x58f   : > { %v2572_v17 = vpop.xlane.xlu1 %2571 }
 0x590   : > { %v2566_v14 = vpop.xlane.xlu0 %2565  ;;  %3417 = vrsqrt.f32 %v2572_v17 }
 0x591   : > { %3419 = vrsqrt.f32 %v2566_v14 }
 0x593   : > { %v2614_v58 = vpop.xlane.xlu1 %2613 }
 0x594   : > { %v2611_v6 = vpop.xlane.xlu0 %2610  ;;  %3421 = vrsqrt.f32 %v2614_v58 }
 0x595   : > { %3423 = vrsqrt.f32 %v2611_v6 }
 0x596   : > { %v3414_v62 = vpop.eup %3413 }
 0x597   : > { %v3416_v52 = vpop.eup %3415  ;;  %v2579_v11 = vmul.f32 %v3414_v62, %v2554_v59  ;;  %v2620_v21 = vpop.xlane.xlu1 %2619 }
 0x598   : > { %v2617_v61 = vpop.xlane.xlu0 %2616  ;;  %v2577_v2 = vmul.f32 %v3416_v52, %v2552_v40  ;;  %3425 = vrsqrt.f32 %v2620_v21 }
 0x599   : > { %2639 = vst.msk [vmem:[%s5117_s8 + $0x5] sm:$0x1] %vm5038_vm9, %v2579_v11  ;;  %3427 = vrsqrt.f32 %v2617_v61 }
 0x59a   : > { %v3418_v63 = vpop.eup %3417  ;;  %2637 = vst.msk [vmem:[%s5117_s8 + $0x1] sm:$0x1] %vm5038_vm9, %v2577_v2 }
 0x59b   : > { %v3420_v8 = vpop.eup %3419  ;;  %v2580_v19 = vmul.f32 %v3418_v63, %v2555_v39 }
 0x59c   : > { %v2578_v43 = vmul.f32 %v3420_v8, %v2553_v4 }
 0x59d   : > { %2640 = vst.msk [vmem:[%s5117_s8 + $0x7] sm:$0x1] %vm5038_vm9, %v2580_v19 }
 0x59e   : > { %v3422_v38 = vpop.eup %3421  ;;  %2638 = vst.msk [vmem:[%s5117_s8 + $0x3] sm:$0x1] %vm5038_vm9, %v2578_v43 }
 0x59f   : > { %v3424_v27 = vpop.eup %3423  ;;  %v2626_v24 = vmul.f32 %v3422_v38, %v2602_v50 }
 0x5a0   : > { %v2625_v3 = vmul.f32 %v3424_v27, %v5025_v37 }
 0x5a1   : > { %2634 = vst.msk [vmem:[%s5117_s8 + $0x2] sm:$0x1] %vm5038_vm9, %v2626_v24 }
 0x5a2   : > { %v3426_v44 = vpop.eup %3425  ;;  %2633 = vst.msk [vmem:[%s5117_s8] sm:$0x1] %vm5038_vm9, %v2625_v3 }
 0x5a3   : > { %v3428_v28 = vpop.eup %3427  ;;  %v2628_v20 = vmul.f32 %v3426_v44, %v2604_v51 }
 0x5a4   : > { %v2627_v7 = vmul.f32 %v3428_v28, %v2603_v1 }
 0x5a5   : > { %2636 = vst.msk [vmem:[%s5117_s8 + $0x6] sm:$0x1] %vm5038_vm9, %v2628_v20 }
 0x5a6   : > { %2635 = vst.msk [vmem:[%s5117_s8 + $0x4] sm:$0x1] %vm5038_vm9, %v2627_v7 }
 0x5a7 PF: > { %s5118_s13 = sld [smem:[#allocation29_spill]] }
 0x5ad   : > { %s29_s1 = sadd.s32 1, %s5118_s13  }
 0x5ae   : > { %p26_p3 = scmp.ge.s32.totalorder %s29_s1, 4  }
 0x5b0   :  { %28 = sbr.rel (!%p26_p3) target bundleno = 29 (0x1d), region = 285 }
 0x5b7   :  { %2686 = vsyncmov [#allocation6] }
 0x5ba   :  { %s2687_s5 = vpop.sfrf %2686 }
 0x5bb   :  { %p3011_p4 = scmp.ne.s32.totalorder %s2687_s5, 0 }
 0x5bd   :  { %2691 = shalt.err (%p3011_p4)  }
 0x5be   :  { %2693 = vsyncmov [#allocation6 + $0x1] }
 0x5c1   :  { %s2694_s15 = vpop.sfrf %2693 }
 0x5c2   :  { %p3012_p5 = scmp.ne.s32.totalorder %s2694_s15, 0 }
 0x5c4   :  { %2698 = shalt.err (%p3012_p5)  }
 0x5c5   :  { %2700 = vsyncmov [#allocation6 + $0x2] }
 0x5c8   :  { %s2701_s23 = vpop.sfrf %2700 }
 0x5c9   :  { %p3013_p6 = scmp.ne.s32.totalorder %s2701_s23, 0 }
 0x5cb   :  { %2705 = shalt.err (%p3013_p6)  }
 0x5cc   :  { %2707 = vsyncmov [#allocation6 + $0x3] }
 0x5cf   :  { %s2708_s19 = vpop.sfrf %2707 }
 0x5d0   :  { %p3014_p7 = scmp.ne.s32.totalorder %s2708_s19, 0 }
 0x5d2   :  { %2712 = shalt.err (%p3014_p7)  }
 0x5d3   :  { %2714 = vsyncmov [#allocation6 + $0x4] }
 0x5d6   :  { %s2715_s21 = vpop.sfrf %2714 }
 0x5d7   :  { %p3015_p8 = scmp.ne.s32.totalorder %s2715_s21, 0 }
 0x5d9   :  { %2719 = shalt.err (%p3015_p8)  }
 0x5da   :  { %2721 = vsyncmov [#allocation6 + $0x5] }
 0x5dd   :  { %s2722_s4 = vpop.sfrf %2721 }
 0x5de   :  { %p3016_p9 = scmp.ne.s32.totalorder %s2722_s4, 0 }
 0x5e0   :  { %2726 = shalt.err (%p3016_p9)  }
 0x5e1   :  { %2728 = vsyncmov [#allocation6 + $0x6] }
 0x5e4   :  { %s2729_s26 = vpop.sfrf %2728 }
 0x5e5   :  { %p3017_p10 = scmp.ne.s32.totalorder %s2729_s26, 0 }
 0x5e7   :  { %2733 = shalt.err (%p3017_p10)  }
 0x5e8   :  { %2735 = vsyncmov [#allocation6 + $0x7] }
 0x5eb   :  { %s2736_s3 = vpop.sfrf %2735 }
 0x5ec   :  { %p3018_p11 = scmp.ne.s32.totalorder %s2736_s3, 0 }
 0x5ee   :  { %2740 = shalt.err (%p3018_p11)  }
 0x5ef   :  { %2741 = vsyncmov [#allocation7] }
 0x5f2   :  { %s2742_s25 = vpop.sfrf %2741 }
 0x5f3   :  { %p3019_p12 = scmp.ne.s32.totalorder %s2742_s25, 0 }
 0x5f5   :  { %2746 = shalt.err (%p3019_p12)  }

</bundles_post_ra>
